<compile_context>
chip_gen: v7x
topology: tpu7x:2x2x1
jax: 0.10.0
libtpu: 0.0.40
codegen_flags: <defaults>
</compile_context>

<pallas_src>
import functools

import jax
import jax.numpy as jnp
from jax.experimental import pallas as pl
from jax.experimental.pallas import tpu as pltpu

EPS = 1e-5
_BLOCK_BUDGET = 4 * 1024 * 1024      # target bytes per streaming input block
_VMEM_FLOOR = 24 * 1024 * 1024
_VMEM_CAP = 48 * 1024 * 1024         # leaves headroom on v7x's 64 MiB VMEM


# ---------------------------------------------------------------------------
# Tiling / budgeting helpers (all Python ints, trace-time only)
# ---------------------------------------------------------------------------
def _itemsize(dtype):
    return jnp.dtype(dtype).itemsize


def _pad_up(v, m):
    return -(-v // m) * m


def _padded_block_bytes(shape, itemsize):
    """VMEM bytes of one block after (8,128) tiling of the last two dims."""
    if len(shape) < 2:
        return _pad_up(int(shape[0]) if shape else 1, 128) * itemsize
    lead = 1
    for d in shape[:-2]:
        lead *= d
    return lead * _pad_up(shape[-2], 8) * _pad_up(shape[-1], 128) * itemsize


def _vmem_limit(blocks):
    """Double-buffered working-set estimate, clamped for v5e/v6e/v7x."""
    need = 2 * 1024 * 1024            # compiler scratch slack
    for shape, dtype in blocks:
        need += 2 * _padded_block_bytes(shape, _itemsize(dtype))
    return int(min(max(need, _VMEM_FLOOR), _VMEM_CAP))


def _channel_tile(C, dtype, cap=64):
    """Largest divisor of C that is a sublane-quantum multiple and <= cap."""
    q = max(8, 32 // _itemsize(dtype))        # 8 f32, 16 bf16, 32 int8/fp8
    for mult in (q, 8):
        best = 0
        for ct in range(mult, min(C, cap) + 1, mult):
            if C % ct == 0:
                best = ct
        if best:
            return best
    return C                                   # full dim (always legal)


def _spatial_tile(hw, per_col_bytes, budget=_BLOCK_BUDGET):
    """Largest lane-dense (multiple of 128) divisor of hw within budget."""
    if hw * per_col_bytes <= budget:
        return hw
    t = max(128, (budget // per_col_bytes) // 128 * 128)
    while t >= 128:
        if hw % t == 0:
            return t
        t -= 128
    # TODO(synk): pad hw to a multiple of 128 and mask the tail instead of
    # falling back to a full (possibly oversized) lane dimension.
    return hw


def _batch_tile(N, row_bytes, budget=_BLOCK_BUDGET):
    best = 1
    for nb in range(1, N + 1):
        if N % nb == 0 and nb * row_bytes <= budget:
            best = nb
    return best


def _fused_group_batch(NG, cpg, hw, itemsize, budget=_BLOCK_BUDGET):
    """# of (sample, group) units per fused-GN block; 0 if one unit won't fit."""
    per_group = _pad_up(cpg, 8) * _pad_up(hw, 128) * itemsize
    if per_group > budget:
        return 0
    cap = min(NG, max(1, budget // per_group))
    best = 1
    for gb in range(1, cap + 1):
        if NG % gb == 0:
            best = gb
    return best


# ---------------------------------------------------------------------------
# Kernels
# ---------------------------------------------------------------------------
def _sums_kernel(x_ref, s_ref, ss_ref):
    """Per-(n, c) sum / sum-of-squares with a resident accumulator over the
    innermost (spatial) grid axis.  x_ref: (nb, ct, st); s/ss: (nb, ct, 1)."""
    @pl.when(pl.program_id(2) == 0)
    def _():
        s_ref[...] = jnp.zeros_like(s_ref)
        ss_ref[...] = jnp.zeros_like(ss_ref)

    x = x_ref[...].astype(jnp.float32)
    s_ref[...] += jnp.sum(x, axis=-1, keepdims=True)
    ss_ref[...] += jnp.sum(x * x, axis=-1, keepdims=True)


def _affine_kernel(x_ref, scale_ref, shift_ref, o_ref):
    """y = x * scale[n, c] + shift[n, c]; lane-dense streaming apply."""
    x = x_ref[...]
    scale = scale_ref[...].astype(x.dtype)
    shift = shift_ref[...].astype(x.dtype)
    o_ref[...] = (x * scale + shift).astype(o_ref.dtype)


def _gn_fused_kernel(x_ref, w_ref, b_ref, o_ref, *, eps, inv_n):
    """One-pass GroupNorm over a batch of gb (sample, group) units.
    x_ref: (gb, cpg, hw); w_ref/b_ref: (gb, cpg, 1)."""
    x = x_ref[...].astype(jnp.float32)
    # Single pass of sum / sumsq (lane reduce, then tiny sublane reduce).
    row_s = jnp.sum(x, axis=2, keepdims=True)            # (gb, cpg, 1)
    row_q = jnp.sum(x * x, axis=2, keepdims=True)        # (gb, cpg, 1)
    mean = jnp.sum(row_s, axis=1, keepdims=True) * inv_n  # (gb, 1, 1)
    msq = jnp.sum(row_q, axis=1, keepdims=True) * inv_n
    var = jnp.maximum(msq - mean * mean, 0.0)
    rstd = jax.lax.rsqrt(var + eps)
    scale = w_ref[...].astype(jnp.float32) * rstd          # (gb, cpg, 1)
    shift = b_ref[...].astype(jnp.float32) - mean * scale
    o_ref[...] = (x * scale + shift).astype(o_ref.dtype)


# ---------------------------------------------------------------------------
# Shared pallas_call wrappers
# ---------------------------------------------------------------------------
def _per_nc_sums(x3):
    """x3: (N, C, hw) -> per-(n, c) sum and sumsq, each (N, C, 1) float32."""
    N, C, hw = x3.shape
    isz = _itemsize(x3.dtype)
    ct = _channel_tile(C, x3.dtype)
    st = _spatial_tile(hw, ct * isz)
    nb = _batch_tile(N, ct * st * isz)
    grid = (N // nb, C // ct, hw // st)
    x_spec = pl.BlockSpec((nb, ct, st), lambda n, c, s: (n, c, s))
    stat_spec = pl.BlockSpec((nb, ct, 1), lambda n, c, s: (n, c, 0))
    return pl.pallas_call(
        _sums_kernel,
        out_shape=(jax.ShapeDtypeStruct((N, C, 1), jnp.float32),
                   jax.ShapeDtypeStruct((N, C, 1), jnp.float32)),
        grid=grid,
        in_specs=[x_spec],
        out_specs=(stat_spec, stat_spec),
        compiler_params=pltpu.CompilerParams(
            dimension_semantics=("parallel", "parallel", "arbitrary"),
            vmem_limit_bytes=_vmem_limit(
                [((nb, ct, st), x3.dtype)]
                + [((nb, ct, 1), jnp.float32)] * 2)),
    )(x3)


def _apply_affine(x3, scale_nc, shift_nc):
    """y[n,c,s] = x3[n,c,s]*scale[n,c] + shift[n,c]; x3: (N, C, hw)."""
    N, C, hw = x3.shape
    isz = _itemsize(x3.dtype)
    ct = _channel_tile(C, x3.dtype)
    st = _spatial_tile(hw, ct * isz)
    nb = _batch_tile(N, ct * st * isz)
    grid = (N // nb, C // ct, hw // st)
    x_spec = pl.BlockSpec((nb, ct, st), lambda n, c, s: (n, c, s))
    p_spec = pl.BlockSpec((nb, ct, 1), lambda n, c, s: (n, c, 0))
    return pl.pallas_call(
        _affine_kernel,
        out_shape=jax.ShapeDtypeStruct((N, C, hw), x3.dtype),
        grid=grid,
        in_specs=[x_spec, p_spec, p_spec],
        out_specs=x_spec,
        compiler_params=pltpu.CompilerParams(
            dimension_semantics=("parallel", "parallel", "parallel"),
            vmem_limit_bytes=_vmem_limit(
                [((nb, ct, st), x3.dtype)] * 2
                + [((nb, ct, 1), jnp.float32)] * 2)),
    )(x3,
      scale_nc.reshape(N, C, 1).astype(jnp.float32),
      shift_nc.reshape(N, C, 1).astype(jnp.float32))


# ---------------------------------------------------------------------------
# GroupNorm ('gn')
# ---------------------------------------------------------------------------
def _gn_scale_shift(s_x, ss_x, weight, bias, num_groups, hw, eps):
    """Per-(n, c) affine (scale, shift) implementing affine GroupNorm."""
    N, C, _ = s_x.shape
    cpg = C // num_groups
    cnt = cpg * hw
    s_g = s_x[:, :, 0].reshape(N, num_groups, cpg).sum(axis=2)   # (N, G)
    ss_g = ss_x[:, :, 0].reshape(N, num_groups, cpg).sum(axis=2)
    mean_g = s_g / cnt
    var_g = jnp.maximum(ss_g / cnt - mean_g * mean_g, 0.0)
    rstd_g = jax.lax.rsqrt(var_g + eps)
    w = weight.astype(jnp.float32).reshape(1, num_groups, cpg)
    b = bias.astype(jnp.float32).reshape(1, num_groups, cpg)
    scale = (w * rstd_g[:, :, None]).reshape(N, C)
    shift = (b - (mean_g * rstd_g)[:, :, None] * w).reshape(N, C)
    return scale, shift


def group_norm(x, weight, bias, num_groups=32, eps=EPS):
    N, C, H, W = x.shape
    assert C % num_groups == 0
    cpg = C // num_groups
    hw = H * W
    NG = N * num_groups
    gb = _fused_group_batch(NG, cpg, hw, _itemsize(x.dtype))

    if gb > 0:
        # One-pass fused path (2x HBM traffic): gb (sample, group) units/block.
        x3 = x.reshape(NG, cpg, hw)
        w3 = jnp.broadcast_to(weight.reshape(1, num_groups, cpg, 1),
                              (N, num_groups, cpg, 1)).reshape(NG, cpg, 1)
        b3 = jnp.broadcast_to(bias.reshape(1, num_groups, cpg, 1),
                              (N, num_groups, cpg, 1)).reshape(NG, cpg, 1)
        kernel = functools.partial(_gn_fused_kernel, eps=eps,
                                   inv_n=1.0 / float(cpg * hw))
        x_spec = pl.BlockSpec((gb, cpg, hw), lambda i: (i, 0, 0))
        p_spec = pl.BlockSpec((gb, cpg, 1), lambda i: (i, 0, 0))
        y3 = pl.pallas_call(
            kernel,
            out_shape=jax.ShapeDtypeStruct((NG, cpg, hw), x.dtype),
            grid=(NG // gb,),
            in_specs=[x_spec, p_spec, p_spec],
            out_specs=x_spec,
            compiler_params=pltpu.CompilerParams(
                dimension_semantics=("parallel",),
                vmem_limit_bytes=_vmem_limit(
                    [((gb, cpg, hw), x.dtype)] * 2
                    + [((gb, cpg, 1), jnp.float32)] * 2)),
        )(x3, w3, b3)
        return y3.reshape(N, C, H, W)

    # Two-pass fallback (bounded VMEM for huge H*W on v7x):
    # per-(n,c) sums reduction -> tiny JAX stats -> per-(n,c) affine apply.
    x3 = x.reshape(N, C, hw)
    s_x, ss_x = _per_nc_sums(x3)
    scale, shift = _gn_scale_shift(s_x, ss_x, weight, bias, num_groups, hw, eps)
    return _apply_affine(x3, scale, shift).reshape(N, C, H, W)


# ---------------------------------------------------------------------------
# BatchNorm2d ('bn', training-mode batch statistics, biased variance)
# ---------------------------------------------------------------------------
def batch_norm(x, weight, bias, eps=EPS):
    N, C, H, W = x.shape
    hw = H * W
    x3 = x.reshape(N, C, hw)
    s_x, ss_x = _per_nc_sums(x3)
    cnt = float(N * hw)
    s_c = s_x.sum(axis=0)[:, 0]                               # (C,)
    ss_c = ss_x.sum(axis=0)[:, 0]
    mean = s_c / cnt
    var = jnp.maximum(ss_c / cnt - mean * mean, 0.0)
    scale_c = weight.astype(jnp.float32) * jax.lax.rsqrt(var + eps)
    shift_c = bias.astype(jnp.float32) - mean * scale_c
    scale = jnp.broadcast_to(scale_c[None, :], (N, C))
    shift = jnp.broadcast_to(shift_c[None, :], (N, C))
    return _apply_affine(x3, scale, shift).reshape(N, C, H, W)


# ---------------------------------------------------------------------------
# 'gbn': GroupNorm(affine=False) -> BatchNorm2d, fully fused
# (the GroupNorm output is never materialized in HBM)
# ---------------------------------------------------------------------------
def group_batch_norm(x, bn_weight, bn_bias, num_groups=32, eps=EPS):
    N, C, H, W = x.shape
    assert C % num_groups == 0
    cpg = C // num_groups
    hw = H * W
    x3 = x.reshape(N, C, hw)

    s_x3, ss_x3 = _per_nc_sums(x3)                 # raw-x per-(n,c) sums, f32
    s_x = s_x3[:, :, 0]                            # (N, C)
    ss_x = ss_x3[:, :, 0]

    # GroupNorm statistics (per sample, per group).
    cnt_g = float(cpg * hw)
    s_g = s_x.reshape(N, num_groups, cpg).sum(axis=2)
    ss_g = ss_x.reshape(N, num_groups, cpg).sum(axis=2)
    mean_g = s_g / cnt_g
    var_g = jnp.maximum(ss_g / cnt_g - mean_g * mean_g, 0.0)
    rstd_g = jax.lax.rsqrt(var_g + eps)
    mean_gc = jnp.repeat(mean_g, cpg, axis=1)      # (N, C) per-channel view
    rstd_gc = jnp.repeat(rstd_g, cpg, axis=1)

    # Per-(n,c) sums of the (never materialized) GroupNorm output xn.
    sum_xn = (s_x - hw * mean_gc) * rstd_gc
    sumsq_xn = (rstd_gc * rstd_gc) * (
        ss_x - 2.0 * mean_gc * s_x + hw * mean_gc * mean_gc)

    # BatchNorm statistics of xn (training mode, biased variance).
    cnt_b = float(N * hw)
    mean_bn = sum_xn.sum(axis=0) / cnt_b                      # (C,)
    var_bn = jnp.maximum(sumsq_xn.sum(axis=0) / cnt_b - mean_bn * mean_bn, 0.0)
    bn_scale = bn_weight.astype(jnp.float32) * jax.lax.rsqrt(var_bn + eps)
    bn_shift = bn_bias.astype(jnp.float32) - mean_bn * bn_scale

    # Compose GN normalize + BN affine into a single per-(n,c) affine of x.
    scale = rstd_gc * bn_scale[None, :]                       # (N, C)
    shift = bn_shift[None, :] - mean_gc * scale
    return _apply_affine(x3, scale, shift).reshape(N, C, H, W)


# ---------------------------------------------------------------------------
# Norm module equivalent
# ---------------------------------------------------------------------------
def make_norm_params(name, n_feats, dtype=jnp.float32):
    """Deterministic init matching PyTorch defaults (weight=1, bias=0)."""
    ones = jnp.ones((n_feats,), dtype)
    zeros = jnp.zeros((n_feats,), dtype)
    if name == "bn":
        return {"bn_w": ones, "bn_b": zeros}
    elif name == "gn":
        return {"gn_w": ones, "gn_b": zeros}
    elif name == "gbn":
        return {"bn_w": ones, "bn_b": zeros}   # GroupNorm part is affine=False
    elif name == "none":
        return {}
    raise ValueError(name)


def norm_forward(name, x, params, n_feats):
    # TODO(synk): training-mode running_mean/running_var buffer updates
    # (BatchNorm side effect) are not modeled; only the forward output is.
    if name == "none":
        return x
    if name == "bn":
        return batch_norm(x, params["bn_w"], params["bn_b"])
    if name == "gn":
        return group_norm(x, params["gn_w"], params["gn_b"], num_groups=32)
    if name == "gbn":
        return group_batch_norm(x, params["bn_w"], params["bn_b"], num_groups=32)
    raise ValueError(name)


# ---------------------------------------------------------------------------
# Pure-JAX references for validation
# ---------------------------------------------------------------------------
def group_norm_ref(x, w, b, num_groups, eps=EPS):
    N, C, H, W = x.shape
    xg = x.reshape(N, num_groups, -1)
    mean = xg.mean(axis=2, keepdims=True)
    var = jnp.square(xg - mean).mean(axis=2, keepdims=True)
    xn = ((xg - mean) / jnp.sqrt(var + eps)).reshape(N, C, H, W)
    return xn * w[None, :, None, None] + b[None, :, None, None]


def batch_norm_ref(x, w, b, eps=EPS):
    mean = x.mean(axis=(0, 2, 3), keepdims=True)
    var = jnp.square(x - mean).mean(axis=(0, 2, 3), keepdims=True)
    xn = (x - mean) / jnp.sqrt(var + eps)
    return xn * w[None, :, None, None] + b[None, :, None, None]


def norm_ref(name, x, params, n_feats):
    if name == "none":
        return x
    if name == "bn":
        return batch_norm_ref(x, params["bn_w"], params["bn_b"])
    if name == "gn":
        return group_norm_ref(x, params["gn_w"], params["gn_b"], 32)
    if name == "gbn":
        ones = jnp.ones((n_feats,), x.dtype)
        zeros = jnp.zeros((n_feats,), x.dtype)
        y = group_norm_ref(x, ones, zeros, 32)
        return batch_norm_ref(y, params["bn_w"], params["bn_b"])
    raise ValueError(name)


if __name__ == "__main__":
    # GroupNorm(32, n_feats) requires n_feats % 32 == 0 -> use 32 channels.
    N, C, H, W = 2, 32, 16, 16
    key = jax.random.PRNGKey(0)
    x = jax.random.normal(key, (N, C, H, W), dtype=jnp.float32)

    ok = True
    for name in ["none", "gn", "bn", "gbn"]:
        params = make_norm_params(name, C)
        out = norm_forward(name, x, params, C)
        out = jax.block_until_ready(out)
        ref = norm_ref(name, x, params, C)
        err = float(jnp.max(jnp.abs(out - ref)))
        if err > 1e-3:
            ok = False
            print(f"mode {name}: max abs err {err}")

    if ok:
        print("KERNEL_OK")
</pallas_src>

<mosaic_0001>
module attributes {stable_mosaic.version = 11 : i64} {
  func.func @_gn_fused_kernel(%arg0: i32, %arg1: memref<64x1x256xf32, #tpu.memory_space<vmem>>, %arg2: memref<64x1x1xf32, #tpu.memory_space<vmem>>, %arg3: memref<64x1x1xf32, #tpu.memory_space<vmem>>, %arg4: memref<64x1x256xf32, #tpu.memory_space<vmem>>) attributes {dimension_semantics = [#tpu.dimension_semantics<parallel>], iteration_bounds = array<i64: 1>, scalar_prefetch = 0 : i64, scratch_operands = 0 : i64, tpu.core_type = #tpu.core_type<tc>, window_params = [{transform_indices = @transform_0, window_bounds = array<i64: 64, 1, 256>}, {transform_indices = @transform_1, window_bounds = array<i64: 64, 1, 1>}, {transform_indices = @transform_2, window_bounds = array<i64: 64, 1, 1>}, {transform_indices = @transform_3, window_bounds = array<i64: 64, 1, 256>}]} {
    %c0 = arith.constant 0 : index
    %c0_0 = arith.constant 0 : index
    %c0_1 = arith.constant 0 : index
    %0 = vector.load %arg1[%c0, %c0_0, %c0_1] : memref<64x1x256xf32, #tpu.memory_space<vmem>>, vector<64x1x256xf32>
    %cst = arith.constant dense<0.000000e+00> : vector<64x1xf32>
    %1 = vector.multi_reduction <add>, %0, %cst [2] : vector<64x1x256xf32> to vector<64x1xf32>
    %2 = vector.shape_cast %1 : vector<64x1xf32> to vector<64x1x1xf32>
    %3 = arith.mulf %0, %0 : vector<64x1x256xf32>
    %cst_2 = arith.constant dense<0.000000e+00> : vector<64x1xf32>
    %4 = vector.multi_reduction <add>, %3, %cst_2 [2] : vector<64x1x256xf32> to vector<64x1xf32>
    %5 = vector.shape_cast %4 : vector<64x1xf32> to vector<64x1x1xf32>
    %cst_3 = arith.constant dense<0.000000e+00> : vector<64x1xf32>
    %6 = vector.multi_reduction <add>, %2, %cst_3 [1] : vector<64x1x1xf32> to vector<64x1xf32>
    %7 = vector.shape_cast %6 : vector<64x1xf32> to vector<64x1x1xf32>
    %cst_4 = arith.constant 3.906250e-03 : f32
    %8 = vector.broadcast %cst_4 : f32 to vector<64x1x1xf32>
    %9 = arith.mulf %7, %8 : vector<64x1x1xf32>
    %cst_5 = arith.constant dense<0.000000e+00> : vector<64x1xf32>
    %10 = vector.multi_reduction <add>, %5, %cst_5 [1] : vector<64x1x1xf32> to vector<64x1xf32>
    %11 = vector.shape_cast %10 : vector<64x1xf32> to vector<64x1x1xf32>
    %cst_6 = arith.constant 3.906250e-03 : f32
    %12 = vector.broadcast %cst_6 : f32 to vector<64x1x1xf32>
    %13 = arith.mulf %11, %12 : vector<64x1x1xf32>
    %14 = arith.mulf %9, %9 : vector<64x1x1xf32>
    %15 = arith.subf %13, %14 : vector<64x1x1xf32>
    %cst_7 = arith.constant 0.000000e+00 : f32
    %16 = vector.broadcast %cst_7 : f32 to vector<64x1x1xf32>
    %17 = arith.maximumf %15, %16 : vector<64x1x1xf32>
    %cst_8 = arith.constant 9.99999974E-6 : f32
    %18 = vector.broadcast %cst_8 : f32 to vector<64x1x1xf32>
    %19 = arith.addf %17, %18 : vector<64x1x1xf32>
    %20 = math.rsqrt %19 : vector<64x1x1xf32>
    %c0_9 = arith.constant 0 : index
    %c0_10 = arith.constant 0 : index
    %c0_11 = arith.constant 0 : index
    %21 = vector.load %arg2[%c0_9, %c0_10, %c0_11] : memref<64x1x1xf32, #tpu.memory_space<vmem>>, vector<64x1x1xf32>
    %22 = arith.mulf %21, %20 : vector<64x1x1xf32>
    %c0_12 = arith.constant 0 : index
    %c0_13 = arith.constant 0 : index
    %c0_14 = arith.constant 0 : index
    %23 = vector.load %arg3[%c0_12, %c0_13, %c0_14] : memref<64x1x1xf32, #tpu.memory_space<vmem>>, vector<64x1x1xf32>
    %24 = arith.mulf %9, %22 : vector<64x1x1xf32>
    %25 = arith.subf %23, %24 : vector<64x1x1xf32>
    %26 = vector.broadcast %22 : vector<64x1x1xf32> to vector<64x1x256xf32>
    %27 = arith.mulf %0, %26 : vector<64x1x256xf32>
    %28 = vector.broadcast %25 : vector<64x1x1xf32> to vector<64x1x256xf32>
    %29 = arith.addf %27, %28 : vector<64x1x256xf32>
    %c0_15 = arith.constant 0 : index
    %c0_16 = arith.constant 0 : index
    %c0_17 = arith.constant 0 : index
    %30 = vector.load %arg4[%c0_15, %c0_16, %c0_17] : memref<64x1x256xf32, #tpu.memory_space<vmem>>, vector<64x1x256xf32>
    tpu.vector_store %arg4[%c0_15, %c0_16, %c0_17], %29 {strides = array<i32>} : memref<64x1x256xf32, #tpu.memory_space<vmem>>, vector<64x1x256xf32>,
    return
  }
  func.func @transform_0(%arg0: i32) -> (i32, i32, i32) {
    %c0_i32 = arith.constant 0 : i32
    %c0_i32_0 = arith.constant 0 : i32
    %c0_i32_1 = arith.constant 0 : i32
    return %arg0, %c0_i32, %c0_i32_0 : i32, i32, i32
  }
  func.func @transform_1(%arg0: i32) -> (i32, i32, i32) {
    %c0_i32 = arith.constant 0 : i32
    %c0_i32_0 = arith.constant 0 : i32
    %c0_i32_1 = arith.constant 0 : i32
    return %arg0, %c0_i32, %c0_i32_0 : i32, i32, i32
  }
  func.func @transform_2(%arg0: i32) -> (i32, i32, i32) {
    %c0_i32 = arith.constant 0 : i32
    %c0_i32_0 = arith.constant 0 : i32
    %c0_i32_1 = arith.constant 0 : i32
    return %arg0, %c0_i32, %c0_i32_0 : i32, i32, i32
  }
  func.func @transform_3(%arg0: i32) -> (i32, i32, i32) {
    %c0_i32 = arith.constant 0 : i32
    %c0_i32_0 = arith.constant 0 : i32
    %c0_i32_1 = arith.constant 0 : i32
    return %arg0, %c0_i32, %c0_i32_0 : i32, i32, i32
  }
}

</mosaic_0001>

<bundles_post_ra>
// kernel: tpu_custom_call.1
= control target key start
LH: loop header
LB: loop body
LE: loop exit
PB: predicated region body
PF: predicated region fallthrough
CT: control target
= control target key end

     0   :  { %v7604_v0 = vlaneseq  ;;  %vm783_vm0 = vcmask 1040384   ;;  %s7600_s0 = inlined_call_operand.vmem [shape: f32[64,1,256], index: 0, kind: input, shape index: {}]   ;;  %s7601_s1 = inlined_call_operand.vmem [shape: f32[64,1,1], index: 1, kind: input, shape index: {}]   ;;  %s7602_s2 = inlined_call_operand.vmem [shape: f32[64,1,1], index: 2, kind: input, shape index: {}]   ;;  %s7603_s3 = inlined_call_operand.hbm [shape: f32[64,1,256], index: 3, kind: output, shape index: {}]  }
   0x1   :  { %v4702_v2 = vld [vmem:[%s7600_s0 + $0x4] sm:$0x3]  ;;  %v4707_v3 = vld [vmem:[%s7600_s0] sm:$0x3]  ;;  %v4716_v6 = vld [vmem:[%s7600_s0 + $0x6] sm:$0x3] }
   0x2   :  { %v144_v1 = vshrl.u32 %v7604_v0, 7  ;;  %v4721_v7 = vld [vmem:[%s7600_s0 + $0x2] sm:$0x3]  ;;  %v4742_v16 = vld [vmem:[%s7600_s0 + $0xa] sm:$0x3] }
   0x3   :  { %v4751_v21 = vld [vmem:[%s7600_s0 + $0x8] sm:$0x3]  ;;  %v4758_v26 = vld [vmem:[%s7600_s0 + $0xe] sm:$0x3]  ;;  %v4767_v31 = vld [vmem:[%s7600_s0 + $0xc] sm:$0x3] }
   0x4   :  { %v4709_v4 = vsub.s32 0, %v144_v1  ;;  %v4711_v5 = vsub.s32 1, %v144_v1  ;;  %v4789_v43 = vld [vmem:[%s7600_s0 + $0x12] sm:$0x3]  ;;  %v4794_v44 = vld [vmem:[%s7600_s0 + $0x10] sm:$0x3] }
   0x5   :  { %v4803_v51 = vld [vmem:[%s7600_s0 + $0x16] sm:$0x3]  ;;  %v4817_v57 = vld [vmem:[%s7600_s0 + $0x14] sm:$0x3] }
   0x6   :  { %7706 = vst [vmem:[#allocation5_spill] sm:$0xff] %v4709_v4  ;;  %v162_v8 = vrot.slane %v4702_v2, %v4709_v4  ;;  %v166_v9 = vrot.slane %v4702_v2, %v4711_v5  ;;  %v146_v10 = vrot.slane %v4707_v3, %v4709_v4  ;;  %v150_v11 = vrot.slane %v4707_v3, %v4711_v5 }
   0x7   :  { %v170_v12 = vrot.slane %v4716_v6, %v4709_v4  ;;  %v174_v13 = vrot.slane %v4716_v6, %v4711_v5  ;;  %v154_v14 = vrot.slane %v4721_v7, %v4709_v4  ;;  %v158_v15 = vrot.slane %v4721_v7, %v4711_v5 }
   0x8   :  { %v794_v17 = vsel %vm783_vm0, %v162_v8, 0.0  ;;  %v795_v18 = vsel %vm783_vm0, %v166_v9, 0.0  ;;  %v784_v19 = vsel %vm783_vm0, %v146_v10, 0.0  ;;  %v785_v20 = vsel %vm783_vm0, %v150_v11, 0.0  ;;  %v4834_v11 = vld [vmem:[%s7600_s0 + $0x1a] sm:$0x3] }
   0x9   :  { %v796_v22 = vadd.f32 %v795_v18, %v794_v17  ;;  %v786_v23 = vadd.f32 %v785_v20, %v784_v19  ;;  %v799_v24 = vsel %vm783_vm0, %v170_v12, 0.0  ;;  %v800_v25 = vsel %vm783_vm0, %v174_v13, 0.0  ;;  %v4839_v12 = vld [vmem:[%s7600_s0 + $0x18] sm:$0x3]  ;;  %v4850_v20 = vld [vmem:[%s7600_s0 + $0x1e] sm:$0x3] }
   0xa   :  { %v801_v27 = vadd.f32 %v800_v25, %v799_v24  ;;  %v789_v28 = vsel %vm783_vm0, %v154_v14, 0.0  ;;  %v790_v29 = vsel %vm783_vm0, %v158_v15, 0.0  ;;  %v186_v30 = vrot.slane %v4742_v16, %v4709_v4 }
   0xb   :  { %797 = vadd.xlane.f32.xlu1 %v796_v22  ;;  %787 = vadd.xlane.f32.xlu0 %v786_v23  ;;  %v791_v32 = vadd.f32 %v790_v29, %v789_v28  ;;  %v190_v33 = vrot.slane %v4742_v16, %v4711_v5  ;;  %v178_v34 = vrot.slane %v4751_v21, %v4709_v4 }
   0xc   :  { %v809_v35 = vsel %vm783_vm0, %v186_v30, 0.0  ;;  %v182_v36 = vrot.slane %v4751_v21, %v4711_v5  ;;  %v202_v37 = vrot.slane %v4758_v26, %v4709_v4  ;;  %v206_v38 = vrot.slane %v4758_v26, %v4711_v5 }
   0xd   :  { %v810_v39 = vsel %vm783_vm0, %v190_v33, 0.0  ;;  %v804_v40 = vsel %vm783_vm0, %v178_v34, 0.0  ;;  %v194_v41 = vrot.slane %v4767_v31, %v4709_v4  ;;  %v198_v42 = vrot.slane %v4767_v31, %v4711_v5 }
   0xe   :  { %v811_v45 = vadd.f32 %v810_v39, %v809_v35  ;;  %v805_v46 = vsel %vm783_vm0, %v182_v36, 0.0  ;;  %v819_v48 = vsel %vm783_vm0, %v202_v37, 0.0  ;;  %v820_v49 = vsel %vm783_vm0, %v206_v38, 0.0  ;;  %v4878_v39 = vld [vmem:[%s7600_s0 + $0x22] sm:$0x3] }
   0xf   :  { %802 = vadd.xlane.f32.xlu1 %v801_v27  ;;  %792 = vadd.xlane.f32.xlu0 %v791_v32  ;;  %v806_v47 = vadd.f32 %v805_v46, %v804_v40  ;;  %v814_v50 = vsel %vm783_vm0, %v194_v41, 0.0  ;;  %v815_v52 = vsel %vm783_vm0, %v198_v42, 0.0  ;;  %v218_v53 = vrot.slane %v4789_v43, %v4709_v4  ;;  %v4861_v27 = vld [vmem:[%s7600_s0 + $0x1c] sm:$0x3]  ;;  %v4883_v40 = vld [vmem:[%s7600_s0 + $0x20] sm:$0x3] }
  0x10   :  { %v222_v54 = vrot.slane %v4789_v43, %v4711_v5  ;;  %v210_v55 = vrot.slane %v4794_v44, %v4709_v4  ;;  %v214_v56 = vrot.slane %v4794_v44, %v4711_v5  ;;  %v821_v58 = vadd.f32 %v820_v49, %v819_v48 }
  0x11   :  { %v234_v59 = vrot.slane %v4803_v51, %v4709_v4  ;;  %v816_v60 = vadd.f32 %v815_v52, %v814_v50  ;;  %v829_v61 = vsel %vm783_vm0, %v218_v53, 0.0  ;;  %v238_v63 = vrot.slane %v4803_v51, %v4711_v5 }
  0x12   :  { %v830_v62 = vsel %vm783_vm0, %v222_v54, 0.0  ;;  %v824_v1 = vsel %vm783_vm0, %v210_v55, 0.0  ;;  %v825_v8 = vsel %vm783_vm0, %v214_v56, 0.0  ;;  %v226_v9 = vrot.slane %v4817_v57, %v4709_v4 }
  0x13   :  { %812 = vadd.xlane.f32.xlu1 %v811_v45  ;;  %807 = vadd.xlane.f32.xlu0 %v806_v47  ;;  %v230_v10 = vrot.slane %v4817_v57, %v4711_v5  ;;  %v831_v13 = vadd.f32 %v830_v62, %v829_v61  ;;  %v839_v14 = vsel %vm783_vm0, %v234_v59, 0.0  ;;  %v826_v15 = vadd.f32 %v825_v8, %v824_v1 }
  0x14   :  { %v840_v17 = vsel %vm783_vm0, %v238_v63, 0.0  ;;  %v250_v18 = vrot.slane %v4834_v11, %v4709_v4  ;;  %v254_v19 = vrot.slane %v4834_v11, %v4711_v5  ;;  %v834_v22 = vsel %vm783_vm0, %v226_v9, 0.0 }
  0x15   :  { %v835_v23 = vsel %vm783_vm0, %v230_v10, 0.0  ;;  %v242_v24 = vrot.slane %v4839_v12, %v4709_v4  ;;  %v246_v25 = vrot.slane %v4839_v12, %v4711_v5  ;;  %v841_v28 = vadd.f32 %v840_v17, %v839_v14 }
  0x16   :  { %v266_v29 = vrot.slane %v4850_v20, %v4709_v4  ;;  %v836_v30 = vadd.f32 %v835_v23, %v834_v22  ;;  %v849_v32 = vsel %vm783_vm0, %v250_v18, 0.0  ;;  %v850_v33 = vsel %vm783_vm0, %v254_v19, 0.0 }
  0x17   :  { %822 = vadd.xlane.f32.xlu1 %v821_v58  ;;  %817 = vadd.xlane.f32.xlu0 %v816_v60  ;;  %v270_v34 = vrot.slane %v4850_v20, %v4711_v5  ;;  %v844_v35 = vsel %vm783_vm0, %v242_v24, 0.0  ;;  %v845_v36 = vsel %vm783_vm0, %v246_v25, 0.0  ;;  %v258_v37 = vrot.slane %v4861_v27, %v4709_v4 }
  0x18   :  { %v262_v38 = vrot.slane %v4861_v27, %v4711_v5  ;;  %v851_v41 = vadd.f32 %v850_v33, %v849_v32  ;;  %v859_v42 = vsel %vm783_vm0, %v266_v29, 0.0 }
  0x1b   :  { %832 = vadd.xlane.f32.xlu1 %v831_v13  ;;  %827 = vadd.xlane.f32.xlu0 %v826_v15 }
  0x1c   :  { %8 = vsyncpa [#allocation3], 0  ;;  %v846_v45 = vadd.f32 %v845_v36, %v844_v35  ;;  %v860_v46 = vsel %vm783_vm0, %v270_v34, 0.0  ;;  %v282_v47 = vrot.slane %v4878_v39, %v4709_v4  ;;  %v286_v48 = vrot.slane %v4878_v39, %v4711_v5  ;;  %v4894_v49 = vld [vmem:[%s7600_s0 + $0x26] sm:$0x3]  ;;  %s4675_s22 = smov [#allocation2]  }
  0x1d   :  { %v854_v50 = vsel %vm783_vm0, %v258_v37, 0.0  ;;  %v855_v52 = vsel %vm783_vm0, %v262_v38, 0.0  ;;  %v274_v53 = vrot.slane %v4883_v40, %v4709_v4  ;;  %v278_v54 = vrot.slane %v4883_v40, %v4711_v5  ;;  %v4905_v55 = vld [vmem:[%s7600_s0 + $0x24] sm:$0x3]  ;;  %v4922_v10 = vld [vmem:[%s7600_s0 + $0x2a] sm:$0x3] }
  0x1e   :  { %v861_v56 = vadd.f32 %v860_v46, %v859_v42  ;;  %v298_v58 = vrot.slane %v4894_v49, %v4709_v4  ;;  %v856_v59 = vadd.f32 %v855_v52, %v854_v50  ;;  %v869_v60 = vsel %vm783_vm0, %v282_v47, 0.0  ;;  %v4927_v13 = vld [vmem:[%s7600_s0 + $0x28] sm:$0x3]  ;;  %v4938_v23 = vld [vmem:[%s7600_s0 + $0x2e] sm:$0x3]  ;;  %s4441_s23 = sshll.u32 %s4675_s22, 4  ;;  %s4442_s23 = int_to_ptr.vmem [resolvable:$true] %s4441_s23 }
  0x1f   :  { %842 = vadd.xlane.f32.xlu1 %v841_v28  ;;  %837 = vadd.xlane.f32.xlu0 %v836_v30  ;;  %v870_v61 = vsel %vm783_vm0, %v286_v48, 0.0  ;;  %v302_v62 = vrot.slane %v4894_v49, %v4711_v5  ;;  %v864_v63 = vsel %vm783_vm0, %v274_v53, 0.0  ;;  %v865_v1 = vsel %vm783_vm0, %v278_v54, 0.0  ;;  %v4949_v30 = vld [vmem:[%s7600_s0 + $0x2c] sm:$0x3]  ;;  %s4650_s26 = scalar_lea.vmem %s4442_s23, 2048  ;;  %p4655_p1 = scmp.lt.s32.totalorder %s4442_s23, %s4442_s23 }
  0x20   :  { %v290_v8 = vrot.slane %v4905_v55, %v4709_v4  ;;  %v294_v9 = vrot.slane %v4905_v55, %v4711_v5  ;;  %v871_v14 = vadd.f32 %v870_v61, %v869_v60  ;;  %v879_v15 = vsel %vm783_vm0, %v298_v58, 0.0  ;;  %v4966_v46 = vld [vmem:[%s7600_s0 + $0x32] sm:$0x3]  ;;  %v4971_v47 = vld [vmem:[%s7600_s0 + $0x30] sm:$0x3]  ;;  %p4651_p0 = scmp.ne.s32.totalorder %s4442_s23, %s4650_s26  ;;  %p4656_p2 = scmp.lt.s32.totalorder %s4650_s26, %s4650_s26 }
  0x21   :  { %v866_v17 = vadd.f32 %v865_v1, %v864_v63  ;;  %v880_v18 = vsel %vm783_vm0, %v302_v62, 0.0  ;;  %v314_v19 = vrot.slane %v4922_v10, %v4709_v4  ;;  %v318_v22 = vrot.slane %v4922_v10, %v4711_v5  ;;  %v4982_v58 = vld [vmem:[%s7600_s0 + $0x36] sm:$0x3]  ;;  %v4993_v63 = vld [vmem:[%s7600_s0 + $0x34] sm:$0x3] }
  0x22   :  { %v874_v24 = vsel %vm783_vm0, %v290_v8, 0.0  ;;  %v875_v25 = vsel %vm783_vm0, %v294_v9, 0.0  ;;  %v306_v28 = vrot.slane %v4927_v13, %v4709_v4  ;;  %v310_v29 = vrot.slane %v4927_v13, %v4711_v5  ;;  %p4657_p3 = por %p4656_p2, %p4655_p1 }
  0x23   :  { %852 = vadd.xlane.f32.xlu1 %v851_v41  ;;  %847 = vadd.xlane.f32.xlu0 %v846_v45  ;;  %v881_v32 = vadd.f32 %v880_v18, %v879_v15  ;;  %v330_v33 = vrot.slane %v4938_v23, %v4709_v4  ;;  %v876_v34 = vadd.f32 %v875_v25, %v874_v24  ;;  %v889_v35 = vsel %vm783_vm0, %v314_v19, 0.0  ;;  %v5010_v25 = vld [vmem:[%s7600_s0 + $0x3a] sm:$0x3] }
  0x24   :  { %v890_v36 = vsel %vm783_vm0, %v318_v22, 0.0  ;;  %v334_v37 = vrot.slane %v4938_v23, %v4711_v5  ;;  %v884_v38 = vsel %vm783_vm0, %v306_v28, 0.0  ;;  %v885_v41 = vsel %vm783_vm0, %v310_v29, 0.0  ;;  %v5015_v28 = vld [vmem:[%s7600_s0 + $0x38] sm:$0x3]  ;;  %p4658_p4 = pnand %p4657_p3, %p4651_p0 }
  0x25   :  { %v322_v42 = vrot.slane %v4949_v30, %v4709_v4  ;;  %v326_v45 = vrot.slane %v4949_v30, %v4711_v5  ;;  %v891_v48 = vadd.f32 %v890_v36, %v889_v35  ;;  %v899_v50 = vsel %vm783_vm0, %v330_v33, 0.0 }
  0x26   :  { %v886_v52 = vadd.f32 %v885_v41, %v884_v38  ;;  %v900_v53 = vsel %vm783_vm0, %v334_v37, 0.0  ;;  %v346_v54 = vrot.slane %v4966_v46, %v4709_v4  ;;  %v338_v61 = vrot.slane %v4971_v47, %v4709_v4  ;;  %v5026_v37 = vld [vmem:[%s7600_s0 + $0x3e] sm:$0x3] }
  0x27   :  { %862 = vadd.xlane.f32.xlu1 %v861_v56  ;;  %857 = vadd.xlane.f32.xlu0 %v856_v59  ;;  %v350_v56 = vrot.slane %v4966_v46, %v4711_v5  ;;  %v894_v59 = vsel %vm783_vm0, %v322_v42, 0.0  ;;  %v895_v60 = vsel %vm783_vm0, %v326_v45, 0.0  ;;  %v342_v62 = vrot.slane %v4971_v47, %v4711_v5 }
  0x28   :  { %v901_v1 = vadd.f32 %v900_v53, %v899_v50  ;;  %v362_v8 = vrot.slane %v4982_v58, %v4709_v4  ;;  %v896_v9 = vadd.f32 %v895_v60, %v894_v59  ;;  %v904_v18 = vsel %vm783_vm0, %v338_v61, 0.0  ;;  %v5048_v60 = vld [vmem:[%s7600_s0 + $0x42] sm:$0x3] }
  0x29   :  { %v910_v15 = vsel %vm783_vm0, %v350_v56, 0.0  ;;  %v905_v19 = vsel %vm783_vm0, %v342_v62, 0.0  ;;  %v354_v22 = vrot.slane %v4993_v63, %v4709_v4  ;;  %v358_v24 = vrot.slane %v4993_v63, %v4711_v5 }
  0x2a   :  { %v906_v33 = vadd.f32 %v905_v19, %v904_v18  ;;  %v378_v35 = vrot.slane %v5010_v25, %v4709_v4  ;;  %v382_v36 = vrot.slane %v5010_v25, %v4711_v5  ;;  %v370_v42 = vrot.slane %v5015_v28, %v4709_v4 }
  0x2b   :  { %872 = vadd.xlane.f32.xlu1 %v871_v14  ;;  %867 = vadd.xlane.f32.xlu0 %v866_v17  ;;  %v909_v14 = vsel %vm783_vm0, %v346_v54, 0.0  ;;  %v366_v17 = vrot.slane %v4982_v58, %v4711_v5  ;;  %v914_v38 = vsel %vm783_vm0, %v354_v22, 0.0  ;;  %v915_v41 = vsel %vm783_vm0, %v358_v24, 0.0 }
  0x2c   :  { %v911_v29 = vadd.f32 %v910_v15, %v909_v14  ;;  %v374_v45 = vrot.slane %v5015_v28, %v4711_v5  ;;  %v916_v53 = vadd.f32 %v915_v41, %v914_v38  ;;  %v929_v54 = vsel %vm783_vm0, %v378_v35, 0.0  ;;  %v5081_v35 = vld [vmem:[%s7600_s0 + $0x44] sm:$0x3] }
  0x2d   :  { %v930_v56 = vsel %vm783_vm0, %v382_v36, 0.0  ;;  %v398_v59 = vrot.slane %v5026_v37, %v4711_v5  ;;  %v924_v61 = vsel %vm783_vm0, %v370_v42, 0.0  ;;  %v410_v15 = vrot.slane %v5048_v60, %v4709_v4 }
  0x2e   :  { %v925_v62 = vsel %vm783_vm0, %v374_v45, 0.0  ;;  %v931_v14 = vadd.f32 %v930_v56, %v929_v54  ;;  %v414_v22 = vrot.slane %v5048_v60, %v4711_v5  ;;  %v418_v56 = vrot.slane %v5081_v35, %v4709_v4 }
  0x2f   :  { %882 = vadd.xlane.f32.xlu1 %v881_v32  ;;  %877 = vadd.xlane.f32.xlu0 %v876_v34  ;;  %v919_v32 = vsel %vm783_vm0, %v362_v8, 0.0  ;;  %v920_v34 = vsel %vm783_vm0, %v366_v17, 0.0  ;;  %v926_v17 = vadd.f32 %v925_v62, %v924_v61  ;;  %v940_v19 = vsel %vm783_vm0, %v398_v59, 0.0  ;;  %v5103_v61 = vld [vmem:[%s7600_s0 + $0x48] sm:$0x3] }
  0x30   :  { %v921_v50 = vadd.f32 %v920_v34, %v919_v32  ;;  %v5076_v34 = vld [vmem:[%s7600_s0 + $0x46] sm:$0x3]  ;;  %v949_v38 = vsel %vm783_vm0, %v410_v15, 0.0  ;;  %v950_v42 = vsel %vm783_vm0, %v414_v22, 0.0  ;;  %v422_v59 = vrot.slane %v5081_v35, %v4711_v5 }
  0x31   :  { %v426_v45 = vrot.slane %v5076_v34, %v4709_v4  ;;  %v951_v62 = vadd.f32 %v950_v42, %v949_v38  ;;  %v434_v22 = vrot.slane %v5103_v61, %v4709_v4 }
  0x33   :  { %892 = vadd.xlane.f32.xlu1 %v891_v48  ;;  %887 = vadd.xlane.f32.xlu0 %v886_v52  ;;  %v5037_v48 = vld [vmem:[%s7600_s0 + $0x3c] sm:$0x3]  ;;  %v394_v52 = vrot.slane %v5026_v37, %v4709_v4 }
  0x34   :  { %v390_v8 = vrot.slane %v5037_v48, %v4711_v5 }
  0x35   :  { %v939_v18 = vsel %vm783_vm0, %v394_v52, 0.0  ;;  %v5092_v52 = vld [vmem:[%s7600_s0 + $0x4a] sm:$0x3] }
  0x36   :  { %v941_v36 = vadd.f32 %v940_v19, %v939_v18  ;;  %v954_v18 = vsel %vm783_vm0, %v418_v56, 0.0  ;;  %v955_v19 = vsel %vm783_vm0, %v422_v59, 0.0 }
  0x37   :  { %902 = vadd.xlane.f32.xlu1 %v901_v1  ;;  %897 = vadd.xlane.f32.xlu0 %v896_v9  ;;  %v386_v1 = vrot.slane %v5037_v48, %v4709_v4  ;;  %v5059_v9 = vld [vmem:[%s7600_s0 + $0x40] sm:$0x3]  ;;  %v956_v38 = vadd.f32 %v955_v19, %v954_v18 }
  0x38   :  { %v402_v32 = vrot.slane %v5059_v9, %v4709_v4 }
  0x39   :  { %v934_v24 = vsel %vm783_vm0, %v386_v1, 0.0  ;;  %v442_v1 = vrot.slane %v5092_v52, %v4709_v4 }
  0x3b   :  { %912 = vadd.xlane.f32.xlu1 %v911_v29  ;;  %907 = vadd.xlane.f32.xlu0 %v906_v33  ;;  %v935_v29 = vsel %vm783_vm0, %v390_v8, 0.0  ;;  %v406_v33 = vrot.slane %v5059_v9, %v4711_v5 }
  0x3c   :  { %v936_v41 = vadd.f32 %v935_v29, %v934_v24  ;;  %v438_v24 = vrot.slane %v5103_v61, %v4711_v5  ;;  %v5120_v29 = vld [vmem:[%s7600_s0 + $0x4e] sm:$0x3] }
  0x3d   :  { %v945_v54 = vsel %vm783_vm0, %v406_v33, 0.0  ;;  %v458_v42 = vrot.slane %v5120_v29, %v4709_v4 }
  0x3f   :  { %922 = vadd.xlane.f32.xlu1 %v921_v50  ;;  %917 = vadd.xlane.f32.xlu0 %v916_v53  ;;  %v430_v50 = vrot.slane %v5076_v34, %v4711_v5  ;;  %v944_v53 = vsel %vm783_vm0, %v402_v32, 0.0  ;;  %v5125_v32 = vld [vmem:[%s7600_s0 + $0x4c] sm:$0x3] }
  0x40   :  { %v946_v8 = vadd.f32 %v945_v54, %v944_v53  ;;  %7707 = vst [vmem:[#allocation6_spill] sm:$0xff] %v5125_v32  ;;  %v964_v53 = vsel %vm783_vm0, %v434_v22, 0.0  ;;  %v965_v54 = vsel %vm783_vm0, %v438_v24, 0.0  ;;  %v450_v56 = vrot.slane %v5125_v32, %v4709_v4 }
  0x41   :  { %v960_v15 = vsel %vm783_vm0, %v430_v50, 0.0  ;;  %v5136_v50 = vld [vmem:[%s7600_s0 + $0x52] sm:$0x3]  ;;  %v454_v59 = vrot.slane %v5125_v32, %v4711_v5 }
  0x42   :  { %7708 = vst [vmem:[#allocation7_spill] sm:$0xff] %v5136_v50  ;;  %v478_v18 = vrot.slane %v5136_v50, %v4711_v5  ;;  %v974_v19 = vsel %vm783_vm0, %v450_v56, 0.0 }
  0x43   :  { %932 = vadd.xlane.f32.xlu1 %v931_v14  ;;  %927 = vadd.xlane.f32.xlu0 %v926_v17  ;;  %v959_v14 = vsel %vm783_vm0, %v426_v45, 0.0  ;;  %v446_v17 = vrot.slane %v5092_v52, %v4711_v5  ;;  %v462_v45 = vrot.slane %v5120_v29, %v4711_v5  ;;  %v975_v22 = vsel %vm783_vm0, %v454_v59, 0.0  ;;  %v5180_v59 = vld [vmem:[%s7600_s0 + $0x5a] sm:$0x3] }
  0x44   :  { %v961_v33 = vadd.f32 %v960_v15, %v959_v14  ;;  %v966_v14 = vadd.f32 %v965_v54, %v964_v53  ;;  %v979_v15 = vsel %vm783_vm0, %v458_v42, 0.0  ;;  %v990_v53 = vsel %vm783_vm0, %v478_v18, 0.0  ;;  %7712 = vst [vmem:[#allocation11_spill] sm:$0xff] %v5180_v59 }
  0x45   :  { %v510_v0 = vrot.slane %v5180_v59, %v4711_v5 }
  0x47   :  { %942 = vadd.xlane.f32.xlu1 %v941_v36  ;;  %937 = vadd.xlane.f32.xlu0 %v936_v41  ;;  %v969_v36 = vsel %vm783_vm0, %v442_v1, 0.0  ;;  %v970_v41 = vsel %vm783_vm0, %v446_v17, 0.0  ;;  %v980_v17 = vsel %vm783_vm0, %v462_v45, 0.0  ;;  %v976_v45 = vadd.f32 %v975_v22, %v974_v19 }
  0x48   :  { %v971_v1 = vadd.f32 %v970_v41, %v969_v36  ;;  %v981_v41 = vadd.f32 %v980_v17, %v979_v15  ;;  %v5191_v17 = vld [vmem:[%s7600_s0 + $0x58] sm:$0x3]  ;;  %v506_v19 = vrot.slane %v5180_v59, %v4709_v4 }
  0x49   :  { %7713 = vst [vmem:[#allocation12_spill] sm:$0xff] %v5191_v17 }
  0x4b   :  { %952 = vadd.xlane.f32.xlu1 %v951_v62  ;;  %947 = vadd.xlane.f32.xlu0 %v946_v8  ;;  %v5147_v62 = vld [vmem:[%s7600_s0 + $0x50] sm:$0x3]  ;;  %v474_v8 = vrot.slane %v5136_v50, %v4709_v4 }
  0x4c   :  { %7709 = vst [vmem:[#allocation8_spill] sm:$0xff] %v5147_v62  ;;  %v466_v24 = vrot.slane %v5147_v62, %v4709_v4  ;;  %v470_v36 = vrot.slane %v5147_v62, %v4711_v5 }
  0x4d   :  { %v989_v42 = vsel %vm783_vm0, %v474_v8, 0.0 }
  0x4e   :  { %v984_v15 = vsel %vm783_vm0, %v466_v24, 0.0  ;;  %v985_v8 = vsel %vm783_vm0, %v470_v36, 0.0  ;;  %v991_v18 = vadd.f32 %v990_v53, %v989_v42  ;;  %v498_v42 = vrot.slane %v5191_v17, %v4709_v4 }
  0x4f   :  { %962 = vadd.xlane.f32.xlu1 %v961_v33  ;;  %957 = vadd.xlane.f32.xlu0 %v956_v38  ;;  %v5164_v33 = vld [vmem:[%s7600_s0 + $0x56] sm:$0x3]  ;;  %v5169_v38 = vld [vmem:[%s7600_s0 + $0x54] sm:$0x3]  ;;  %v986_v22 = vadd.f32 %v985_v8, %v984_v15  ;;  %v502_v53 = vrot.slane %v5191_v17, %v4711_v5  ;;  %v1010_v8 = vsel %vm783_vm0, %v510_v0, 0.0 }
  0x50   :  { %7710 = vst [vmem:[#allocation9_spill] sm:$0xff] %v5164_v33  ;;  %7711 = vst [vmem:[#allocation10_spill] sm:$0xff] %v5169_v38  ;;  %v490_v54 = vrot.slane %v5164_v33, %v4709_v4  ;;  %v494_v56 = vrot.slane %v5164_v33, %v4711_v5  ;;  %v5224_v17 = vld [vmem:[%s7600_s0 + $0x62] sm:$0x3] }
  0x51   :  { %7716 = vst [vmem:[#allocation15_spill] sm:$0xff] %v5224_v17 }
  0x52   :  { %v999_v24 = vsel %vm783_vm0, %v490_v54, 0.0  ;;  %v1000_v36 = vsel %vm783_vm0, %v494_v56, 0.0  ;;  %v1009_v56 = vsel %vm783_vm0, %v506_v19, 0.0  ;;  %v1005_v19 = vsel %vm783_vm0, %v502_v53, 0.0 }
  0x53   :  { %972 = vadd.xlane.f32.xlu1 %v971_v1  ;;  %967 = vadd.xlane.f32.xlu0 %v966_v14  ;;  %v482_v1 = vrot.slane %v5169_v38, %v4709_v4  ;;  %v486_v14 = vrot.slane %v5169_v38, %v4711_v5  ;;  %v1001_v54 = vadd.f32 %v1000_v36, %v999_v24  ;;  %v1004_v24 = vsel %vm783_vm0, %v498_v42, 0.0 }
  0x54   :  { %v1006_v36 = vadd.f32 %v1005_v19, %v1004_v24 }
  0x55   :  { %v994_v38 = vsel %vm783_vm0, %v482_v1, 0.0  ;;  %v995_v33 = vsel %vm783_vm0, %v486_v14, 0.0 }
  0x56   :  { %v996_v15 = vadd.f32 %v995_v33, %v994_v38  ;;  %v5235_v38 = vld [vmem:[%s7600_s0 + $0x60] sm:$0x3] }
  0x57   :  { %982 = vadd.xlane.f32.xlu1 %v981_v41  ;;  %977 = vadd.xlane.f32.xlu0 %v976_v45  ;;  %v5208_v41 = vld [vmem:[%s7600_s0 + $0x5e] sm:$0x3]  ;;  %v5213_v45 = vld [vmem:[%s7600_s0 + $0x5c] sm:$0x3]  ;;  %7717 = vst [vmem:[#allocation16_spill] sm:$0xff] %v5235_v38 }
  0x58   :  { %7714 = vst [vmem:[#allocation13_spill] sm:$0xff] %v5208_v41  ;;  %7715 = vst [vmem:[#allocation14_spill] sm:$0xff] %v5213_v45  ;;  %v522_v1 = vrot.slane %v5208_v41, %v4709_v4  ;;  %v526_v14 = vrot.slane %v5208_v41, %v4711_v5  ;;  %v514_v33 = vrot.slane %v5213_v45, %v4709_v4 }
  0x59   :  { %v518_v0 = vrot.slane %v5213_v45, %v4711_v5  ;;  %v542_v41 = vrot.slane %v5224_v17, %v4711_v5 }
  0x5a   :  { %v1019_v42 = vsel %vm783_vm0, %v522_v1, 0.0  ;;  %v1020_v53 = vsel %vm783_vm0, %v526_v14, 0.0  ;;  %v1014_v45 = vsel %vm783_vm0, %v514_v33, 0.0 }
  0x5b   :  { %992 = vadd.xlane.f32.xlu1 %v991_v18  ;;  %987 = vadd.xlane.f32.xlu0 %v986_v22  ;;  %v1011_v18 = vadd.f32 %v1010_v8, %v1009_v56  ;;  %v538_v22 = vrot.slane %v5224_v17, %v4709_v4  ;;  %v1015_v59 = vsel %vm783_vm0, %v518_v0, 0.0  ;;  %v530_v56 = vrot.slane %v5235_v38, %v4709_v4 }
  0x5c   :  { %v534_v8 = vrot.slane %v5235_v38, %v4711_v5  ;;  %v1021_v1 = vadd.f32 %v1020_v53, %v1019_v42  ;;  %v1016_v24 = vadd.f32 %v1015_v59, %v1014_v45  ;;  %v1030_v19 = vsel %vm783_vm0, %v542_v41, 0.0  ;;  %v5268_v38 = vld [vmem:[%s7600_s0 + $0x6a] sm:$0x3]  ;;  %v5279_v45 = vld [vmem:[%s7600_s0 + $0x68] sm:$0x3] }
  0x5d   :  { %v1029_v14 = vsel %vm783_vm0, %v538_v22, 0.0  ;;  %7720 = vst [vmem:[#allocation19_spill] sm:$0xff] %v5268_v38  ;;  %v1024_v42 = vsel %vm783_vm0, %v530_v56, 0.0  ;;  %7721 = vst [vmem:[#allocation20_spill] sm:$0xff] %v5279_v45 }
  0x5e   :  { %v1025_v22 = vsel %vm783_vm0, %v534_v8, 0.0  ;;  %v1031_v53 = vadd.f32 %v1030_v19, %v1029_v14  ;;  %v5301_v14 = vld [vmem:[%s7600_s0 + $0x6c] sm:$0x3] }
  0x5f   :  { %1002 = vadd.xlane.f32.xlu1 %v1001_v54  ;;  %997 = vadd.xlane.f32.xlu0 %v996_v15  ;;  %v5252_v54 = vld [vmem:[%s7600_s0 + $0x66] sm:$0x3]  ;;  %v5257_v15 = vld [vmem:[%s7600_s0 + $0x64] sm:$0x3]  ;;  %v1026_v56 = vadd.f32 %v1025_v22, %v1024_v42  ;;  %7723 = vst [vmem:[#allocation22_spill] sm:$0xff] %v5301_v14 }
  0x60   :  { %7718 = vst [vmem:[#allocation17_spill] sm:$0xff] %v5252_v54  ;;  %7719 = vst [vmem:[#allocation18_spill] sm:$0xff] %v5257_v15  ;;  %v554_v33 = vrot.slane %v5252_v54, %v4709_v4  ;;  %v558_v0 = vrot.slane %v5252_v54, %v4711_v5  ;;  %v546_v59 = vrot.slane %v5257_v15, %v4709_v4 }
  0x61   :  { %v550_v41 = vrot.slane %v5257_v15, %v4711_v5  ;;  %v5290_v15 = vld [vmem:[%s7600_s0 + $0x6e] sm:$0x3] }
  0x62   :  { %v1039_v8 = vsel %vm783_vm0, %v554_v33, 0.0  ;;  %v1040_v54 = vsel %vm783_vm0, %v558_v0, 0.0  ;;  %7722 = vst [vmem:[#allocation21_spill] sm:$0xff] %v5290_v15  ;;  %v1034_v17 = vsel %vm783_vm0, %v546_v59, 0.0  ;;  %v586_v33 = vrot.slane %v5290_v15, %v4709_v4  ;;  %v5312_v59 = vld [vmem:[%s7600_s0 + $0x72] sm:$0x3] }
  0x63   :  { %1012 = vadd.xlane.f32.xlu1 %v1011_v18  ;;  %1007 = vadd.xlane.f32.xlu0 %v1006_v36  ;;  %v570_v18 = vrot.slane %v5268_v38, %v4709_v4  ;;  %v574_v36 = vrot.slane %v5268_v38, %v4711_v5  ;;  %v1035_v62 = vsel %vm783_vm0, %v550_v41, 0.0  ;;  %v562_v38 = vrot.slane %v5279_v45, %v4709_v4 }
  0x64   :  { %v590_v0 = vrot.slane %v5290_v15, %v4711_v5  ;;  %v1041_v42 = vadd.f32 %v1040_v54, %v1039_v8  ;;  %v1036_v22 = vadd.f32 %v1035_v62, %v1034_v17  ;;  %7724 = vst [vmem:[#allocation23_spill] sm:$0xff] %v5312_v59  ;;  %v5323_v54 = vld [vmem:[%s7600_s0 + $0x70] sm:$0x3]  ;;  %v1059_v17 = vsel %vm783_vm0, %v586_v33, 0.0  ;;  %v5334_v8 = vld [vmem:[%s7600_s0 + $0x76] sm:$0x3] }
  0x65   :  { %v1050_v19 = vsel %vm783_vm0, %v574_v36, 0.0  ;;  %v1044_v41 = vsel %vm783_vm0, %v562_v38, 0.0  ;;  %v578_v36 = vrot.slane %v5301_v14, %v4709_v4  ;;  %7725 = vst [vmem:[#allocation24_spill] sm:$0xff] %v5323_v54  ;;  %v602_v38 = vrot.slane %v5312_v59, %v4709_v4  ;;  %7726 = vst [vmem:[#allocation25_spill] sm:$0xff] %v5334_v8  ;;  %v5343_v33 = vld [vmem:[%s7600_s0 + $0x74] sm:$0x3] }
  0x66   :  { %7727 = vst [vmem:[#allocation26_spill] sm:$0xff] %v5343_v33 }
  0x67   :  { %1022 = vadd.xlane.f32.xlu1 %v1021_v1  ;;  %1017 = vadd.xlane.f32.xlu0 %v1016_v24  ;;  %v566_v1 = vrot.slane %v5279_v45, %v4711_v5  ;;  %v1049_v24 = vsel %vm783_vm0, %v570_v18, 0.0  ;;  %v582_v45 = vrot.slane %v5301_v14, %v4711_v5 }
  0x68   :  { %v1051_v62 = vadd.f32 %v1050_v19, %v1049_v24  ;;  %v594_v24 = vrot.slane %v5323_v54, %v4709_v4  ;;  %v598_v19 = vrot.slane %v5323_v54, %v4711_v5  ;;  %v610_v54 = vrot.slane %v5343_v33, %v4709_v4 }
  0x69   :  { %v1045_v18 = vsel %vm783_vm0, %v566_v1, 0.0 }
  0x6a   :  { %v1046_v1 = vadd.f32 %v1045_v18, %v1044_v41  ;;  %v622_v18 = vrot.slane %v5334_v8, %v4711_v5 }
  0x6b   :  { %1032 = vadd.xlane.f32.xlu1 %v1031_v53  ;;  %1027 = vadd.xlane.f32.xlu0 %v1026_v56  ;;  %v1060_v53 = vsel %vm783_vm0, %v590_v0, 0.0  ;;  %v606_v56 = vrot.slane %v5312_v59, %v4711_v5  ;;  %v1054_v0 = vsel %vm783_vm0, %v578_v36, 0.0  ;;  %v1055_v59 = vsel %vm783_vm0, %v582_v45, 0.0 }
  0x6c   :  { %v1061_v14 = vadd.f32 %v1060_v53, %v1059_v17  ;;  %v1056_v15 = vadd.f32 %v1055_v59, %v1054_v0  ;;  %v1064_v36 = vsel %vm783_vm0, %v594_v24, 0.0  ;;  %v1065_v45 = vsel %vm783_vm0, %v598_v19, 0.0  ;;  %v5362_v53 = vld [vmem:[%s7600_s0 + $0x7a] sm:$0x3]  ;;  %v5372_v59 = vld [vmem:[%s7600_s0 + $0x7e] sm:$0x3] }
  0x6d   :  { %v1070_v41 = vsel %vm783_vm0, %v606_v56, 0.0  ;;  %v614_v17 = vrot.slane %v5343_v33, %v4711_v5  ;;  %7728 = vst [vmem:[#allocation27_spill] sm:$0xff] %v5362_v53  ;;  %7730 = vst [vmem:[#allocation29_spill] sm:$0xff] %v5372_v59  ;;  %v1066_v56 = vadd.f32 %v1065_v45, %v1064_v36  ;;  %v1080_v24 = vsel %vm783_vm0, %v622_v18, 0.0 }
  0x6e   :  { %v1074_v19 = vsel %vm783_vm0, %v610_v54, 0.0  ;;  %v634_v33 = vrot.slane %v5362_v53, %v4709_v4  ;;  %v650_v18 = vrot.slane %v5372_v59, %v4709_v4  ;;  %v1105_v54 = vmul.f32 %v4721_v7, %v4721_v7 }
  0x6f   :  { %1042 = vadd.xlane.f32.xlu1 %v1041_v42  ;;  %1037 = vadd.xlane.f32.xlu0 %v1036_v22  ;;  %v618_v42 = vrot.slane %v5334_v8, %v4709_v4  ;;  %v1069_v22 = vsel %vm783_vm0, %v602_v38, 0.0  ;;  %v5367_v38 = vld [vmem:[%s7600_s0 + $0x78] sm:$0x3]  ;;  %v1075_v0 = vsel %vm783_vm0, %v614_v17, 0.0  ;;  %v1104_v36 = vmul.f32 %v4707_v3, %v4707_v3 }
  0x70   :  { %7729 = vst [vmem:[#allocation28_spill] sm:$0xff] %v5367_v38  ;;  %v1076_v17 = vadd.f32 %v1075_v0, %v1074_v19  ;;  %v1099_v7 = vsel %vm783_vm0, %v650_v18, 0.0  ;;  %v1106_v19 = vmul.f32 %v4702_v2, %v4702_v2 }
  0x73   :  { %1052 = vadd.xlane.f32.xlu1 %v1051_v62  ;;  %1047 = vadd.xlane.f32.xlu0 %v1046_v1  ;;  %v1071_v62 = vadd.f32 %v1070_v41, %v1069_v22  ;;  %v1079_v1 = vsel %vm783_vm0, %v618_v42, 0.0  ;;  %v638_v22 = vrot.slane %v5362_v53, %v4711_v5  ;;  %v626_v41 = vrot.slane %v5367_v38, %v4709_v4 }
  0x74   :  { %v630_v42 = vrot.slane %v5367_v38, %v4711_v5  ;;  %v1081_v45 = vadd.f32 %v1080_v24, %v1079_v1  ;;  %v1089_v38 = vsel %vm783_vm0, %v634_v33, 0.0  ;;  %v1247_v33 = vrot.slane %v1105_v54, %v4711_v5 }
  0x75   :  { %v1090_v53 = vsel %vm783_vm0, %v638_v22, 0.0  ;;  %v1239_v1 = vrot.slane %v1104_v36, %v4711_v5  ;;  %v1107_v24 = vmul.f32 %v4716_v6, %v4716_v6 }
  0x76   :  { %v1085_v50 = vsel %vm783_vm0, %v630_v42, 0.0  ;;  %v1091_v0 = vadd.f32 %v1090_v53, %v1089_v38  ;;  %v1251_v53 = vrot.slane %v1106_v19, %v4709_v4  ;;  %v1108_v38 = vmul.f32 %v4751_v21, %v4751_v21 }
  0x77   :  { %1062 = vadd.xlane.f32.xlu1 %v1061_v14  ;;  %1057 = vadd.xlane.f32.xlu0 %v1056_v15  ;;  %v654_v15 = vrot.slane %v5372_v59, %v4711_v5  ;;  %v5393_v14 = vld [vmem:[%s7600_s0 + $0x7c] sm:$0x3]  ;;  %v1084_v59 = vsel %vm783_vm0, %v626_v41, 0.0  ;;  %v1873_v6 = vsel %vm783_vm0, %v1239_v1, 0.0  ;;  %v1263_v2 = vrot.slane %v1107_v24, %v4711_v5 }
  0x78   :  { %7731 = vst [vmem:[#allocation30_spill] sm:$0xff] %v5393_v14  ;;  %v642_v8 = vrot.slane %v5393_v14, %v4709_v4  ;;  %v646_v3 = vrot.slane %v5393_v14, %v4711_v5  ;;  %v1086_v22 = vadd.f32 %v1085_v50, %v1084_v59  ;;  %v1259_v14 = vrot.slane %v1107_v24, %v4709_v4 }
  0x79   :  { %v1100_v32 = vsel %vm783_vm0, %v654_v15, 0.0  ;;  %v1111_v21 = vmul.f32 %v4758_v26, %v4758_v26  ;;  %v1271_v1 = vrot.slane %v1108_v38, %v4711_v5  ;;  %v1113_v24 = vmul.f32 %v4789_v43, %v4789_v43 }
  0x7a   :  { %v1101_v41 = vadd.f32 %v1100_v32, %v1099_v7  ;;  %v1094_v42 = vsel %vm783_vm0, %v642_v8, 0.0  ;;  %v1095_v18 = vsel %vm783_vm0, %v646_v3, 0.0  ;;  %v1109_v32 = vmul.f32 %v4742_v16, %v4742_v16 }
  0x7b   :  { %1072 = vadd.xlane.f32.xlu1 %v1071_v62  ;;  %1067 = vadd.xlane.f32.xlu0 %v1066_v56  ;;  %v1243_v62 = vrot.slane %v1105_v54, %v4709_v4  ;;  %v1235_v56 = vrot.slane %v1104_v36, %v4709_v4  ;;  %v1878_v54 = vsel %vm783_vm0, %v1247_v33, 0.0  ;;  %v1096_v50 = vadd.f32 %v1095_v18, %v1094_v42 }
  0x7c   :  { %v1255_v8 = vrot.slane %v1106_v19, %v4711_v5  ;;  %v1888_v7 = vsel %vm783_vm0, %v1263_v2, 0.0  ;;  %v1882_v3 = vsel %vm783_vm0, %v1251_v53, 0.0  ;;  %v1279_v33 = vrot.slane %v1109_v32, %v4711_v5 }
  0x7d   :  { %v1877_v15 = vsel %vm783_vm0, %v1243_v62, 0.0  ;;  %v1872_v36 = vsel %vm783_vm0, %v1235_v56, 0.0  ;;  %v1275_v62 = vrot.slane %v1109_v32, %v4709_v4  ;;  %v1267_v56 = vrot.slane %v1108_v38, %v4709_v4 }
  0x7e   :  { %v1879_v59 = vadd.f32 %v1878_v54, %v1877_v15  ;;  %v1883_v16 = vsel %vm783_vm0, %v1255_v8, 0.0  ;;  %v1898_v42 = vsel %vm783_vm0, %v1279_v33, 0.0  ;;  %v1291_v18 = vrot.slane %v1111_v21, %v4709_v4 }
  0x7f   :  { %1082 = vadd.xlane.f32.xlu1 %v1081_v45  ;;  %1077 = vadd.xlane.f32.xlu0 %v1076_v17  ;;  %v1874_v45 = vadd.f32 %v1873_v6, %v1872_v36  ;;  %v1887_v17 = vsel %vm783_vm0, %v1259_v14, 0.0  ;;  %v1110_v14 = vmul.f32 %v4767_v31, %v4767_v31  ;;  %v1892_v26 = vsel %vm783_vm0, %v1267_v56, 0.0 }
  0x80   :  { %v1889_v19 = vadd.f32 %v1888_v7, %v1887_v17  ;;  %v1295_v31 = vrot.slane %v1111_v21, %v4711_v5  ;;  %v1893_v15 = vsel %vm783_vm0, %v1271_v1, 0.0  ;;  %v1115_v36 = vmul.f32 %v4803_v51, %v4803_v51 }
  0x81   :  { %v1283_v43 = vrot.slane %v1110_v14, %v4709_v4  ;;  %v1287_v54 = vrot.slane %v1110_v14, %v4711_v5  ;;  %v1311_v6 = vrot.slane %v1113_v24, %v4711_v5  ;;  %v1114_v2 = vmul.f32 %v4817_v57, %v4817_v57 }
  0x82   :  { %v1894_v8 = vadd.f32 %v1893_v15, %v1892_v26  ;;  %v1907_v38 = vsel %vm783_vm0, %v1291_v18, 0.0  ;;  %v1323_v17 = vrot.slane %v1115_v36, %v4709_v4  ;;  %v1117_v21 = vmul.f32 %v4834_v11, %v4834_v11 }
  0x83   :  { %1092 = vadd.xlane.f32.xlu1 %v1091_v0  ;;  %1087 = vadd.xlane.f32.xlu0 %v1086_v22  ;;  %v1884_v0 = vadd.f32 %v1883_v16, %v1882_v3  ;;  %v1897_v22 = vsel %vm783_vm0, %v1275_v62, 0.0  ;;  %v1902_v51 = vsel %vm783_vm0, %v1283_v43, 0.0  ;;  %v1918_v7 = vsel %vm783_vm0, %v1311_v6, 0.0 }
  0x84   :  { %v1327_v3 = vrot.slane %v1115_v36, %v4711_v5  ;;  %v1315_v62 = vrot.slane %v1114_v2, %v4709_v4  ;;  %v1319_v56 = vrot.slane %v1114_v2, %v4711_v5  ;;  %v1339_v18 = vrot.slane %v1117_v21, %v4709_v4 }
  0x85   :  { %v1343_v11 = vrot.slane %v1117_v21, %v4711_v5  ;;  %v1118_v43 = vmul.f32 %v4861_v27, %v4861_v27  ;;  %v1121_v2 = vmul.f32 %v4878_v39, %v4878_v39  ;;  %v1123_v21 = vmul.f32 %v4894_v49, %v4894_v49 }
  0x86   :  { %v1923_v26 = vsel %vm783_vm0, %v1319_v56, 0.0 }
  0x87   :  { %1102 = vadd.xlane.f32.xlu1 %v1101_v41  ;;  %1097 = vadd.xlane.f32.xlu0 %v1096_v50  ;;  %v1112_v41 = vmul.f32 %v4794_v44, %v4794_v44  ;;  %v1307_v44 = vrot.slane %v1113_v24, %v4709_v4  ;;  %v1899_v50 = vadd.f32 %v1898_v42, %v1897_v22  ;;  %v1927_v22 = vsel %vm783_vm0, %v1323_v17, 0.0 }
  0x88   :  { %v1116_v24 = vmul.f32 %v4839_v12, %v4839_v12  ;;  %v1922_v42 = vsel %vm783_vm0, %v1315_v62, 0.0  ;;  %v1371_v62 = vrot.slane %v1121_v2, %v4709_v4  ;;  %v1375_v56 = vrot.slane %v1121_v2, %v4711_v5 }
  0x89   :  { %v1299_v53 = vrot.slane %v1112_v41, %v4709_v4  ;;  %v1303_v32 = vrot.slane %v1112_v41, %v4711_v5  ;;  %v1917_v57 = vsel %vm783_vm0, %v1307_v44, 0.0  ;;  %v1928_v41 = vsel %vm783_vm0, %v1327_v3, 0.0 }
  0x8a   :  { %v1331_v12 = vrot.slane %v1116_v24, %v4709_v4  ;;  %v1335_v15 = vrot.slane %v1116_v24, %v4711_v5  ;;  %v1929_v44 = vadd.f32 %v1928_v41, %v1927_v22  ;;  %v1924_v6 = vadd.f32 %v1923_v26, %v1922_v42 }
  0x8b   :  { %1880 = vadd.xlane.f32.xlu1 %v1879_v59  ;;  %1875 = vadd.xlane.f32.xlu0 %v1874_v45  ;;  %v1908_v59 = vsel %vm783_vm0, %v1295_v31, 0.0  ;;  %v1903_v45 = vsel %vm783_vm0, %v1287_v54, 0.0  ;;  %v1912_v16 = vsel %vm783_vm0, %v1299_v53, 0.0  ;;  %v1913_v33 = vsel %vm783_vm0, %v1303_v32, 0.0 }
  0x8c   :  { %v1909_v1 = vadd.f32 %v1908_v59, %v1907_v38  ;;  %v1904_v14 = vadd.f32 %v1903_v45, %v1902_v51  ;;  %v1119_v31 = vmul.f32 %v4850_v20, %v4850_v20  ;;  %v1937_v20 = vsel %vm783_vm0, %v1339_v18, 0.0 }
  0x8d   :  { %v1938_v53 = vsel %vm783_vm0, %v1343_v11, 0.0  ;;  %v1932_v27 = vsel %vm783_vm0, %v1331_v12, 0.0  ;;  %v1347_v38 = vrot.slane %v1118_v43, %v4709_v4  ;;  %v1351_v59 = vrot.slane %v1118_v43, %v4711_v5 }
  0x8e   :  { %v1355_v32 = vrot.slane %v1119_v31, %v4709_v4  ;;  %v1120_v45 = vmul.f32 %v4883_v40, %v4883_v40  ;;  %v1939_v17 = vadd.f32 %v1938_v53, %v1937_v20  ;;  %v1957_v41 = vsel %vm783_vm0, %v1371_v62, 0.0 }
  0x8f   :  { %1890 = vadd.xlane.f32.xlu1 %v1889_v19  ;;  %1885 = vadd.xlane.f32.xlu0 %v1884_v0  ;;  %v1919_v19 = vadd.f32 %v1918_v7, %v1917_v57  ;;  %v1914_v0 = vadd.f32 %v1913_v33, %v1912_v16  ;;  %v1942_v16 = vsel %vm783_vm0, %v1347_v38, 0.0  ;;  %v1943_v33 = vsel %vm783_vm0, %v1351_v59, 0.0 }
  0x90   :  { %v1947_v7 = vsel %vm783_vm0, %v1355_v32, 0.0  ;;  %v1367_v24 = vrot.slane %v1120_v45, %v4711_v5  ;;  %v1944_v22 = vadd.f32 %v1943_v33, %v1942_v16  ;;  %v1125_v42 = vmul.f32 %v4922_v10, %v4922_v10 }
  0x91   :  { %v1958_v49 = vsel %vm783_vm0, %v1375_v56, 0.0  ;;  %v1387_v26 = vrot.slane %v1123_v21, %v4709_v4  ;;  %v1391_v18 = vrot.slane %v1123_v21, %v4711_v5  ;;  %v1124_v11 = vmul.f32 %v4927_v13, %v4927_v13 }
  0x92   :  { %v1403_v2 = vrot.slane %v1125_v42, %v4709_v4  ;;  %v1407_v13 = vrot.slane %v1125_v42, %v4711_v5  ;;  %v1128_v62 = vmul.f32 %v4971_v47, %v4971_v47  ;;  %v1131_v47 = vmul.f32 %v4982_v58, %v4982_v58 }
  0x93   :  { %1900 = vadd.xlane.f32.xlu1 %v1899_v50  ;;  %1895 = vadd.xlane.f32.xlu0 %v1894_v8  ;;  %v1359_v50 = vrot.slane %v1119_v31, %v4711_v5  ;;  %v1933_v8 = vsel %vm783_vm0, %v1335_v15, 0.0  ;;  %v1953_v15 = vsel %vm783_vm0, %v1367_v24, 0.0  ;;  %v1967_v53 = vsel %vm783_vm0, %v1387_v26, 0.0 }
  0x94   :  { %v1934_v57 = vadd.f32 %v1933_v8, %v1932_v27  ;;  %v1968_v32 = vsel %vm783_vm0, %v1391_v18, 0.0  ;;  %v1395_v59 = vrot.slane %v1124_v11, %v4709_v4  ;;  %v1978_v33 = vsel %vm783_vm0, %v1407_v13, 0.0 }
  0x95   :  { %v1948_v3 = vsel %vm783_vm0, %v1359_v50, 0.0  ;;  %v1126_v50 = vmul.f32 %v4949_v30, %v4949_v30  ;;  %v1969_v30 = vadd.f32 %v1968_v32, %v1967_v53  ;;  %v1427_v26 = vrot.slane %v1128_v62, %v4709_v4 }
  0x96   :  { %v1431_v18 = vrot.slane %v1128_v62, %v4711_v5  ;;  %v1451_v13 = vrot.slane %v1131_v47, %v4709_v4 }
  0x97   :  { %1910 = vadd.xlane.f32.xlu1 %v1909_v1  ;;  %1905 = vadd.xlane.f32.xlu0 %v1904_v14  ;;  %v1363_v14 = vrot.slane %v1120_v45, %v4709_v4  ;;  %v1399_v45 = vrot.slane %v1124_v11, %v4711_v5  ;;  %v1411_v56 = vrot.slane %v1126_v50, %v4709_v4  ;;  %v1992_v32 = vsel %vm783_vm0, %v1427_v26, 0.0 }
  0x98   :  { %v5491_v54 = vpop.xlane.xlu1 %797  ;;  %v5493_v36 = vpop.xlane.xlu0 %787  ;;  %v1415_v21 = vrot.slane %v1126_v50, %v4711_v5  ;;  %v1993_v50 = vsel %vm783_vm0, %v1431_v18, 0.0 }
  0x99   :  { %v1952_v12 = vsel %vm783_vm0, %v1363_v14, 0.0 }
  0x9a   :  { %v1954_v20 = vadd.f32 %v1953_v15, %v1952_v12  ;;  %v1982_v12 = vsel %vm783_vm0, %v1411_v56, 0.0  ;;  %v1983_v58 = vsel %vm783_vm0, %v1415_v21, 0.0  ;;  %v1130_v15 = vmul.f32 %v4993_v63, %v4993_v63 }
  0x9b   :  { %1920 = vadd.xlane.f32.xlu1 %v1919_v19  ;;  %1915 = vadd.xlane.f32.xlu0 %v1914_v0  ;;  %v1122_v19 = vmul.f32 %v4905_v55, %v4905_v55  ;;  %v1949_v0 = vadd.f32 %v1948_v3, %v1947_v7  ;;  %v1129_v7 = vmul.f32 %v4966_v46, %v4966_v46  ;;  %v1977_v3 = vsel %vm783_vm0, %v1403_v2, 0.0 }
  0x9c   :  { %v5505_v51 = vpop.xlane.xlu1 %802  ;;  %v5507_v39 = vpop.xlane.xlu0 %792  ;;  %v1972_v46 = vsel %vm783_vm0, %v1395_v59, 0.0  ;;  %v1984_v53 = vadd.f32 %v1983_v58, %v1982_v12  ;;  %v1133_v63 = vmul.f32 %v5010_v25, %v5010_v25  ;;  %v1132_v59 = vmul.f32 %v5015_v28, %v5015_v28 }
  0x9d   :  { %v1379_v10 = vrot.slane %v1122_v19, %v4709_v4  ;;  %v1383_v43 = vrot.slane %v1122_v19, %v4711_v5  ;;  %v1973_v19 = vsel %vm783_vm0, %v1399_v45, 0.0  ;;  %v1439_v42 = vrot.slane %v1129_v7, %v4711_v5 }
  0x9e   :  { %v1974_v11 = vadd.f32 %v1973_v19, %v1972_v46  ;;  %v2007_v25 = vsel %vm783_vm0, %v1451_v13, 0.0  ;;  %v1467_v62 = vrot.slane %v1133_v63, %v4709_v4  ;;  %v1471_v56 = vrot.slane %v1133_v63, %v4711_v5 }
  0x9f   :  { %1930 = vadd.xlane.f32.xlu1 %v1929_v44  ;;  %1925 = vadd.xlane.f32.xlu0 %v1924_v6  ;;  %v1127_v44 = vmul.f32 %v4938_v23, %v4938_v23  ;;  %v1959_v6 = vadd.f32 %v1958_v49, %v1957_v41  ;;  %v1962_v23 = vsel %vm783_vm0, %v1379_v10, 0.0  ;;  %v1963_v38 = vsel %vm783_vm0, %v1383_v43, 0.0 }
  0xa0   :  { %v5519_v40 = vpop.xlane.xlu1 %812  ;;  %v5521_v1 = vpop.xlane.xlu0 %807  ;;  %v1964_v16 = vadd.f32 %v1963_v38, %v1962_v23  ;;  %v1435_v41 = vrot.slane %v1129_v7, %v4709_v4  ;;  %v1979_v49 = vadd.f32 %v1978_v33, %v1977_v3  ;;  %v1998_v2 = vsel %vm783_vm0, %v1439_v42, 0.0 }
  0xa1   :  { %v1443_v23 = vrot.slane %v1130_v15, %v4709_v4  ;;  %v1447_v38 = vrot.slane %v1130_v15, %v4711_v5  ;;  %v1459_v21 = vrot.slane %v1132_v59, %v4709_v4  ;;  %v1137_v42 = vmul.f32 %v5048_v60, %v5048_v60 }
  0xa2   :  { %v2018_v26 = vsel %vm783_vm0, %v1471_v56, 0.0 }
  0xa3   :  { %1940 = vadd.xlane.f32.xlu1 %v1939_v17  ;;  %1935 = vadd.xlane.f32.xlu0 %v1934_v57  ;;  %v1419_v17 = vrot.slane %v1127_v44, %v4709_v4  ;;  %v1423_v57 = vrot.slane %v1127_v44, %v4711_v5  ;;  %v2002_v28 = vsel %vm783_vm0, %v1443_v23, 0.0  ;;  %v2003_v33 = vsel %vm783_vm0, %v1447_v38, 0.0 }
  0xa4   :  { %v5535_v31 = vpop.xlane.xlu1 %822  ;;  %v5537_v55 = vpop.xlane.xlu0 %817  ;;  %v2012_v18 = vsel %vm783_vm0, %v1459_v21, 0.0  ;;  %v1503_v63 = vrot.slane %v1137_v42, %v4711_v5 }
  0xa7   :  { %1950 = vadd.xlane.f32.xlu1 %v1949_v0  ;;  %1945 = vadd.xlane.f32.xlu0 %v1944_v22  ;;  %v1987_v0 = vsel %vm783_vm0, %v1419_v17, 0.0  ;;  %v1988_v22 = vsel %vm783_vm0, %v1423_v57, 0.0  ;;  %v4674_v57 = vmov 0  }
  0xa8   :  { %v5551_v27 = vpop.xlane.xlu1 %832  ;;  %v5553_v8 = vpop.xlane.xlu0 %827  ;;  %v1989_v44 = vadd.f32 %v1988_v22, %v1987_v0  ;;  %4457 = vset.pattern.permute.xlu1 %v4674_v57  ;;  %4456 = vset.pattern.permute.xlu0 %v4674_v57  ;;  %v1134_v0 = vmul.f32 %v5037_v48, %v5037_v48  ;;  %v2004_v22 = vadd.f32 %v2003_v33, %v2002_v28 }
  0xaa   :  { %v1475_v15 = vrot.slane %v1134_v0, %v4709_v4  ;;  %v1479_v60 = vrot.slane %v1134_v0, %v4711_v5 }
  0xab   :  { %1960 = vadd.xlane.f32.xlu1 %v1959_v6  ;;  %1955 = vadd.xlane.f32.xlu0 %v1954_v20  ;;  %v1997_v6 = vsel %vm783_vm0, %v1435_v41, 0.0  ;;  %v1455_v20 = vrot.slane %v1131_v47, %v4711_v5  ;;  %v1463_v47 = vrot.slane %v1132_v59, %v4711_v5 }
  0xac   :  { %v5569_v14 = vpop.xlane.xlu1 %842  ;;  %v5571_v24 = vpop.xlane.xlu0 %837  ;;  %v1999_v7 = vadd.f32 %v1998_v2, %v1997_v6  ;;  %v1139_v6 = vmul.f32 %v5076_v34, %v5076_v34  ;;  %v2022_v34 = vsel %vm783_vm0, %v1475_v15, 0.0  ;;  %v2023_v38 = vsel %vm783_vm0, %v1479_v60, 0.0 }
  0xad   :  { %v2008_v3 = vsel %vm783_vm0, %v1455_v20, 0.0  ;;  %v2013_v58 = vsel %vm783_vm0, %v1463_v47, 0.0  ;;  %v1138_v20 = vmul.f32 %v5081_v35, %v5081_v35  ;;  %v2024_v28 = vadd.f32 %v2023_v38, %v2022_v34  ;;  %v7733_v38 = vld [vmem:[#allocation7_spill] sm:$0xff] }
  0xae   :  { %v1515_v57 = vrot.slane %v1139_v6, %v4709_v4  ;;  %v2038_v47 = vsel %vm783_vm0, %v1503_v63, 0.0 }
  0xaf   :  { %1970 = vadd.xlane.f32.xlu1 %v1969_v30  ;;  %1965 = vadd.xlane.f32.xlu0 %v1964_v16  ;;  %v1994_v30 = vadd.f32 %v1993_v50, %v1992_v32  ;;  %v1135_v16 = vmul.f32 %v5026_v37, %v5026_v37  ;;  %v2009_v37 = vadd.f32 %v2008_v3, %v2007_v25 }
  0xb0   :  { %v5587_v10 = vpop.xlane.xlu1 %852  ;;  %v5589_v43 = vpop.xlane.xlu0 %847  ;;  %v1499_v50 = vrot.slane %v1137_v42, %v4709_v4  ;;  %v1507_v25 = vrot.slane %v1138_v20, %v4709_v4  ;;  %v1511_v3 = vrot.slane %v1138_v20, %v4711_v5 }
  0xb1   :  { %v1483_v41 = vrot.slane %v1135_v16, %v4709_v4 }
  0xb2   :  { %v2037_v21 = vsel %vm783_vm0, %v1499_v50, 0.0  ;;  %v2042_v42 = vsel %vm783_vm0, %v1507_v25, 0.0 }
  0xb3   :  { %1980 = vadd.xlane.f32.xlu1 %v1979_v49  ;;  %1975 = vadd.xlane.f32.xlu0 %v1974_v11  ;;  %v2017_v49 = vsel %vm783_vm0, %v1467_v62, 0.0  ;;  %v1487_v11 = vrot.slane %v1135_v16, %v4711_v5  ;;  %v2027_v13 = vsel %vm783_vm0, %v1483_v41, 0.0  ;;  %v1140_v62 = vmul.f32 %v5103_v61, %v5103_v61 }
  0xb4   :  { %v5603_v45 = vpop.xlane.xlu1 %862  ;;  %v5605_v17 = vpop.xlane.xlu0 %857  ;;  %v2019_v2 = vadd.f32 %v2018_v26, %v2017_v49  ;;  %v1143_v41 = vmul.f32 %v5120_v29, %v5120_v29  ;;  %v2043_v49 = vsel %vm783_vm0, %v1511_v3, 0.0 }
  0xb5   :  { %v2028_v32 = vsel %vm783_vm0, %v1487_v11, 0.0  ;;  %v2039_v11 = vadd.f32 %v2038_v47, %v2037_v21  ;;  %v1527_v15 = vrot.slane %v1140_v62, %v4711_v5 }
  0xb6   :  { %v2029_v16 = vadd.f32 %v2028_v32, %v2027_v13  ;;  %v2044_v13 = vadd.f32 %v2043_v49, %v2042_v42  ;;  %v1547_v50 = vrot.slane %v1143_v41, %v4709_v4  ;;  %v1551_v34 = vrot.slane %v1143_v41, %v4711_v5 }
  0xb7   :  { %1990 = vadd.xlane.f32.xlu1 %v1989_v44  ;;  %1985 = vadd.xlane.f32.xlu0 %v1984_v53  ;;  %v1136_v44 = vmul.f32 %v5059_v9, %v5059_v9  ;;  %v2014_v53 = vadd.f32 %v2013_v58, %v2012_v18  ;;  %v1523_v18 = vrot.slane %v1140_v62, %v4709_v4  ;;  %v2053_v63 = vsel %vm783_vm0, %v1527_v15, 0.0  ;;  %v7735_v62 = vld [vmem:[#allocation9_spill] sm:$0xff] }
  0xb8   :  { %v5616_v46 = vpop.xlane.xlu1 %872  ;;  %v5618_v19 = vpop.xlane.xlu0 %867  ;;  %v2067_v47 = vsel %vm783_vm0, %v1547_v50, 0.0 }
  0xb9   :  { %v1491_v59 = vrot.slane %v1136_v44, %v4709_v4  ;;  %v1495_v35 = vrot.slane %v1136_v44, %v4711_v5  ;;  %v2052_v32 = vsel %vm783_vm0, %v1523_v18, 0.0 }
  0xba   :  { %v2054_v21 = vadd.f32 %v2053_v63, %v2052_v32 }
  0xbb   :  { %2000 = vadd.xlane.f32.xlu1 %v1999_v7  ;;  %1995 = vadd.xlane.f32.xlu0 %v1994_v30  ;;  %v1519_v7 = vrot.slane %v1139_v6, %v4711_v5  ;;  %v1141_v30 = vmul.f32 %v5092_v52, %v5092_v52  ;;  %v2032_v52 = vsel %vm783_vm0, %v1491_v59, 0.0  ;;  %v2033_v0 = vsel %vm783_vm0, %v1495_v35, 0.0  ;;  %v7732_v6 = vld [vmem:[#allocation6_spill] sm:$0xff]  ;;  %v7734_v35 = vld [vmem:[#allocation8_spill] sm:$0xff] }
  0xbc   :  { %v5630_v12 = vpop.xlane.xlu1 %882  ;;  %v5632_v48 = vpop.xlane.xlu0 %877  ;;  %v2034_v58 = vadd.f32 %v2033_v0, %v2032_v52  ;;  %v1142_v29 = vmul.f32 %v7732_v6, %v7732_v6  ;;  %v1145_v59 = vmul.f32 %v7733_v38, %v7733_v38  ;;  %v7736_v52 = vld [vmem:[#allocation10_spill] sm:$0xff]  ;;  %v7737_v6 = vld [vmem:[#allocation11_spill] sm:$0xff] }
  0xbd   :  { %v2048_v61 = vsel %vm783_vm0, %v1519_v7, 0.0  ;;  %v1535_v26 = vrot.slane %v1141_v30, %v4711_v5  ;;  %v1146_v0 = vmul.f32 %v7736_v52, %v7736_v52 }
  0xbe   :  { %v1539_v25 = vrot.slane %v1142_v29, %v4709_v4  ;;  %v1543_v3 = vrot.slane %v1142_v29, %v4711_v5  ;;  %v1149_v29 = vmul.f32 %v7737_v6, %v7737_v6 }
  0xbf   :  { %2010 = vadd.xlane.f32.xlu1 %v2009_v37  ;;  %2005 = vadd.xlane.f32.xlu0 %v2004_v22  ;;  %v2047_v37 = vsel %vm783_vm0, %v1515_v57, 0.0  ;;  %v1531_v22 = vrot.slane %v1141_v30, %v4709_v4  ;;  %v1144_v57 = vmul.f32 %v7734_v35, %v7734_v35 }
  0xc0   :  { %v5647_v23 = vpop.xlane.xlu1 %892  ;;  %v5649_v9 = vpop.xlane.xlu0 %887  ;;  %v2063_v18 = vsel %vm783_vm0, %v1543_v3, 0.0 }
  0xc1   :  { %v2057_v20 = vsel %vm783_vm0, %v1531_v22, 0.0  ;;  %v1567_v22 = vrot.slane %v1145_v59, %v4711_v5  ;;  %v1555_v41 = vrot.slane %v1144_v57, %v4709_v4 }
  0xc3   :  { %2020 = vadd.xlane.f32.xlu1 %v2019_v2  ;;  %2015 = vadd.xlane.f32.xlu0 %v2014_v53  ;;  %v2049_v2 = vadd.f32 %v2048_v61, %v2047_v37  ;;  %v2058_v53 = vsel %vm783_vm0, %v1535_v26, 0.0  ;;  %v2068_v37 = vsel %vm783_vm0, %v1551_v34, 0.0  ;;  %v1563_v61 = vrot.slane %v1145_v59, %v4709_v4 }
  0xc4   :  { %v5663_v33 = vpop.xlane.xlu1 %902  ;;  %v5665_v56 = vpop.xlane.xlu0 %897  ;;  %v2062_v26 = vsel %vm783_vm0, %v1539_v25, 0.0  ;;  %v2078_v50 = vsel %vm783_vm0, %v1567_v22, 0.0  ;;  %v2072_v63 = vsel %vm783_vm0, %v1555_v41, 0.0  ;;  %v1575_v25 = vrot.slane %v1146_v0, %v4711_v5  ;;  %v7740_v22 = vld [vmem:[#allocation14_spill] sm:$0xff] }
  0xc5   :  { %v2077_v32 = vsel %vm783_vm0, %v1563_v61, 0.0 }
  0xc7   :  { %2030 = vadd.xlane.f32.xlu1 %v2029_v16  ;;  %2025 = vadd.xlane.f32.xlu0 %v2024_v28  ;;  %v1147_v16 = vmul.f32 %v7735_v62, %v7735_v62  ;;  %v2059_v28 = vadd.f32 %v2058_v53, %v2057_v20  ;;  %v2064_v53 = vadd.f32 %v2063_v18, %v2062_v26 }
  0xc8   :  { %v5681_v60 = vpop.xlane.xlu1 %912  ;;  %v5683_v44 = vpop.xlane.xlu0 %907  ;;  %v1595_v62 = vrot.slane %v1149_v29, %v4709_v4 }
  0xc9   :  { %v1583_v15 = vrot.slane %v1147_v16, %v4711_v5 }
  0xcb   :  { %2040 = vadd.xlane.f32.xlu1 %v2039_v11  ;;  %2035 = vadd.xlane.f32.xlu0 %v2034_v58  ;;  %v1559_v11 = vrot.slane %v1144_v57, %v4711_v5  ;;  %v1579_v58 = vrot.slane %v1147_v16, %v4709_v4  ;;  %v1571_v57 = vrot.slane %v1146_v0, %v4709_v4  ;;  %v2088_v3 = vsel %vm783_vm0, %v1583_v15, 0.0 }
  0xcc   :  { %v5697_v7 = vpop.xlane.xlu1 %922  ;;  %v5699_v30 = vpop.xlane.xlu0 %917  ;;  %v1599_v16 = vrot.slane %v1149_v29, %v4711_v5  ;;  %v1150_v0 = vmul.f32 %v7740_v22, %v7740_v22  ;;  %v2097_v15 = vsel %vm783_vm0, %v1595_v62, 0.0 }
  0xcd   :  { %v2073_v59 = vsel %vm783_vm0, %v1559_v11, 0.0  ;;  %v2087_v35 = vsel %vm783_vm0, %v1579_v58, 0.0  ;;  %v2082_v11 = vsel %vm783_vm0, %v1571_v57, 0.0  ;;  %v2083_v58 = vsel %vm783_vm0, %v1575_v25, 0.0 }
  0xce   :  { %v2074_v61 = vadd.f32 %v2073_v59, %v2072_v63  ;;  %v2089_v18 = vadd.f32 %v2088_v3, %v2087_v35  ;;  %v2098_v6 = vsel %vm783_vm0, %v1599_v16, 0.0  ;;  %v2084_v59 = vadd.f32 %v2083_v58, %v2082_v11 }
  0xcf   :  { %2050 = vadd.xlane.f32.xlu1 %v2049_v2  ;;  %2045 = vadd.xlane.f32.xlu0 %v2044_v13  ;;  %v2069_v2 = vadd.f32 %v2068_v37, %v2067_v47  ;;  %v7738_v13 = vld [vmem:[#allocation12_spill] sm:$0xff]  ;;  %v2079_v37 = vadd.f32 %v2078_v50, %v2077_v32  ;;  %v1603_v35 = vrot.slane %v1150_v0, %v4709_v4 }
  0xd0   :  { %v5712_v42 = vpop.xlane.xlu1 %932  ;;  %v5714_v49 = vpop.xlane.xlu0 %927  ;;  %v1148_v20 = vmul.f32 %v7738_v13, %v7738_v13  ;;  %v7742_v50 = vld [vmem:[#allocation16_spill] sm:$0xff]  ;;  %v1607_v57 = vrot.slane %v1150_v0, %v4711_v5  ;;  %v2099_v62 = vadd.f32 %v2098_v6, %v2097_v15  ;;  %v7744_v15 = vld [vmem:[#allocation18_spill] sm:$0xff] }
  0xd1   :  { %v1152_v63 = vmul.f32 %v7742_v50, %v7742_v50  ;;  %v2102_v0 = vsel %vm783_vm0, %v1603_v35, 0.0  ;;  %v1154_v6 = vmul.f32 %v7744_v15, %v7744_v15 }
  0xd2   :  { %v1587_v47 = vrot.slane %v1148_v20, %v4709_v4  ;;  %v1591_v52 = vrot.slane %v1148_v20, %v4711_v5  ;;  %v2103_v11 = vsel %vm783_vm0, %v1607_v57, 0.0 }
  0xd3   :  { %2060 = vadd.xlane.f32.xlu1 %v2059_v28  ;;  %2055 = vadd.xlane.f32.xlu0 %v2054_v21  ;;  %v7739_v28 = vld [vmem:[#allocation13_spill] sm:$0xff]  ;;  %v1623_v58 = vrot.slane %v1152_v63, %v4711_v5  ;;  %v1639_v15 = vrot.slane %v1154_v6, %v4711_v5 }
  0xd4   :  { %v5728_v34 = vpop.xlane.xlu1 %942  ;;  %v5730_v38 = vpop.xlane.xlu0 %937  ;;  %v1151_v21 = vmul.f32 %v7739_v28, %v7739_v28  ;;  %v2092_v20 = vsel %vm783_vm0, %v1587_v47, 0.0 }
  0xd5   :  { %v2113_v35 = vsel %vm783_vm0, %v1623_v58, 0.0 }
  0xd6   :  { %v1611_v29 = vrot.slane %v1151_v21, %v4709_v4  ;;  %v1615_v32 = vrot.slane %v1151_v21, %v4711_v5 }
  0xd7   :  { %2070 = vadd.xlane.f32.xlu1 %v2069_v2  ;;  %2065 = vadd.xlane.f32.xlu0 %v2064_v53  ;;  %v7741_v2 = vld [vmem:[#allocation15_spill] sm:$0xff]  ;;  %v2093_v53 = vsel %vm783_vm0, %v1591_v52, 0.0 }
  0xd8   :  { %v5745_v41 = vpop.xlane.xlu1 %952  ;;  %v5747_v26 = vpop.xlane.xlu0 %947  ;;  %v1153_v13 = vmul.f32 %v7741_v2, %v7741_v2  ;;  %v2094_v16 = vadd.f32 %v2093_v53, %v2092_v20  ;;  %v2107_v28 = vsel %vm783_vm0, %v1611_v29, 0.0  ;;  %v2108_v47 = vsel %vm783_vm0, %v1615_v32, 0.0 }
  0xd9   :  { %v2109_v53 = vadd.f32 %v2108_v47, %v2107_v28  ;;  %v2104_v32 = vadd.f32 %v2103_v11, %v2102_v0  ;;  %v7752_v11 = vld [vmem:[#allocation22_spill] sm:$0xff] }
  0xda   :  { %v1627_v21 = vrot.slane %v1153_v13, %v4709_v4  ;;  %v1631_v52 = vrot.slane %v1153_v13, %v4711_v5  ;;  %v7747_v13 = vld [vmem:[#allocation19_spill] sm:$0xff] }
  0xdb   :  { %2080 = vadd.xlane.f32.xlu1 %v2079_v37  ;;  %2075 = vadd.xlane.f32.xlu0 %v2074_v61  ;;  %v1619_v37 = vrot.slane %v1152_v63, %v4709_v4  ;;  %v7743_v61 = vld [vmem:[#allocation17_spill] sm:$0xff]  ;;  %v1157_v20 = vmul.f32 %v7747_v13, %v7747_v13 }
  0xdc   :  { %v5763_v25 = vpop.xlane.xlu1 %962  ;;  %v5765_v3 = vpop.xlane.xlu0 %957  ;;  %v1155_v22 = vmul.f32 %v7743_v61, %v7743_v61  ;;  %v2118_v50 = vsel %vm783_vm0, %v1631_v52, 0.0  ;;  %v1635_v61 = vrot.slane %v1154_v6, %v4709_v4 }
  0xdd   :  { %v1659_v47 = vrot.slane %v1157_v20, %v4709_v4  ;;  %v1663_v52 = vrot.slane %v1157_v20, %v4711_v5  ;;  %v2123_v20 = vsel %vm783_vm0, %v1639_v15, 0.0 }
  0xde   :  { %v1643_v63 = vrot.slane %v1155_v22, %v4709_v4  ;;  %v1647_v57 = vrot.slane %v1155_v22, %v4711_v5  ;;  %v1158_v22 = vmul.f32 %v7752_v11, %v7752_v11 }
  0xdf   :  { %2090 = vadd.xlane.f32.xlu1 %v2089_v18  ;;  %2085 = vadd.xlane.f32.xlu0 %v2084_v59  ;;  %v2117_v18 = vsel %vm783_vm0, %v1627_v21, 0.0  ;;  %v2112_v59 = vsel %vm783_vm0, %v1619_v37, 0.0  ;;  %v7750_v37 = vld [vmem:[#allocation20_spill] sm:$0xff]  ;;  %v2138_v11 = vsel %vm783_vm0, %v1663_v52, 0.0 }
  0xe0   :  { %v5779_v29 = vpop.xlane.xlu1 %972  ;;  %v5781_v2 = vpop.xlane.xlu0 %967  ;;  %v2119_v58 = vadd.f32 %v2118_v50, %v2117_v18  ;;  %v2114_v13 = vadd.f32 %v2113_v35, %v2112_v59  ;;  %v2127_v6 = vsel %vm783_vm0, %v1643_v63, 0.0  ;;  %v1667_v59 = vrot.slane %v1158_v22, %v4709_v4  ;;  %v7755_v63 = vld [vmem:[#allocation23_spill] sm:$0xff] }
  0xe1   :  { %7745 = vst [vmem:[#allocation6_spill] sm:$0xff] %v5779_v29  ;;  %7746 = vst [vmem:[#allocation7_spill] sm:$0xff] %v5781_v2  ;;  %v1161_v35 = vmul.f32 %v7755_v63, %v7755_v63 }
  0xe3   :  { %2100 = vadd.xlane.f32.xlu1 %v2099_v62  ;;  %2095 = vadd.xlane.f32.xlu0 %v2094_v16  ;;  %v1156_v62 = vmul.f32 %v7750_v37, %v7750_v37  ;;  %v7751_v16 = vld [vmem:[#allocation21_spill] sm:$0xff] }
  0xe4   :  { %v5793_v28 = vpop.xlane.xlu1 %982  ;;  %v5795_v21 = vpop.xlane.xlu0 %977  ;;  %v1159_v0 = vmul.f32 %v7751_v16, %v7751_v16  ;;  %v2137_v16 = vsel %vm783_vm0, %v1659_v47, 0.0  ;;  %v7756_v47 = vld [vmem:[#allocation24_spill] sm:$0xff] }
  0xe5   :  { %7748 = vst [vmem:[#allocation8_spill] sm:$0xff] %v5793_v28  ;;  %7749 = vst [vmem:[#allocation9_spill] sm:$0xff] %v5795_v21  ;;  %v2128_v21 = vsel %vm783_vm0, %v1647_v57, 0.0  ;;  %v2122_v28 = vsel %vm783_vm0, %v1635_v61, 0.0  ;;  %v1651_v18 = vrot.slane %v1156_v62, %v4709_v4  ;;  %v1671_v57 = vrot.slane %v1158_v22, %v4711_v5 }
  0xe6   :  { %v1679_v50 = vrot.slane %v1159_v0, %v4711_v5  ;;  %v2129_v61 = vadd.f32 %v2128_v21, %v2127_v6  ;;  %v2124_v15 = vadd.f32 %v2123_v20, %v2122_v28  ;;  %v1160_v52 = vmul.f32 %v7756_v47, %v7756_v47  ;;  %v7758_v6 = vld [vmem:[#allocation25_spill] sm:$0xff] }
  0xe7   :  { %2110 = vadd.xlane.f32.xlu1 %v2109_v53  ;;  %2105 = vadd.xlane.f32.xlu0 %v2104_v32  ;;  %v1655_v53 = vrot.slane %v1156_v62, %v4711_v5  ;;  %v1675_v32 = vrot.slane %v1159_v0, %v4709_v4  ;;  %v2132_v0 = vsel %vm783_vm0, %v1651_v18, 0.0  ;;  %v1691_v28 = vrot.slane %v1161_v35, %v4709_v4 }
  0xe8   :  { %v5809_v2 = vpop.xlane.xlu1 %992  ;;  %v5811_v37 = vpop.xlane.xlu0 %987  ;;  %v2148_v22 = vsel %vm783_vm0, %v1679_v50, 0.0  ;;  %v2143_v21 = vsel %vm783_vm0, %v1671_v57, 0.0  ;;  %v1163_v20 = vmul.f32 %v7758_v6, %v7758_v6 }
  0xe9   :  { %7753 = vst [vmem:[#allocation10_spill] sm:$0xff] %v5809_v2  ;;  %7754 = vst [vmem:[#allocation11_spill] sm:$0xff] %v5811_v37  ;;  %v2139_v2 = vadd.f32 %v2138_v11, %v2137_v16  ;;  %v2133_v29 = vsel %vm783_vm0, %v1655_v53, 0.0  ;;  %v2147_v63 = vsel %vm783_vm0, %v1675_v32, 0.0  ;;  %v7759_v16 = vld [vmem:[#allocation26_spill] sm:$0xff]  ;;  %v1683_v53 = vrot.slane %v1160_v52, %v4709_v4 }
  0xea   :  { %v1162_v11 = vmul.f32 %v7759_v16, %v7759_v16  ;;  %v2134_v18 = vadd.f32 %v2133_v29, %v2132_v0  ;;  %v1687_v32 = vrot.slane %v1160_v52, %v4711_v5  ;;  %v2149_v57 = vadd.f32 %v2148_v22, %v2147_v63  ;;  %v7760_v63 = vld [vmem:[#allocation27_spill] sm:$0xff] }
  0xeb   :  { %2120 = vadd.xlane.f32.xlu1 %v2119_v58  ;;  %2115 = vadd.xlane.f32.xlu0 %v2114_v13  ;;  %v2142_v58 = vsel %vm783_vm0, %v1667_v59, 0.0  ;;  %v1695_v13 = vrot.slane %v1161_v35, %v4711_v5  ;;  %v2157_v35 = vsel %vm783_vm0, %v1691_v28, 0.0  ;;  %v1165_v22 = vmul.f32 %v7760_v63, %v7760_v63 }
  0xec   :  { %v5825_v37 = vpop.xlane.xlu1 %1002  ;;  %v5827_v62 = vpop.xlane.xlu0 %997  ;;  %v2144_v47 = vadd.f32 %v2143_v21, %v2142_v58  ;;  %v1699_v29 = vrot.slane %v1162_v11, %v4709_v4  ;;  %v2153_v52 = vsel %vm783_vm0, %v1687_v32, 0.0  ;;  %v1703_v0 = vrot.slane %v1162_v11, %v4711_v5  ;;  %v7763_v21 = vld [vmem:[#allocation28_spill] sm:$0xff] }
  0xed   :  { %7757 = vst [vmem:[#allocation12_spill] sm:$0xff] %v5827_v62  ;;  %v2158_v6 = vsel %vm783_vm0, %v1695_v13, 0.0  ;;  %v1707_v62 = vrot.slane %v1163_v20, %v4709_v4  ;;  %v1164_v13 = vmul.f32 %v7763_v21, %v7763_v21  ;;  %v1723_v32 = vrot.slane %v1165_v22, %v4709_v4 }
  0xee   :  { %v2163_v11 = vsel %vm783_vm0, %v1703_v0, 0.0  ;;  %v1727_v63 = vrot.slane %v1165_v22, %v4711_v5 }
  0xef   :  { %2130 = vadd.xlane.f32.xlu1 %v2129_v61  ;;  %2125 = vadd.xlane.f32.xlu0 %v2124_v15  ;;  %v1711_v61 = vrot.slane %v1163_v20, %v4711_v5  ;;  %v2152_v15 = vsel %vm783_vm0, %v1683_v53, 0.0  ;;  %v2159_v20 = vadd.f32 %v2158_v6, %v2157_v35  ;;  %v2162_v53 = vsel %vm783_vm0, %v1699_v29, 0.0 }
  0xf0   :  { %v5843_v50 = vpop.xlane.xlu1 %1012  ;;  %v5845_v59 = vpop.xlane.xlu0 %1007  ;;  %v2154_v16 = vadd.f32 %v2153_v52, %v2152_v15  ;;  %v1719_v6 = vrot.slane %v1164_v13, %v4711_v5  ;;  %v2164_v29 = vadd.f32 %v2163_v11, %v2162_v53  ;;  %v2177_v15 = vsel %vm783_vm0, %v1723_v32, 0.0 }
  0xf1   :  { %v2178_v52 = vsel %vm783_vm0, %v1727_v63, 0.0 }
  0xf3   :  { %2140 = vadd.xlane.f32.xlu1 %v2139_v2  ;;  %2135 = vadd.xlane.f32.xlu0 %v2134_v18  ;;  %v2167_v2 = vsel %vm783_vm0, %v1707_v62, 0.0  ;;  %v2168_v18 = vsel %vm783_vm0, %v1711_v61, 0.0  ;;  %v1715_v62 = vrot.slane %v1164_v13, %v4709_v4  ;;  %v7766_v61 = vld [vmem:[#allocation30_spill] sm:$0xff] }
  0xf4   :  { %v5857_v58 = vpop.xlane.xlu1 %1022  ;;  %v5859_v28 = vpop.xlane.xlu0 %1017 }
  0xf5   :  { %7761 = vst [vmem:[#allocation13_spill] sm:$0xff] %v5857_v58  ;;  %7762 = vst [vmem:[#allocation14_spill] sm:$0xff] %v5859_v28  ;;  %v7764_v28 = vld [vmem:[#allocation29_spill] sm:$0xff]  ;;  %v2172_v13 = vsel %vm783_vm0, %v1715_v62, 0.0 }
  0xf6   :  { %v1167_v58 = vmul.f32 %v7764_v28, %v7764_v28 }
  0xf7   :  { %2150 = vadd.xlane.f32.xlu1 %v2149_v57  ;;  %2145 = vadd.xlane.f32.xlu0 %v2144_v47  ;;  %v1166_v57 = vmul.f32 %v7766_v61, %v7766_v61  ;;  %v2169_v47 = vadd.f32 %v2168_v18, %v2167_v2  ;;  %v2173_v61 = vsel %vm783_vm0, %v1719_v6, 0.0 }
  0xf8   :  { %v5871_v21 = vpop.xlane.xlu1 %1032  ;;  %v5873_v35 = vpop.xlane.xlu0 %1027  ;;  %v1739_v0 = vrot.slane %v1167_v58, %v4709_v4  ;;  %v1743_v22 = vrot.slane %v1167_v58, %v4711_v5  ;;  %v2174_v18 = vadd.f32 %v2173_v61, %v2172_v13 }
  0xf9   :  { %7765 = vst [vmem:[#allocation15_spill] sm:$0xff] %v5873_v35  ;;  %v1731_v2 = vrot.slane %v1166_v57, %v4709_v4 }
  0xfa   :  { %v2187_v58 = vsel %vm783_vm0, %v1739_v0, 0.0  ;;  %v2188_v32 = vsel %vm783_vm0, %v1743_v22, 0.0 }
  0xfb   :  { %2160 = vadd.xlane.f32.xlu1 %v2159_v20  ;;  %2155 = vadd.xlane.f32.xlu0 %v2154_v16  ;;  %v1735_v20 = vrot.slane %v1166_v57, %v4711_v5  ;;  %v2179_v16 = vadd.f32 %v2178_v52, %v2177_v15  ;;  %v2182_v63 = vsel %vm783_vm0, %v1731_v2, 0.0  ;;  %v2189_v6 = vadd.f32 %v2188_v32, %v2187_v58 }
  0xfc   :  { %v5883_v28 = vpop.xlane.xlu1 %1042  ;;  %v5885_v35 = vpop.xlane.xlu0 %1037  ;;  %v5929_v58 = vmul.f32 0.00390625, %v5505_v51  ;;  %v5940_v51 = vmul.f32 0.00390625, %v5519_v40 }
  0xfd   :  { %v2183_v62 = vsel %vm783_vm0, %v1735_v20, 0.0  ;;  %v5920_v20 = vmul.f32 0.00390625, %v5493_v36 }
  0xfe   :  { %v2184_v5 = vadd.f32 %v2183_v62, %v2182_v63  ;;  %7777 = vst [vmem:[#allocation26_spill] sm:$0xff] %v5929_v58 }
  0xff   :  { %2170 = vadd.xlane.f32.xlu1 %v2169_v47  ;;  %2165 = vadd.xlane.f32.xlu0 %v2164_v29  ;;  %7774 = vst [vmem:[#allocation23_spill] sm:$0xff] %v5920_v20  ;;  %v2448_v62 = vmul.f32 %v5920_v20, %v5920_v20 }
 0x100   :  { %v5891_v53 = vpop.xlane.xlu1 %1052  ;;  %v5893_v11 = vpop.xlane.xlu0 %1047 }
 0x103   :  { %2180 = vadd.xlane.f32.xlu1 %v2179_v16  ;;  %2175 = vadd.xlane.f32.xlu0 %v2174_v18  ;;  %v5923_v16 = vmul.f32 0.00390625, %v5507_v39  ;;  %v5926_v18 = vmul.f32 0.00390625, %v5491_v54  ;;  %v2451_v54 = vmul.f32 %v5929_v58, %v5929_v58 }
 0x104   :  { %v5899_v57 = vpop.xlane.xlu1 %1062  ;;  %v5901_v47 = vpop.xlane.xlu0 %1057 }
 0x105   :  { %7775 = vst [vmem:[#allocation24_spill] sm:$0xff] %v5923_v16  ;;  %7776 = vst [vmem:[#allocation25_spill] sm:$0xff] %v5926_v18  ;;  %v2450_v39 = vmul.f32 %v5926_v18, %v5926_v18 }
 0x107   :  { %2190 = vadd.xlane.f32.xlu1 %v2189_v6  ;;  %2185 = vadd.xlane.f32.xlu0 %v2184_v5  ;;  %v2449_v6 = vmul.f32 %v5923_v16, %v5923_v16 }
 0x108   :  { %v5903_v29 = vpop.xlane.xlu1 %1072  ;;  %v5905_v15 = vpop.xlane.xlu0 %1067 }
 0x109   :  { %7767 = vst [vmem:[#allocation16_spill] sm:$0xff] %v5905_v15 }
 0x10c   :  { %v5907_v52 = vpop.xlane.xlu1 %1082  ;;  %v5909_v0 = vpop.xlane.xlu0 %1077 }
 0x10d   :  { %7768 = vst [vmem:[#allocation17_spill] sm:$0xff] %v5907_v52  ;;  %7769 = vst [vmem:[#allocation18_spill] sm:$0xff] %v5909_v0 }
 0x110   :  { %v5911_v22 = vpop.xlane.xlu1 %1092  ;;  %v5913_v13 = vpop.xlane.xlu0 %1087 }
 0x111   :  { %7770 = vst [vmem:[#allocation19_spill] sm:$0xff] %v5911_v22  ;;  %7771 = vst [vmem:[#allocation20_spill] sm:$0xff] %v5913_v13 }
 0x114   :  { %v5915_v61 = vpop.xlane.xlu1 %1102  ;;  %v5917_v2 = vpop.xlane.xlu0 %1097 }
 0x115   :  { %7772 = vst [vmem:[#allocation21_spill] sm:$0xff] %v5915_v61  ;;  %7773 = vst [vmem:[#allocation22_spill] sm:$0xff] %v5917_v2 }
 0x118   :  { %v1881_v32 = vpop.xlane.xlu1 %1880  ;;  %v1876_v63 = vpop.xlane.xlu0 %1875 }
 0x119   :  { %v2385_v5 = vmul.f32 0.00390625, %v1881_v32  ;;  %v2384_v36 = vmul.f32 0.00390625, %v1876_v63  ;;  %v5943_v32 = vmul.f32 0.00390625, %v5521_v1 }
 0x11b   :  { %v2513_v4 = vsub.f32 %v2385_v5, %v2449_v6  ;;  %v2512_v2 = vsub.f32 %v2384_v36, %v2448_v62  ;;  %7778 = vst [vmem:[#allocation27_spill] sm:$0xff] %v5943_v32  ;;  %v2453_v36 = vmul.f32 %v5940_v51, %v5940_v51 }
 0x11c   :  { %v1891_v13 = vpop.xlane.xlu1 %1890  ;;  %v1886_v61 = vpop.xlane.xlu0 %1885 }
 0x11d   :  { %v2577_v0 = vmax.f32 %v2513_v4, 0.0  ;;  %v2576_v20 = vmax.f32 %v2512_v2, 0.0  ;;  %v2387_v22 = vmul.f32 0.00390625, %v1891_v13  ;;  %v2386_v15 = vmul.f32 0.00390625, %v1886_v61 }
 0x11e   :  { %v2452_v4 = vmul.f32 %v5943_v32, %v5943_v32  ;;  %v5950_v13 = vmul.f32 0.00390625, %v5537_v55 }
 0x11f   :  { %v2641_v63 = vadd.f32 1e-05, %v2577_v0  ;;  %v2640_v62 = vadd.f32 1e-05, %v2576_v20  ;;  %v2515_v6 = vsub.f32 %v2387_v22, %v2451_v54  ;;  %v2514_v5 = vsub.f32 %v2386_v15, %v2450_v39 }
 0x120   :  { %v1901_v18 = vpop.xlane.xlu1 %1900  ;;  %v1896_v58 = vpop.xlane.xlu0 %1895  ;;  %7779 = vst [vmem:[#allocation28_spill] sm:$0xff] %v5950_v13  ;;  %v5953_v20 = vmul.f32 0.00390625, %v5551_v27 }
 0x121   :  { %4458 = vrsqrt.f32 %v2641_v63  ;;  %v2579_v40 = vmax.f32 %v2515_v6, 0.0  ;;  %v2578_v16 = vmax.f32 %v2514_v5, 0.0  ;;  %v2389_v52 = vmul.f32 0.00390625, %v1901_v18 }
 0x122   :  { %4460 = vrsqrt.f32 %v2640_v62  ;;  %v2388_v1 = vmul.f32 0.00390625, %v1896_v58  ;;  %v5956_v18 = vmul.f32 0.00390625, %v5535_v31  ;;  %v2454_v63 = vmul.f32 %v5950_v13, %v5950_v13 }
 0x123   :  { %v2642_v0 = vadd.f32 1e-05, %v2578_v16  ;;  %v2517_v22 = vsub.f32 %v2389_v52, %v2453_v36  ;;  %v2643_v39 = vadd.f32 1e-05, %v2579_v40  ;;  %v5961_v58 = vmul.f32 0.00390625, %v5569_v14 }
 0x124   :  { %v2516_v15 = vsub.f32 %v2388_v1, %v2452_v4  ;;  %v1911_v61 = vpop.xlane.xlu1 %1910  ;;  %v1906_v2 = vpop.xlane.xlu0 %1905  ;;  %v2457_v27 = vmul.f32 %v5953_v20, %v5953_v20  ;;  %v2769_v40 = vld [vmem:[%s7601_s1 + $0x1] sm:$0x1]  ;;  %v2455_v4 = vmul.f32 %v5956_v18, %v5956_v18  ;;  %v5971_v14 = vmul.f32 0.00390625, %v5553_v8 }
 0x125   :  { %v2390_v54 = vmul.f32 0.00390625, %v1906_v2  ;;  %4462 = vrsqrt.f32 %v2642_v0  ;;  %7780 = vst [vmem:[#allocation29_spill] sm:$0xff] %v5961_v58  ;;  %v2581_v52 = vmax.f32 %v2517_v22, 0.0  ;;  %v2391_v16 = vmul.f32 0.00390625, %v1911_v61  ;;  %v2768_v2 = vld [vmem:[%s7601_s1] sm:$0x1] }
 0x126   :  { %v2580_v55 = vmax.f32 %v2516_v15, 0.0  ;;  %4464 = vrsqrt.f32 %v2643_v39  ;;  %7781 = vst [vmem:[#allocation30_spill] sm:$0xff] %v5971_v14  ;;  %v5974_v1 = vmul.f32 0.00390625, %v5571_v24  ;;  %v2459_v22 = vmul.f32 %v5961_v58, %v5961_v58 }
 0x127   :  { %v2518_v62 = vsub.f32 %v2390_v54, %v2454_v63  ;;  %v2645_v15 = vadd.f32 1e-05, %v2581_v52  ;;  %v2519_v54 = vsub.f32 %v2391_v16, %v2455_v4  ;;  %v5984_v24 = vmul.f32 0.00390625, %v5587_v10 }
 0x128   :  { %v1921_v6 = vpop.xlane.xlu1 %1920  ;;  %v1916_v5 = vpop.xlane.xlu0 %1915  ;;  %v2644_v36 = vadd.f32 1e-05, %v2580_v55  ;;  %7782 = vst [vmem:[#allocation31_spill] sm:$0xff] %v5974_v1  ;;  %v2456_v52 = vmul.f32 %v5971_v14, %v5971_v14  ;;  %v5991_v16 = vmul.f32 0.00390625, %v5589_v43 }
 0x129   :  { %v2393_v31 = vmul.f32 0.00390625, %v1921_v6  ;;  %v2582_v63 = vmax.f32 %v2518_v62, 0.0  ;;  %v2392_v55 = vmul.f32 0.00390625, %v1916_v5  ;;  %v5997_v5 = vmul.f32 0.00390625, %v5603_v45 }
 0x12a   :  { %4466 = vrsqrt.f32 %v2644_v36  ;;  %7783 = vst [vmem:[#allocation32_spill] sm:$0xff] %v5991_v16  ;;  %v2461_v45 = vmul.f32 %v5984_v24, %v5984_v24 }
 0x12b   :  { %v4459_v0 = vpop.eup %4458  ;;  %v2521_v61 = vsub.f32 %v2393_v31, %v2457_v27  ;;  %v2458_v27 = vmul.f32 %v5974_v1, %v5974_v1  ;;  %7784 = vst [vmem:[#allocation33_spill] sm:$0xff] %v5997_v5  ;;  %4468 = vrsqrt.f32 %v2645_v15  ;;  %v2520_v43 = vsub.f32 %v2392_v55, %v2456_v52  ;;  %v2771_v1 = vld [vmem:[%s7601_s1 + $0x3] sm:$0x1] }
 0x12c   :  { %v4461_v39 = vpop.eup %4460  ;;  %v1931_v6 = vpop.xlane.xlu1 %1930  ;;  %v5981_v13 = vmul.f32 %v4459_v0, %v2769_v40  ;;  %v2770_v40 = vld [vmem:[%s7601_s1 + $0x2] sm:$0x1]  ;;  %v2583_v0 = vmax.f32 %v2519_v54, 0.0 }
 0x12d   :  { %v1926_v8 = vpop.xlane.xlu0 %1925  ;;  %v2585_v32 = vmax.f32 %v2521_v61, 0.0  ;;  %v2395_v58 = vmul.f32 0.00390625, %v1931_v6  ;;  %v5994_v62 = vmul.f32 %v4461_v39, %v2768_v2  ;;  %v2646_v61 = vadd.f32 1e-05, %v2582_v63 }
 0x12e   :  { %3099 = vperm.xlu1 %4457, %v5981_v13   ;;  %v2394_v31 = vmul.f32 0.00390625, %v1926_v8  ;;  %v6008_v39 = vmul.f32 0.00390625, %v5605_v17 }
 0x12f   :  { %v2649_v10 = vadd.f32 1e-05, %v2585_v32  ;;  %v2523_v36 = vsub.f32 %v2395_v58, %v2459_v22  ;;  %v4463_v4 = vpop.eup %4462  ;;  %3090 = vperm.xlu0 %4456, %v5994_v62   ;;  %v2460_v22 = vmul.f32 %v5991_v16, %v5991_v16 }
 0x130   :  { %v1941_v6 = vpop.xlane.xlu1 %1940  ;;  %7785 = vst [vmem:[#allocation34_spill] sm:$0xff] %v6008_v39  ;;  %v6010_v15 = vmul.f32 %v4463_v4, %v2770_v40  ;;  %v4465_v54 = vpop.eup %4464  ;;  %v2522_v55 = vsub.f32 %v2394_v31, %v2458_v27  ;;  %v6019_v4 = vmul.f32 0.00390625, %v5616_v46  ;;  %v2772_v46 = vld [vmem:[%s7601_s1 + $0x4] sm:$0x1] }
 0x131   :  { %v1936_v2 = vpop.xlane.xlu0 %1935  ;;  %4470 = vrsqrt.f32 %v2649_v10  ;;  %v2587_v32 = vmax.f32 %v2523_v36, 0.0  ;;  %v2397_v58 = vmul.f32 0.00390625, %v1941_v6  ;;  %v2463_v10 = vmul.f32 %v5997_v5, %v5997_v5 }
 0x132   :  { %v2396_v52 = vmul.f32 0.00390625, %v1936_v2  ;;  %v2647_v36 = vadd.f32 1e-05, %v2583_v0  ;;  %4472 = vrsqrt.f32 %v2646_v61  ;;  %v2584_v6 = vmax.f32 %v2520_v43, 0.0  ;;  %3108 = vperm.xlu1 %4457, %v6010_v15   ;;  %7786 = vst [vmem:[#allocation35_spill] sm:$0xff] %v6019_v4 }
 0x133   :  { %v2651_v63 = vadd.f32 1e-05, %v2587_v32  ;;  %v2525_v8 = vsub.f32 %v2397_v58, %v2461_v45  ;;  %v6022_v2 = vmul.f32 0.00390625, %v5618_v19  ;;  %v6025_v45 = vmul.f32 0.00390625, %v5630_v12 }
 0x134   :  { %v1951_v17 = vpop.xlane.xlu1 %1950  ;;  %v6027_v32 = vmul.f32 %v4465_v54, %v2771_v1  ;;  %v4467_v0 = vpop.eup %4466  ;;  %v2586_v61 = vmax.f32 %v2522_v55, 0.0  ;;  %v2524_v58 = vsub.f32 %v2396_v52, %v2460_v22  ;;  %v2648_v19 = vadd.f32 1e-05, %v2584_v6  ;;  %v2777_v52 = vld [vmem:[%s7601_s1 + $0x9] sm:$0x1] }
 0x135   :  { %v1946_v40 = vpop.xlane.xlu0 %1945  ;;  %4474 = vrsqrt.f32 %v2651_v63  ;;  %v2589_v27 = vmax.f32 %v2525_v8, 0.0  ;;  %v2399_v31 = vmul.f32 0.00390625, %v1951_v17  ;;  %7787 = vst [vmem:[#allocation36_spill] sm:$0xff] %v6022_v2  ;;  %7788 = vst [vmem:[#allocation37_spill] sm:$0xff] %v6025_v45  ;;  %v2462_v63 = vmul.f32 %v6008_v39, %v6008_v39 }
 0x136   :  { %4476 = vrsqrt.f32 %v2647_v36  ;;  %v2398_v8 = vmul.f32 0.00390625, %v1946_v40  ;;  %3117 = vperm.xlu1 %4457, %v6027_v32   ;;  %v2465_v54 = vmul.f32 %v6019_v4, %v6019_v4  ;;  %v2464_v36 = vmul.f32 %v6022_v2, %v6022_v2 }
 0x137   :  { %v2653_v43 = vadd.f32 1e-05, %v2589_v27  ;;  %v2527_v16 = vsub.f32 %v2399_v31, %v2463_v10  ;;  %v4469_v10 = vpop.eup %4468  ;;  %v2467_v6 = vmul.f32 %v6025_v45, %v6025_v45  ;;  %v6045_v17 = vmul.f32 0.00390625, %v5632_v48 }
 0x138   :  { %v1961_v12 = vpop.xlane.xlu1 %1960  ;;  %v6047_v40 = vmul.f32 %v4467_v0, %v2772_v46  ;;  %v2650_v31 = vadd.f32 1e-05, %v2586_v61  ;;  %v2526_v4 = vsub.f32 %v2398_v8, %v2462_v63  ;;  %v6056_v0 = vmul.f32 0.00390625, %v5647_v23  ;;  %v2779_v61 = vld [vmem:[%s7601_s1 + $0xb] sm:$0x1] }
 0x139   :  { %v1956_v1 = vpop.xlane.xlu0 %1955  ;;  %4478 = vrsqrt.f32 %v2653_v43  ;;  %v2591_v22 = vmax.f32 %v2527_v16, 0.0  ;;  %v2401_v55 = vmul.f32 0.00390625, %v1961_v12  ;;  %7789 = vst [vmem:[#allocation38_spill] sm:$0xff] %v6045_v17  ;;  %v2773_v16 = vld [vmem:[%s7601_s1 + $0x5] sm:$0x1]  ;;  %v2588_v43 = vmax.f32 %v2524_v58, 0.0 }
 0x13a   :  { %4480 = vrsqrt.f32 %v2648_v19  ;;  %v2400_v2 = vmul.f32 0.00390625, %v1956_v1  ;;  %3126 = vperm.xlu1 %4457, %v6047_v40   ;;  %7790 = vst [vmem:[#allocation39_spill] sm:$0xff] %v6056_v0  ;;  %v2466_v63 = vmul.f32 %v6045_v17, %v6045_v17  ;;  %v6064_v19 = vmul.f32 0.00390625, %v5649_v9 }
 0x13b   :  { %v4471_v27 = vpop.eup %4470  ;;  %v2655_v12 = vadd.f32 1e-05, %v2591_v22  ;;  %v2529_v39 = vsub.f32 %v2401_v55, %v2465_v54  ;;  %v6067_v8 = vmul.f32 0.00390625, %v5663_v33  ;;  %v6070_v23 = vmul.f32 %v4469_v10, %v2773_v16  ;;  %v2774_v22 = vld [vmem:[%s7601_s1 + $0x6] sm:$0x1] }
 0x13c   :  { %v1971_v45 = vpop.xlane.xlu1 %1970  ;;  %v6053_v48 = vmul.f32 %v4471_v27, %v2777_v52  ;;  %v4473_v58 = vpop.eup %4472  ;;  %7791 = vst [vmem:[#allocation40_spill] sm:$0xff] %v6064_v19  ;;  %v2590_v55 = vmax.f32 %v2526_v4, 0.0  ;;  %v2528_v52 = vsub.f32 %v2400_v2, %v2464_v36  ;;  %v2469_v10 = vmul.f32 %v6056_v0, %v6056_v0 }
 0x13d   :  { %v1966_v14 = vpop.xlane.xlu0 %1965  ;;  %4482 = vrsqrt.f32 %v2655_v12  ;;  %v2593_v46 = vmax.f32 %v2529_v39, 0.0  ;;  %v2403_v5 = vmul.f32 0.00390625, %v1971_v45  ;;  %7792 = vst [vmem:[#allocation41_spill] sm:$0xff] %v6067_v8  ;;  %v2652_v45 = vadd.f32 1e-05, %v2588_v43 }
 0x13e   :  { %3171 = vperm.xlu0 %4456, %v6053_v48   ;;  %4484 = vrsqrt.f32 %v2650_v31  ;;  %v2402_v9 = vmul.f32 0.00390625, %v1966_v14  ;;  %3135 = vperm.xlu1 %4457, %v6070_v23   ;;  %v2468_v14 = vmul.f32 %v6064_v19, %v6064_v19  ;;  %v2471_v4 = vmul.f32 %v6067_v8, %v6067_v8 }
 0x13f   :  { %v4475_v39 = vpop.eup %4474  ;;  %v2657_v1 = vadd.f32 1e-05, %v2593_v46  ;;  %v2531_v54 = vsub.f32 %v2403_v5, %v2467_v6  ;;  %v2781_v5 = vld [vmem:[%s7601_s1 + $0xd] sm:$0x1]  ;;  %v6088_v2 = vmul.f32 0.00390625, %v5665_v56  ;;  %v6091_v36 = vmul.f32 %v4473_v58, %v2774_v22 }
 0x140   :  { %v1981_v33 = vpop.xlane.xlu1 %1980  ;;  %v6076_v12 = vmul.f32 %v4475_v39, %v2779_v61  ;;  %v4477_v6 = vpop.eup %4476  ;;  %v2530_v19 = vsub.f32 %v2402_v9, %v2466_v63  ;;  %v6100_v58 = vmul.f32 0.00390625, %v5681_v60 }
 0x141   :  { %v1976_v27 = vpop.xlane.xlu0 %1975  ;;  %4486 = vrsqrt.f32 %v2657_v1  ;;  %v2595_v16 = vmax.f32 %v2531_v54, 0.0  ;;  %v2405_v31 = vmul.f32 0.00390625, %v1981_v33  ;;  %7793 = vst [vmem:[#allocation42_spill] sm:$0xff] %v6088_v2  ;;  %v2775_v1 = vld [vmem:[%s7601_s1 + $0x7] sm:$0x1]  ;;  %v2592_v33 = vmax.f32 %v2528_v52, 0.0 }
 0x142   :  { %3189 = vperm.xlu0 %4456, %v6076_v12   ;;  %4488 = vrsqrt.f32 %v2652_v45  ;;  %v2404_v39 = vmul.f32 0.00390625, %v1976_v27  ;;  %v2654_v54 = vadd.f32 1e-05, %v2590_v55  ;;  %3144 = vperm.xlu1 %4457, %v6091_v36   ;;  %7794 = vst [vmem:[#allocation43_spill] sm:$0xff] %v6100_v58  ;;  %v2783_v27 = vld [vmem:[%s7601_s1 + $0xf] sm:$0x1]  ;;  %v2470_v63 = vmul.f32 %v6088_v2, %v6088_v2 }
 0x143   :  { %v4479_v43 = vpop.eup %4478  ;;  %v2659_v46 = vadd.f32 1e-05, %v2595_v16  ;;  %v2533_v61 = vsub.f32 %v2405_v31, %v2469_v10  ;;  %v6108_v55 = vmul.f32 0.00390625, %v5683_v44  ;;  %v6111_v52 = vmul.f32 0.00390625, %v5697_v7 }
 0x144   :  { %v1991_v56 = vpop.xlane.xlu1 %1990  ;;  %v6097_v8 = vmul.f32 %v4479_v43, %v2781_v5  ;;  %v4481_v10 = vpop.eup %4480  ;;  %v6114_v60 = vmul.f32 %v4477_v6, %v2775_v1  ;;  %v2532_v31 = vsub.f32 %v2404_v39, %v2468_v14  ;;  %v2594_v44 = vmax.f32 %v2530_v19, 0.0 }
 0x145   :  { %v1986_v17 = vpop.xlane.xlu0 %1985  ;;  %4490 = vrsqrt.f32 %v2659_v46  ;;  %v2597_v45 = vmax.f32 %v2533_v61, 0.0  ;;  %v2407_v22 = vmul.f32 0.00390625, %v1991_v56  ;;  %7795 = vst [vmem:[#allocation44_spill] sm:$0xff] %v6108_v55  ;;  %7796 = vst [vmem:[#allocation45_spill] sm:$0xff] %v6111_v52  ;;  %v2776_v46 = vld [vmem:[%s7601_s1 + $0x8] sm:$0x1]  ;;  %v2473_v1 = vmul.f32 %v6100_v58, %v6100_v58 }
 0x146   :  { %3207 = vperm.xlu0 %4456, %v6097_v8   ;;  %v2406_v43 = vmul.f32 0.00390625, %v1986_v17  ;;  %4492 = vrsqrt.f32 %v2654_v54  ;;  %v2656_v61 = vadd.f32 1e-05, %v2592_v33  ;;  %3153 = vperm.xlu1 %4457, %v6114_v60   ;;  %v2472_v19 = vmul.f32 %v6108_v55, %v6108_v55 }
 0x147   :  { %v4483_v9 = vpop.eup %4482  ;;  %v2661_v16 = vadd.f32 1e-05, %v2597_v45  ;;  %v2535_v5 = vsub.f32 %v2407_v22, %v2471_v4  ;;  %v2785_v4 = vld [vmem:[%s7601_s1 + $0x11] sm:$0x1]  ;;  %v2475_v39 = vmul.f32 %v6111_v52, %v6111_v52  ;;  %v6132_v54 = vmul.f32 0.00390625, %v5699_v30 }
 0x148   :  { %v2001_v7 = vpop.xlane.xlu1 %2000  ;;  %v6120_v2 = vmul.f32 %v4483_v9, %v2783_v27  ;;  %v4485_v6 = vpop.eup %4484  ;;  %v6135_v33 = vmul.f32 %v4481_v10, %v2776_v46  ;;  %v2596_v22 = vmax.f32 %v2532_v31, 0.0  ;;  %v2534_v9 = vsub.f32 %v2406_v43, %v2470_v63  ;;  %v2787_v43 = vld [vmem:[%s7601_s1 + $0x13] sm:$0x1] }
 0x149   :  { %v1996_v56 = vpop.xlane.xlu0 %1995  ;;  %4494 = vrsqrt.f32 %v2661_v16  ;;  %v2599_v14 = vmax.f32 %v2535_v5, 0.0  ;;  %v2409_v17 = vmul.f32 0.00390625, %v2001_v7  ;;  %7797 = vst [vmem:[#allocation46_spill] sm:$0xff] %v6132_v54  ;;  %v2778_v5 = vld [vmem:[%s7601_s1 + $0xa] sm:$0x1]  ;;  %v6144_v46 = vmul.f32 0.00390625, %v5712_v42 }
 0x14a   :  { %3225 = vperm.xlu0 %4456, %v6120_v2   ;;  %4496 = vrsqrt.f32 %v2656_v61  ;;  %v2658_v7 = vadd.f32 1e-05, %v2594_v44  ;;  %v2408_v55 = vmul.f32 0.00390625, %v1996_v56  ;;  %3162 = vperm.xlu1 %4457, %v6135_v33   ;;  %v2474_v61 = vmul.f32 %v6132_v54, %v6132_v54 }
 0x14b   :  { %v4487_v45 = vpop.eup %4486  ;;  %v2663_v27 = vadd.f32 1e-05, %v2599_v14  ;;  %v2537_v16 = vsub.f32 %v2409_v17, %v2473_v1  ;;  %7798 = vst [vmem:[#allocation47_spill] sm:$0xff] %v6144_v46  ;;  %v6152_v44 = vmul.f32 0.00390625, %v5714_v49  ;;  %v6155_v56 = vmul.f32 0.00390625, %v5728_v34 }
 0x14c   :  { %v2011_v30 = vpop.xlane.xlu1 %2010  ;;  %v6141_v58 = vmul.f32 %v4487_v45, %v2785_v4  ;;  %v4489_v10 = vpop.eup %4488  ;;  %v6158_v42 = vmul.f32 %v4485_v6, %v2778_v5  ;;  %v2780_v1 = vld [vmem:[%s7601_s1 + $0xc] sm:$0x1]  ;;  %v2660_v17 = vadd.f32 1e-05, %v2596_v22  ;;  %v2598_v4 = vmax.f32 %v2534_v9, 0.0 }
 0x14d   :  { %v2006_v52 = vpop.xlane.xlu0 %2005  ;;  %4498 = vrsqrt.f32 %v2663_v27  ;;  %v2601_v63 = vmax.f32 %v2537_v16, 0.0  ;;  %v2411_v31 = vmul.f32 0.00390625, %v2011_v30  ;;  %7799 = vst [vmem:[#allocation48_spill] sm:$0xff] %v6152_v44  ;;  %7800 = vst [vmem:[#allocation49_spill] sm:$0xff] %v6155_v56  ;;  %v2536_v16 = vsub.f32 %v2408_v55, %v2472_v19  ;;  %v2789_v22 = vld [vmem:[%s7601_s1 + $0x15] sm:$0x1] }
 0x14e   :  { %3243 = vperm.xlu0 %4456, %v6141_v58   ;;  %4500 = vrsqrt.f32 %v2658_v7  ;;  %v2410_v49 = vmul.f32 0.00390625, %v2006_v52  ;;  %3180 = vperm.xlu1 %4457, %v6158_v42   ;;  %v2477_v6 = vmul.f32 %v6144_v46, %v6144_v46  ;;  %v2476_v55 = vmul.f32 %v6152_v44, %v6152_v44 }
 0x14f   :  { %v4491_v14 = vpop.eup %4490  ;;  %v2665_v45 = vadd.f32 1e-05, %v2601_v63  ;;  %v2539_v27 = vsub.f32 %v2411_v31, %v2475_v39  ;;  %v2479_v52 = vmul.f32 %v6155_v56, %v6155_v56  ;;  %v6176_v19 = vmul.f32 0.00390625, %v5730_v38 }
 0x150   :  { %v2021_v34 = vpop.xlane.xlu1 %2020  ;;  %v6164_v54 = vmul.f32 %v4491_v14, %v2787_v43  ;;  %v4493_v39 = vpop.eup %4492  ;;  %v6179_v9 = vmul.f32 %v4489_v10, %v2780_v1  ;;  %v2662_v63 = vadd.f32 1e-05, %v2598_v4  ;;  %v2782_v14 = vld [vmem:[%s7601_s1 + $0xe] sm:$0x1]  ;;  %v6188_v10 = vmul.f32 0.00390625, %v5745_v41 }
 0x151   :  { %v2016_v30 = vpop.xlane.xlu0 %2015  ;;  %4502 = vrsqrt.f32 %v2665_v45  ;;  %v2603_v5 = vmax.f32 %v2539_v27, 0.0  ;;  %v2413_v0 = vmul.f32 0.00390625, %v2021_v34  ;;  %7801 = vst [vmem:[#allocation50_spill] sm:$0xff] %v6176_v19  ;;  %v2600_v45 = vmax.f32 %v2536_v16, 0.0 }
 0x152   :  { %3261 = vperm.xlu0 %4456, %v6164_v54   ;;  %4504 = vrsqrt.f32 %v2660_v17  ;;  %v2538_v27 = vsub.f32 %v2410_v49, %v2474_v61  ;;  %v2412_v34 = vmul.f32 0.00390625, %v2016_v30  ;;  %3198 = vperm.xlu1 %4457, %v6179_v9   ;;  %7802 = vst [vmem:[#allocation51_spill] sm:$0xff] %v6188_v10  ;;  %v2478_v61 = vmul.f32 %v6176_v19, %v6176_v19 }
 0x153   :  { %v4495_v7 = vpop.eup %4494  ;;  %v2667_v31 = vadd.f32 1e-05, %v2603_v5  ;;  %v2541_v43 = vsub.f32 %v2413_v0, %v2477_v6  ;;  %v2791_v0 = vld [vmem:[%s7601_s1 + $0x17] sm:$0x1]  ;;  %v6196_v16 = vmul.f32 0.00390625, %v5747_v26  ;;  %v6199_v49 = vmul.f32 0.00390625, %v5763_v25 }
 0x154   :  { %v2031_v38 = vpop.xlane.xlu1 %2030  ;;  %v6185_v56 = vmul.f32 %v4495_v7, %v2789_v22  ;;  %v4497_v4 = vpop.eup %4496  ;;  %v6202_v41 = vmul.f32 %v4493_v39, %v2782_v14  ;;  %v2784_v7 = vld [vmem:[%s7601_s1 + $0x10] sm:$0x1]  ;;  %v2540_v26 = vsub.f32 %v2412_v34, %v2476_v55  ;;  %v2481_v39 = vmul.f32 %v6188_v10, %v6188_v10 }
 0x155   :  { %v2026_v44 = vpop.xlane.xlu0 %2025  ;;  %4506 = vrsqrt.f32 %v2667_v31  ;;  %v2605_v1 = vmax.f32 %v2541_v43, 0.0  ;;  %v2415_v17 = vmul.f32 0.00390625, %v2031_v38  ;;  %7803 = vst [vmem:[#allocation52_spill] sm:$0xff] %v6196_v16  ;;  %7804 = vst [vmem:[#allocation53_spill] sm:$0xff] %v6199_v49  ;;  %v2664_v31 = vadd.f32 1e-05, %v2600_v45 }
 0x156   :  { %3279 = vperm.xlu0 %4456, %v6185_v56   ;;  %4508 = vrsqrt.f32 %v2662_v63  ;;  %v2414_v22 = vmul.f32 0.00390625, %v2026_v44  ;;  %v2602_v43 = vmax.f32 %v2538_v27, 0.0  ;;  %3216 = vperm.xlu1 %4457, %v6202_v41   ;;  %v2793_v44 = vld [vmem:[%s7601_s1 + $0x19] sm:$0x1]  ;;  %v2480_v55 = vmul.f32 %v6196_v16, %v6196_v16 }
 0x157   :  { %v4499_v30 = vpop.eup %4498  ;;  %v2669_v6 = vadd.f32 1e-05, %v2605_v1  ;;  %v2543_v5 = vsub.f32 %v2415_v17, %v2479_v52  ;;  %v2483_v45 = vmul.f32 %v6199_v49, %v6199_v49  ;;  %v6220_v27 = vmul.f32 0.00390625, %v5765_v3 }
 0x158   :  { %v2041_v25 = vpop.xlane.xlu1 %2040  ;;  %v6208_v19 = vmul.f32 %v4499_v30, %v2791_v0  ;;  %v4501_v14 = vpop.eup %4500  ;;  %v6223_v34 = vmul.f32 %v4497_v4, %v2784_v7  ;;  %v2542_v0 = vsub.f32 %v2414_v22, %v2478_v61  ;;  %v2604_v16 = vmax.f32 %v2540_v26, 0.0  ;;  %v7809_v7 = vld [vmem:[#allocation6_spill] sm:$0xff] }
 0x159   :  { %v2036_v38 = vpop.xlane.xlu0 %2035  ;;  %4510 = vrsqrt.f32 %v2669_v6  ;;  %v2607_v63 = vmax.f32 %v2543_v5, 0.0  ;;  %v2417_v52 = vmul.f32 0.00390625, %v2041_v25  ;;  %7806 = vst [vmem:[#allocation55_spill] sm:$0xff] %v6220_v27  ;;  %v2786_v5 = vld [vmem:[%s7601_s1 + $0x12] sm:$0x1]  ;;  %v6232_v46 = vmul.f32 0.00390625, %v7809_v7 }
 0x15a   :  { %7805 = vst [vmem:[#allocation54_spill] sm:$0xff] %v6208_v19  ;;  %3297 = vperm.xlu0 %4456, %v6208_v19   ;;  %7807 = vst [vmem:[#allocation56_spill] sm:$0xff] %v6223_v34  ;;  %v2416_v6 = vmul.f32 0.00390625, %v2036_v38  ;;  %4512 = vrsqrt.f32 %v2664_v31  ;;  %v2666_v25 = vadd.f32 1e-05, %v2602_v43  ;;  %3234 = vperm.xlu1 %4457, %v6223_v34   ;;  %v2482_v31 = vmul.f32 %v6220_v27, %v6220_v27  ;;  %v7811_v43 = vld [vmem:[#allocation7_spill] sm:$0xff] }
 0x15b   :  { %v4503_v1 = vpop.eup %4502  ;;  %v2671_v17 = vadd.f32 1e-05, %v2607_v63  ;;  %v2545_v30 = vsub.f32 %v2417_v52, %v2481_v39  ;;  %7810 = vst [vmem:[#allocation6_spill] sm:$0xff] %v6232_v46  ;;  %v2795_v38 = vld [vmem:[%s7601_s1 + $0x1b] sm:$0x1]  ;;  %v6240_v26 = vmul.f32 0.00390625, %v7811_v43  ;;  %v6246_v52 = vmul.f32 %v4501_v14, %v2786_v5 }
 0x15c   :  { %v2051_v3 = vpop.xlane.xlu1 %2050  ;;  %v6229_v10 = vmul.f32 %v4503_v1, %v2793_v44  ;;  %v4505_v4 = vpop.eup %4504  ;;  %v7813_v39 = vld [vmem:[#allocation8_spill] sm:$0xff]  ;;  %v2606_v1 = vmax.f32 %v2542_v0, 0.0  ;;  %v2788_v7 = vld [vmem:[%s7601_s1 + $0x14] sm:$0x1]  ;;  %v2668_v27 = vadd.f32 1e-05, %v2604_v16  ;;  %v2485_v0 = vmul.f32 %v6232_v46, %v6232_v46 }
 0x15d   :  { %v2046_v49 = vpop.xlane.xlu0 %2045  ;;  %4514 = vrsqrt.f32 %v2671_v17  ;;  %v2609_v61 = vmax.f32 %v2545_v30, 0.0  ;;  %v2419_v22 = vmul.f32 0.00390625, %v2051_v3  ;;  %7812 = vst [vmem:[#allocation7_spill] sm:$0xff] %v6240_v26  ;;  %v6243_v63 = vmul.f32 0.00390625, %v7813_v39  ;;  %7815 = vst [vmem:[#allocation58_spill] sm:$0xff] %v6246_v52  ;;  %v7817_v5 = vld [vmem:[#allocation9_spill] sm:$0xff] }
 0x15e   :  { %7808 = vst [vmem:[#allocation57_spill] sm:$0xff] %v6229_v10  ;;  %3315 = vperm.xlu0 %4456, %v6229_v10   ;;  %v2544_v30 = vsub.f32 %v2416_v6, %v2480_v55  ;;  %4516 = vrsqrt.f32 %v2666_v25  ;;  %v2418_v43 = vmul.f32 0.00390625, %v2046_v49  ;;  %3252 = vperm.xlu1 %4457, %v6246_v52   ;;  %v2797_v6 = vld [vmem:[%s7601_s1 + $0x1d] sm:$0x1]  ;;  %v2484_v16 = vmul.f32 %v6240_v26, %v6240_v26 }
 0x15f   :  { %7814 = vst [vmem:[#allocation8_spill] sm:$0xff] %v6243_v63  ;;  %v4507_v44 = vpop.eup %4506  ;;  %v2673_v17 = vadd.f32 1e-05, %v2609_v61  ;;  %v2547_v3 = vsub.f32 %v2419_v22, %v2483_v45  ;;  %v2487_v49 = vmul.f32 %v6243_v63, %v6243_v63  ;;  %v6264_v25 = vmul.f32 0.00390625, %v7817_v5  ;;  %v2790_v22 = vld [vmem:[%s7601_s1 + $0x16] sm:$0x1] }
 0x160   :  { %v2061_v39 = vpop.xlane.xlu1 %2060  ;;  %v6252_v19 = vmul.f32 %v4507_v44, %v2795_v38  ;;  %v4509_v14 = vpop.eup %4508  ;;  %v6267_v61 = vmul.f32 %v4505_v4, %v2788_v7  ;;  %v2670_v44 = vadd.f32 1e-05, %v2606_v1  ;;  %v2546_v26 = vsub.f32 %v2418_v43, %v2482_v31  ;;  %v7819_v4 = vld [vmem:[#allocation10_spill] sm:$0xff]  ;;  %v2799_v1 = vld [vmem:[%s7601_s1 + $0x1f] sm:$0x1] }
 0x161   :  { %v2056_v34 = vpop.xlane.xlu0 %2055  ;;  %4518 = vrsqrt.f32 %v2673_v17  ;;  %v2611_v55 = vmax.f32 %v2547_v3, 0.0  ;;  %v2421_v45 = vmul.f32 0.00390625, %v2061_v39  ;;  %7818 = vst [vmem:[#allocation9_spill] sm:$0xff] %v6264_v25  ;;  %v2608_v17 = vmax.f32 %v2544_v30, 0.0 }
 0x162   :  { %7816 = vst [vmem:[#allocation59_spill] sm:$0xff] %v6252_v19  ;;  %3333 = vperm.xlu0 %4456, %v6252_v19   ;;  %4520 = vrsqrt.f32 %v2668_v27  ;;  %v2420_v46 = vmul.f32 0.00390625, %v2056_v34  ;;  %3270 = vperm.xlu1 %4457, %v6267_v61   ;;  %v6276_v7 = vmul.f32 0.00390625, %v7819_v4  ;;  %v2486_v27 = vmul.f32 %v6264_v25, %v6264_v25  ;;  %v7821_v34 = vld [vmem:[#allocation11_spill] sm:$0xff] }
 0x163   :  { %v4511_v38 = vpop.eup %4510  ;;  %v2675_v3 = vadd.f32 1e-05, %v2611_v55  ;;  %v2549_v39 = vsub.f32 %v2421_v45, %v2485_v0  ;;  %v6284_v31 = vmul.f32 0.00390625, %v7821_v34  ;;  %v6287_v43 = vmul.f32 0.00390625, %v5825_v37 }
 0x164   :  { %v2071_v5 = vpop.xlane.xlu1 %2070  ;;  %v6273_v52 = vmul.f32 %v4511_v38, %v2797_v6  ;;  %7820 = vst [vmem:[#allocation10_spill] sm:$0xff] %v6276_v7  ;;  %v4513_v30 = vpop.eup %4512  ;;  %v6290_v0 = vmul.f32 %v4509_v14, %v2790_v22  ;;  %v2672_v45 = vadd.f32 1e-05, %v2608_v17  ;;  %v2489_v14 = vmul.f32 %v6276_v7, %v6276_v7 }
 0x165   :  { %v2066_v63 = vpop.xlane.xlu0 %2065  ;;  %4522 = vrsqrt.f32 %v2675_v3  ;;  %v2613_v19 = vmax.f32 %v2549_v39, 0.0  ;;  %v2423_v10 = vmul.f32 0.00390625, %v2071_v5  ;;  %7822 = vst [vmem:[#allocation11_spill] sm:$0xff] %v6284_v31  ;;  %7823 = vst [vmem:[#allocation60_spill] sm:$0xff] %v6287_v43  ;;  %v2792_v3 = vld [vmem:[%s7601_s1 + $0x18] sm:$0x1]  ;;  %v2548_v5 = vsub.f32 %v2420_v46, %v2484_v16 }
 0x166   :  { %3351 = vperm.xlu0 %4456, %v6273_v52   ;;  %7824 = vst [vmem:[#allocation61_spill] sm:$0xff] %v6290_v0  ;;  %4524 = vrsqrt.f32 %v2670_v44  ;;  %v2610_v39 = vmax.f32 %v2546_v26, 0.0  ;;  %v2422_v4 = vmul.f32 0.00390625, %v2066_v63  ;;  %3288 = vperm.xlu1 %4457, %v6290_v0   ;;  %v2488_v46 = vmul.f32 %v6284_v31, %v6284_v31  ;;  %v7825_v63 = vld [vmem:[#allocation12_spill] sm:$0xff] }
 0x167   :  { %v4515_v55 = vpop.eup %4514  ;;  %v2677_v6 = vadd.f32 1e-05, %v2613_v19  ;;  %v2551_v38 = vsub.f32 %v2423_v10, %v2487_v49  ;;  %v2801_v10 = vld [vmem:[%s7601_s1 + $0x21] sm:$0x1]  ;;  %v2491_v26 = vmul.f32 %v6287_v43, %v6287_v43  ;;  %v6308_v16 = vmul.f32 0.00390625, %v7825_v63 }
 0x168   :  { %v2081_v37 = vpop.xlane.xlu1 %2080  ;;  %v6296_v25 = vmul.f32 %v4515_v55, %v2799_v1  ;;  %v4517_v49 = vpop.eup %4516  ;;  %v6311_v44 = vmul.f32 %v4513_v30, %v2792_v3  ;;  %v2612_v31 = vmax.f32 %v2548_v5, 0.0  ;;  %v2550_v7 = vsub.f32 %v2422_v4, %v2486_v27  ;;  %v7830_v5 = vld [vmem:[#allocation13_spill] sm:$0xff] }
 0x169   :  { %v2076_v34 = vpop.xlane.xlu0 %2075  ;;  %4526 = vrsqrt.f32 %v2677_v6  ;;  %v2615_v22 = vmax.f32 %v2551_v38, 0.0  ;;  %v2425_v19 = vmul.f32 0.00390625, %v2081_v37  ;;  %7826 = vst [vmem:[#allocation12_spill] sm:$0xff] %v6308_v16  ;;  %v2794_v38 = vld [vmem:[%s7601_s1 + $0x1a] sm:$0x1]  ;;  %v6320_v30 = vmul.f32 0.00390625, %v5843_v50 }
 0x16a   :  { %3369 = vperm.xlu0 %4456, %v6296_v25   ;;  %7827 = vst [vmem:[#allocation62_spill] sm:$0xff] %v6311_v44  ;;  %4528 = vrsqrt.f32 %v2672_v45  ;;  %v2424_v6 = vmul.f32 0.00390625, %v2076_v34  ;;  %v2674_v37 = vadd.f32 1e-05, %v2610_v39  ;;  %3306 = vperm.xlu1 %4457, %v6311_v44   ;;  %v2803_v34 = vld [vmem:[%s7601_s1 + $0x23] sm:$0x1]  ;;  %v2490_v27 = vmul.f32 %v6308_v16, %v6308_v16 }
 0x16b   :  { %v4519_v17 = vpop.eup %4518  ;;  %v2679_v1 = vadd.f32 1e-05, %v2615_v22  ;;  %v2553_v55 = vsub.f32 %v2425_v19, %v2489_v14  ;;  %7828 = vst [vmem:[#allocation63_spill] sm:$0xff] %v6320_v30  ;;  %v6328_v39 = vmul.f32 0.00390625, %v5845_v59  ;;  %v6331_v4 = vmul.f32 0.00390625, %v7830_v5 }
 0x16c   :  { %v2091_v63 = vpop.xlane.xlu1 %2090  ;;  %v6317_v0 = vmul.f32 %v4519_v17, %v2801_v10  ;;  %v4521_v14 = vpop.eup %4520  ;;  %v6334_v50 = vmul.f32 %v4517_v49, %v2794_v38  ;;  %v2552_v10 = vsub.f32 %v2424_v6, %v2488_v46  ;;  %v2614_v59 = vmax.f32 %v2550_v7, 0.0  ;;  %v7833_v6 = vld [vmem:[#allocation14_spill] sm:$0xff] }
 0x16d   :  { %v2086_v43 = vpop.xlane.xlu0 %2085  ;;  %4530 = vrsqrt.f32 %v2679_v1  ;;  %v2617_v45 = vmax.f32 %v2553_v55, 0.0  ;;  %v2427_v3 = vmul.f32 0.00390625, %v2091_v63  ;;  %7829 = vst [vmem:[#allocation64_spill] sm:$0xff] %v6328_v39  ;;  %7831 = vst [vmem:[#allocation13_spill] sm:$0xff] %v6331_v4  ;;  %v2796_v55 = vld [vmem:[%s7601_s1 + $0x1c] sm:$0x1]  ;;  %v2493_v38 = vmul.f32 %v6320_v30, %v6320_v30 }
 0x16e   :  { %3387 = vperm.xlu0 %4456, %v6317_v0   ;;  %7832 = vst [vmem:[#allocation65_spill] sm:$0xff] %v6334_v50  ;;  %v2426_v1 = vmul.f32 0.00390625, %v2086_v43  ;;  %4532 = vrsqrt.f32 %v2674_v37  ;;  %v2676_v63 = vadd.f32 1e-05, %v2612_v31  ;;  %3324 = vperm.xlu1 %4457, %v6334_v50   ;;  %v2492_v7 = vmul.f32 %v6328_v39, %v6328_v39 }
 0x16f   :  { %v4523_v22 = vpop.eup %4522  ;;  %v2681_v19 = vadd.f32 1e-05, %v2617_v45  ;;  %v2555_v17 = vsub.f32 %v2427_v3, %v2491_v26  ;;  %v2805_v26 = vld [vmem:[%s7601_s1 + $0x25] sm:$0x1]  ;;  %v2495_v31 = vmul.f32 %v6331_v4, %v6331_v4  ;;  %v6352_v37 = vmul.f32 0.00390625, %v7833_v6 }
 0x170   :  { %v2101_v5 = vpop.xlane.xlu1 %2100  ;;  %v6340_v44 = vmul.f32 %v4523_v22, %v2803_v34  ;;  %v4525_v49 = vpop.eup %4524  ;;  %v6355_v45 = vmul.f32 %v4521_v14, %v2796_v55  ;;  %v2616_v34 = vmax.f32 %v2552_v10, 0.0  ;;  %v2678_v39 = vadd.f32 1e-05, %v2614_v59 }
 0x171   :  { %v2096_v16 = vpop.xlane.xlu0 %2095  ;;  %4534 = vrsqrt.f32 %v2681_v19  ;;  %v2619_v46 = vmax.f32 %v2555_v17, 0.0  ;;  %v2429_v43 = vmul.f32 0.00390625, %v2101_v5  ;;  %7834 = vst [vmem:[#allocation14_spill] sm:$0xff] %v6352_v37  ;;  %v2554_v19 = vsub.f32 %v2426_v1, %v2490_v27  ;;  %v2798_v5 = vld [vmem:[%s7601_s1 + $0x1e] sm:$0x1] }
 0x172   :  { %3405 = vperm.xlu0 %4456, %v6340_v44   ;;  %7835 = vst [vmem:[#allocation66_spill] sm:$0xff] %v6355_v45  ;;  %4536 = vrsqrt.f32 %v2676_v63  ;;  %v2428_v30 = vmul.f32 0.00390625, %v2096_v16  ;;  %3342 = vperm.xlu1 %4457, %v6355_v45   ;;  %v6364_v55 = vmul.f32 0.00390625, %v5871_v21  ;;  %v2807_v1 = vld [vmem:[%s7601_s1 + $0x27] sm:$0x1]  ;;  %v2494_v16 = vmul.f32 %v6352_v37, %v6352_v37  ;;  %v7838_v63 = vld [vmem:[#allocation15_spill] sm:$0xff] }
 0x173   :  { %v4527_v3 = vpop.eup %4526  ;;  %v2683_v22 = vadd.f32 1e-05, %v2619_v46  ;;  %v2557_v17 = vsub.f32 %v2429_v43, %v2493_v38  ;;  %v6372_v59 = vmul.f32 0.00390625, %v7838_v63  ;;  %v6375_v38 = vmul.f32 0.00390625, %v5883_v28  ;;  %v2800_v46 = vld [vmem:[%s7601_s1 + $0x20] sm:$0x1] }
 0x174   :  { %v2111_v6 = vpop.xlane.xlu1 %2110  ;;  %v6361_v50 = vmul.f32 %v4527_v3, %v2805_v26  ;;  %v4529_v14 = vpop.eup %4528  ;;  %7837 = vst [vmem:[#allocation68_spill] sm:$0xff] %v6364_v55  ;;  %v6378_v21 = vmul.f32 %v4525_v49, %v2798_v5  ;;  %v2680_v26 = vadd.f32 1e-05, %v2616_v34  ;;  %v2618_v3 = vmax.f32 %v2554_v19, 0.0  ;;  %v2809_v34 = vld [vmem:[%s7601_s1 + $0x29] sm:$0x1] }
 0x175   :  { %v2106_v4 = vpop.xlane.xlu0 %2105  ;;  %4538 = vrsqrt.f32 %v2683_v22  ;;  %v2621_v27 = vmax.f32 %v2557_v17, 0.0  ;;  %v2431_v10 = vmul.f32 0.00390625, %v2111_v6  ;;  %7839 = vst [vmem:[#allocation15_spill] sm:$0xff] %v6372_v59  ;;  %7840 = vst [vmem:[#allocation69_spill] sm:$0xff] %v6375_v38  ;;  %v2556_v6 = vsub.f32 %v2428_v30, %v2492_v7 }
 0x176   :  { %7836 = vst [vmem:[#allocation67_spill] sm:$0xff] %v6361_v50  ;;  %3423 = vperm.xlu0 %4456, %v6361_v50   ;;  %4540 = vrsqrt.f32 %v2678_v39  ;;  %v2430_v63 = vmul.f32 0.00390625, %v2106_v4  ;;  %3360 = vperm.xlu1 %4457, %v6378_v21   ;;  %v2497_v49 = vmul.f32 %v6364_v55, %v6364_v55  ;;  %v2496_v30 = vmul.f32 %v6372_v59, %v6372_v59 }
 0x177   :  { %v4531_v43 = vpop.eup %4530  ;;  %v2685_v22 = vadd.f32 1e-05, %v2621_v27  ;;  %v2559_v17 = vsub.f32 %v2431_v10, %v2495_v31  ;;  %v2499_v39 = vmul.f32 %v6375_v38, %v6375_v38  ;;  %v6396_v4 = vmul.f32 0.00390625, %v5885_v35 }
 0x178   :  { %v2121_v28 = vpop.xlane.xlu1 %2120  ;;  %v6384_v45 = vmul.f32 %v4531_v43, %v2807_v1  ;;  %v4533_v31 = vpop.eup %4532  ;;  %v6399_v7 = vmul.f32 %v4529_v14, %v2800_v46  ;;  %v2682_v27 = vadd.f32 1e-05, %v2618_v3  ;;  %v2802_v43 = vld [vmem:[%s7601_s1 + $0x22] sm:$0x1]  ;;  %v6408_v14 = vmul.f32 0.00390625, %v5891_v53 }
 0x179   :  { %v2116_v37 = vpop.xlane.xlu0 %2115  ;;  %4542 = vrsqrt.f32 %v2685_v22  ;;  %v2623_v5 = vmax.f32 %v2559_v17, 0.0  ;;  %v2433_v50 = vmul.f32 0.00390625, %v2121_v28  ;;  %7841 = vst [vmem:[#allocation70_spill] sm:$0xff] %v6396_v4  ;;  %v2620_v22 = vmax.f32 %v2556_v6, 0.0 }
 0x17a   :  { %3441 = vperm.xlu0 %4456, %v6384_v45   ;;  %4544 = vrsqrt.f32 %v2680_v26  ;;  %v2558_v17 = vsub.f32 %v2430_v63, %v2494_v16  ;;  %v2432_v28 = vmul.f32 0.00390625, %v2116_v37  ;;  %3378 = vperm.xlu1 %4457, %v6399_v7   ;;  %7842 = vst [vmem:[#allocation71_spill] sm:$0xff] %v6408_v14  ;;  %v2498_v37 = vmul.f32 %v6396_v4, %v6396_v4 }
 0x17b   :  { %v4535_v19 = vpop.eup %4534  ;;  %v2687_v10 = vadd.f32 1e-05, %v2623_v5  ;;  %v2561_v1 = vsub.f32 %v2433_v50, %v2497_v49  ;;  %v2811_v50 = vld [vmem:[%s7601_s1 + $0x2b] sm:$0x1]  ;;  %v6416_v16 = vmul.f32 0.00390625, %v5893_v11  ;;  %v6419_v6 = vmul.f32 0.00390625, %v5899_v57 }
 0x17c   :  { %v2131_v35 = vpop.xlane.xlu1 %2130  ;;  %v6405_v38 = vmul.f32 %v4535_v19, %v2809_v34  ;;  %v4537_v3 = vpop.eup %4536  ;;  %v6422_v53 = vmul.f32 %v4533_v31, %v2802_v43  ;;  %v2804_v19 = vld [vmem:[%s7601_s1 + $0x24] sm:$0x1]  ;;  %v2560_v11 = vsub.f32 %v2432_v28, %v2496_v30  ;;  %v2501_v31 = vmul.f32 %v6408_v14, %v6408_v14 }
 0x17d   :  { %v2126_v59 = vpop.xlane.xlu0 %2125  ;;  %4546 = vrsqrt.f32 %v2687_v10  ;;  %v2625_v46 = vmax.f32 %v2561_v1, 0.0  ;;  %v2435_v26 = vmul.f32 0.00390625, %v2131_v35  ;;  %7843 = vst [vmem:[#allocation72_spill] sm:$0xff] %v6416_v16  ;;  %7844 = vst [vmem:[#allocation73_spill] sm:$0xff] %v6419_v6  ;;  %v2684_v10 = vadd.f32 1e-05, %v2620_v22 }
 0x17e   :  { %3459 = vperm.xlu0 %4456, %v6405_v38   ;;  %4548 = vrsqrt.f32 %v2682_v27  ;;  %v2434_v34 = vmul.f32 0.00390625, %v2126_v59  ;;  %v2622_v1 = vmax.f32 %v2558_v17, 0.0  ;;  %3396 = vperm.xlu1 %4457, %v6422_v53   ;;  %v2813_v59 = vld [vmem:[%s7601_s1 + $0x2d] sm:$0x1]  ;;  %v2500_v30 = vmul.f32 %v6416_v16, %v6416_v16 }
 0x17f   :  { %v4539_v63 = vpop.eup %4538  ;;  %v2689_v49 = vadd.f32 1e-05, %v2625_v46  ;;  %v2563_v5 = vsub.f32 %v2435_v26, %v2499_v39  ;;  %v2503_v22 = vmul.f32 %v6419_v6, %v6419_v6  ;;  %v6440_v17 = vmul.f32 %v4537_v3, %v2804_v19 }
 0x180   :  { %v2141_v57 = vpop.xlane.xlu1 %2140  ;;  %v6428_v4 = vmul.f32 %v4539_v63, %v2811_v50  ;;  %v4541_v43 = vpop.eup %4540  ;;  %v2562_v26 = vsub.f32 %v2434_v34, %v2498_v37  ;;  %v6449_v19 = vmul.f32 0.00390625, %v5903_v29 }
 0x181   :  { %v2136_v35 = vpop.xlane.xlu0 %2135  ;;  %4550 = vrsqrt.f32 %v2689_v49  ;;  %v2627_v27 = vmax.f32 %v2563_v5, 0.0  ;;  %v2437_v39 = vmul.f32 0.00390625, %v2141_v57  ;;  %v2806_v49 = vld [vmem:[%s7601_s1 + $0x26] sm:$0x1]  ;;  %v2686_v5 = vadd.f32 1e-05, %v2622_v1 }
 0x182   :  { %3477 = vperm.xlu0 %4456, %v6428_v4   ;;  %v2436_v63 = vmul.f32 0.00390625, %v2136_v35  ;;  %4552 = vrsqrt.f32 %v2684_v10  ;;  %v2624_v57 = vmax.f32 %v2560_v11, 0.0  ;;  %3414 = vperm.xlu1 %4457, %v6440_v17   ;;  %7846 = vst [vmem:[#allocation75_spill] sm:$0xff] %v6449_v19  ;;  %v2815_v35 = vld [vmem:[%s7601_s1 + $0x2f] sm:$0x1]  ;;  %v6455_v10 = vmul.f32 0.00390625, %v5901_v47 }
 0x183   :  { %v4543_v28 = vpop.eup %4542  ;;  %v2691_v46 = vadd.f32 1e-05, %v2627_v27  ;;  %v2565_v50 = vsub.f32 %v2437_v39, %v2501_v31  ;;  %v7848_v1 = vld [vmem:[#allocation17_spill] sm:$0xff]  ;;  %v6461_v31 = vmul.f32 %v4541_v43, %v2806_v49  ;;  %v2626_v29 = vmax.f32 %v2562_v26, 0.0  ;;  %v7852_v49 = vld [vmem:[#allocation16_spill] sm:$0xff] }
 0x184   :  { %v2151_v16 = vpop.xlane.xlu1 %2150  ;;  %v6446_v14 = vmul.f32 %v4543_v28, %v2813_v59  ;;  %v4545_v3 = vpop.eup %4544  ;;  %7847 = vst [vmem:[#allocation76_spill] sm:$0xff] %v6455_v10  ;;  %v6458_v11 = vmul.f32 0.00390625, %v7848_v1  ;;  %v2564_v59 = vsub.f32 %v2436_v63, %v2500_v30  ;;  %v2505_v26 = vmul.f32 %v6449_v19, %v6449_v19  ;;  %v2817_v63 = vld [vmem:[%s7601_s1 + $0x31] sm:$0x1] }
 0x185   :  { %v2146_v6 = vpop.xlane.xlu0 %2145  ;;  %4554 = vrsqrt.f32 %v2691_v46  ;;  %v2629_v37 = vmax.f32 %v2565_v50, 0.0  ;;  %v2439_v34 = vmul.f32 0.00390625, %v2151_v16  ;;  %7850 = vst [vmem:[#allocation77_spill] sm:$0xff] %v6461_v31  ;;  %v2808_v16 = vld [vmem:[%s7601_s1 + $0x28] sm:$0x1] }
 0x186   :  { %7845 = vst [vmem:[#allocation74_spill] sm:$0xff] %v6446_v14  ;;  %7849 = vst [vmem:[#allocation17_spill] sm:$0xff] %v6458_v11  ;;  %3495 = vperm.xlu0 %4456, %v6446_v14   ;;  %4556 = vrsqrt.f32 %v2686_v5  ;;  %v2688_v46 = vadd.f32 1e-05, %v2624_v57  ;;  %v2438_v47 = vmul.f32 0.00390625, %v2146_v6  ;;  %3432 = vperm.xlu1 %4457, %v6461_v31   ;;  %v2502_v6 = vmul.f32 %v6455_v10, %v6455_v10 }
 0x187   :  { %v4547_v27 = vpop.eup %4546  ;;  %v2693_v39 = vadd.f32 1e-05, %v2629_v37  ;;  %v2567_v28 = vsub.f32 %v2439_v34, %v2503_v22  ;;  %v6477_v5 = vmul.f32 0.00390625, %v7852_v49  ;;  %v2507_v57 = vmul.f32 %v6458_v11, %v6458_v11  ;;  %v2810_v34 = vld [vmem:[%s7601_s1 + $0x2a] sm:$0x1] }
 0x188   :  { %v2161_v50 = vpop.xlane.xlu1 %2160  ;;  %v6467_v55 = vmul.f32 %v4547_v27, %v2815_v35  ;;  %v4549_v43 = vpop.eup %4548  ;;  %v6482_v37 = vmul.f32 %v4545_v3, %v2808_v16  ;;  %v2690_v27 = vadd.f32 1e-05, %v2626_v29  ;;  %v2566_v10 = vsub.f32 %v2438_v47, %v2502_v6  ;;  %v7855_v3 = vld [vmem:[#allocation19_spill] sm:$0xff]  ;;  %v7857_v47 = vld [vmem:[#allocation18_spill] sm:$0xff] }
 0x189   :  { %v2156_v1 = vpop.xlane.xlu0 %2155  ;;  %4558 = vrsqrt.f32 %v2693_v39  ;;  %v2631_v30 = vmax.f32 %v2567_v28, 0.0  ;;  %v2441_v22 = vmul.f32 0.00390625, %v2161_v50  ;;  %7853 = vst [vmem:[#allocation16_spill] sm:$0xff] %v6477_v5  ;;  %v2628_v39 = vmax.f32 %v2564_v59, 0.0  ;;  %v2819_v29 = vld [vmem:[%s7601_s1 + $0x33] sm:$0x1] }
 0x18a   :  { %7851 = vst [vmem:[#allocation78_spill] sm:$0xff] %v6467_v55  ;;  %3513 = vperm.xlu0 %4456, %v6467_v55   ;;  %7854 = vst [vmem:[#allocation79_spill] sm:$0xff] %v6482_v37  ;;  %4560 = vrsqrt.f32 %v2688_v46  ;;  %v2440_v49 = vmul.f32 0.00390625, %v2156_v1  ;;  %3450 = vperm.xlu1 %4457, %v6482_v37   ;;  %v6491_v16 = vmul.f32 0.00390625, %v7855_v3  ;;  %v2504_v46 = vmul.f32 %v6477_v5, %v6477_v5 }
 0x18b   :  { %v4551_v35 = vpop.eup %4550  ;;  %v2695_v28 = vadd.f32 1e-05, %v2631_v30  ;;  %v2569_v50 = vsub.f32 %v2441_v22, %v2505_v26  ;;  %v6499_v1 = vmul.f32 0.00390625, %v7857_v47  ;;  %v7859_v26 = vld [vmem:[#allocation21_spill] sm:$0xff]  ;;  %v6505_v22 = vmul.f32 %v4549_v43, %v2810_v34 }
 0x18c   :  { %v2171_v19 = vpop.xlane.xlu1 %2170  ;;  %v6488_v31 = vmul.f32 %v4551_v35, %v2817_v63  ;;  %7856 = vst [vmem:[#allocation19_spill] sm:$0xff] %v6491_v16  ;;  %v4553_v59 = vpop.eup %4552  ;;  %v6502_v30 = vmul.f32 0.00390625, %v7859_v26  ;;  %v2568_v3 = vsub.f32 %v2440_v49, %v2504_v46  ;;  %v2509_v43 = vmul.f32 %v6491_v16, %v6491_v16 }
 0x18d   :  { %v2166_v11 = vpop.xlane.xlu0 %2165  ;;  %4562 = vrsqrt.f32 %v2695_v28  ;;  %v2633_v55 = vmax.f32 %v2569_v50, 0.0  ;;  %v2443_v14 = vmul.f32 0.00390625, %v2171_v19  ;;  %7858 = vst [vmem:[#allocation18_spill] sm:$0xff] %v6499_v1  ;;  %v2692_v19 = vadd.f32 1e-05, %v2628_v39 }
 0x18e   :  { %7860 = vst [vmem:[#allocation21_spill] sm:$0xff] %v6502_v30  ;;  %3531 = vperm.xlu0 %4456, %v6488_v31   ;;  %4564 = vrsqrt.f32 %v2690_v27  ;;  %v2812_v28 = vld [vmem:[%s7601_s1 + $0x2c] sm:$0x1]  ;;  %v2630_v50 = vmax.f32 %v2566_v10, 0.0  ;;  %v2442_v47 = vmul.f32 0.00390625, %v2166_v11  ;;  %3468 = vperm.xlu1 %4457, %v6505_v22   ;;  %v2506_v10 = vmul.f32 %v6499_v1, %v6499_v1  ;;  %v7862_v11 = vld [vmem:[#allocation20_spill] sm:$0xff] }
 0x18f   :  { %v4555_v63 = vpop.eup %4554  ;;  %v2697_v6 = vadd.f32 1e-05, %v2633_v55  ;;  %v2571_v35 = vsub.f32 %v2443_v14, %v2507_v57  ;;  %v2821_v14 = vld [vmem:[%s7601_s1 + $0x35] sm:$0x1]  ;;  %v6521_v27 = vmul.f32 0.00390625, %v7862_v11  ;;  %v6524_v39 = vmul.f32 %v4553_v59, %v2812_v28 }
 0x190   :  { %v2181_v26 = vpop.xlane.xlu1 %2180  ;;  %v6511_v37 = vmul.f32 %v4555_v63, %v2819_v29  ;;  %v4557_v57 = vpop.eup %4556  ;;  %v2511_v29 = vmul.f32 %v6502_v30, %v6502_v30  ;;  %v2570_v1 = vsub.f32 %v2442_v47, %v2506_v10 }
 0x191   :  { %v2176_v5 = vpop.xlane.xlu0 %2175  ;;  %4566 = vrsqrt.f32 %v2697_v6  ;;  %v2635_v34 = vmax.f32 %v2571_v35, 0.0  ;;  %v2445_v55 = vmul.f32 0.00390625, %v2181_v26  ;;  %7863 = vst [vmem:[#allocation20_spill] sm:$0xff] %v6521_v27  ;;  %v2814_v6 = vld [vmem:[%s7601_s1 + $0x2e] sm:$0x1]  ;;  %v2632_v26 = vmax.f32 %v2568_v3, 0.0 }
 0x192   :  { %7861 = vst [vmem:[#allocation80_spill] sm:$0xff] %v6511_v37  ;;  %3549 = vperm.xlu0 %4456, %v6511_v37   ;;  %4568 = vrsqrt.f32 %v2692_v19  ;;  %v2694_v35 = vadd.f32 1e-05, %v2630_v50  ;;  %3486 = vperm.xlu1 %4457, %v6524_v39   ;;  %v2444_v28 = vmul.f32 0.00390625, %v2176_v5  ;;  %v2823_v19 = vld [vmem:[%s7601_s1 + $0x37] sm:$0x1]  ;;  %v6538_v50 = vmul.f32 %v4557_v57, %v2814_v6 }
 0x193   :  { %v4559_v49 = vpop.eup %4558  ;;  %v2699_v46 = vadd.f32 1e-05, %v2635_v34  ;;  %v2573_v63 = vsub.f32 %v2445_v55, %v2509_v43  ;;  %v2508_v47 = vmul.f32 %v6521_v27, %v6521_v27  ;;  %v7864_v55 = vld [vmem:[#allocation22_spill] sm:$0xff] }
 0x194   :  { %v2191_v11 = vpop.xlane.xlu1 %2190  ;;  %v6532_v16 = vmul.f32 %v4559_v49, %v2821_v14  ;;  %v4561_v43 = vpop.eup %4560  ;;  %v6543_v14 = vmul.f32 0.00390625, %v7864_v55  ;;  %v2816_v49 = vld [vmem:[%s7601_s1 + $0x30] sm:$0x1] }
 0x195   :  { %4570 = vrsqrt.f32 %v2699_v46  ;;  %v2637_v59 = vmax.f32 %v2573_v63, 0.0  ;;  %v2447_v37 = vmul.f32 0.00390625, %v2191_v11  ;;  %v2186_v34 = vpop.xlane.xlu0 %2185  ;;  %v2696_v46 = vadd.f32 1e-05, %v2632_v26 }
 0x196   :  { %3567 = vperm.xlu0 %4456, %v6532_v16   ;;  %4572 = vrsqrt.f32 %v2694_v35  ;;  %v2634_v63 = vmax.f32 %v2570_v1, 0.0  ;;  %3504 = vperm.xlu1 %4457, %v6538_v50   ;;  %v2572_v11 = vsub.f32 %v2444_v28, %v2508_v47  ;;  %v2446_v30 = vmul.f32 0.00390625, %v2186_v34  ;;  %v2827_v47 = vld [vmem:[%s7601_s1 + $0x3b] sm:$0x1] }
 0x197   :  { %v4563_v3 = vpop.eup %4562  ;;  %v2701_v10 = vadd.f32 1e-05, %v2637_v59  ;;  %v2575_v5 = vsub.f32 %v2447_v37, %v2511_v29  ;;  %v2825_v37 = vld [vmem:[%s7601_s1 + $0x39] sm:$0x1]  ;;  %v6555_v29 = vmul.f32 %v4561_v43, %v2816_v49  ;;  %v2510_v1 = vmul.f32 %v6543_v14, %v6543_v14  ;;  %v2818_v59 = vld [vmem:[%s7601_s1 + $0x32] sm:$0x1] }
 0x198   :  { %v6549_v57 = vmul.f32 %v4563_v3, %v2823_v19  ;;  %v4565_v6 = vpop.eup %4564  ;;  %v2698_v34 = vadd.f32 1e-05, %v2634_v63  ;;  %v2636_v3 = vmax.f32 %v2572_v11, 0.0 }
 0x199   :  { %4574 = vrsqrt.f32 %v2701_v10  ;;  %v2639_v27 = vmax.f32 %v2575_v5, 0.0  ;;  %v2574_v43 = vsub.f32 %v2446_v30, %v2510_v1  ;;  %v2820_v10 = vld [vmem:[%s7601_s1 + $0x34] sm:$0x1] }
 0x19a   :  { %3585 = vperm.xlu0 %4456, %v6549_v57   ;;  %4576 = vrsqrt.f32 %v2696_v46  ;;  %3522 = vperm.xlu1 %4457, %v6555_v29   ;;  %v2700_v49 = vadd.f32 1e-05, %v2636_v3  ;;  %v2829_v46 = vld [vmem:[%s7601_s1 + $0x3d] sm:$0x1]  ;;  %v2824_v3 = vld [vmem:[%s7601_s1 + $0x38] sm:$0x1] }
 0x19b   :  { %v4567_v35 = vpop.eup %4566  ;;  %v2703_v26 = vadd.f32 1e-05, %v2639_v27  ;;  %v6569_v27 = vmul.f32 %v4565_v6, %v2818_v59  ;;  %v2638_v30 = vmax.f32 %v2574_v43, 0.0 }
 0x19c   :  { %v6563_v28 = vmul.f32 %v4567_v35, %v2825_v37  ;;  %v4569_v19 = vpop.eup %4568  ;;  %v2822_v37 = vld [vmem:[%s7601_s1 + $0x36] sm:$0x1] }
 0x19d   :  { %4578 = vrsqrt.f32 %v2703_v26  ;;  %v6581_v6 = vmul.f32 %v4569_v19, %v2820_v10  ;;  %v2702_v1 = vadd.f32 1e-05, %v2638_v30  ;;  %v2831_v26 = vld [vmem:[%s7601_s1 + $0x3f] sm:$0x1]  ;;  %v2897_v10 = vld [vmem:[%s7602_s2 + $0x1] sm:$0x1] }
 0x19e   :  { %3603 = vperm.xlu0 %4456, %v6563_v28   ;;  %3540 = vperm.xlu1 %4457, %v6569_v27   ;;  %4580 = vrsqrt.f32 %v2698_v34 }
 0x19f   :  { %v4571_v55 = vpop.eup %4570  ;;  %4582 = vrsqrt.f32 %v2700_v49 }
 0x1a0   :  { %v6575_v5 = vmul.f32 %v4571_v55, %v2827_v47  ;;  %v4573_v63 = vpop.eup %4572  ;;  %v7865_v47 = vld [vmem:[#allocation24_spill] sm:$0xff]  ;;  %4584 = vrsqrt.f32 %v2702_v1  ;;  %v2899_v1 = vld [vmem:[%s7602_s2 + $0x3] sm:$0x1] }
 0x1a1   :  { %v6593_v19 = vmul.f32 %v4573_v63, %v2822_v37  ;;  %v2961_v55 = vmul.f32 %v5981_v13, %v7865_v47  ;;  %v2901_v47 = vld [vmem:[%s7602_s2 + $0x5] sm:$0x1] }
 0x1a2   :  { %3621 = vperm.xlu0 %4456, %v6575_v5   ;;  %3558 = vperm.xlu1 %4457, %v6581_v6  }
 0x1a3   :  { %v4575_v11 = vpop.eup %4574  ;;  %v3025_v63 = vsub.f32 %v2897_v10, %v2961_v55 }
 0x1a4   :  { %v6587_v35 = vmul.f32 %v4575_v11, %v2829_v46  ;;  %v4577_v59 = vpop.eup %4576  ;;  %v2826_v46 = vld [vmem:[%s7601_s1 + $0x3a] sm:$0x1]  ;;  %v7866_v11 = vld [vmem:[#allocation26_spill] sm:$0xff] }
 0x1a5   :  { %v6607_v49 = vmul.f32 %v4577_v59, %v2824_v3  ;;  %v2963_v13 = vmul.f32 %v6027_v32, %v7866_v11  ;;  %v2965_v32 = vmul.f32 %v6070_v23, %v5940_v51  ;;  %v2967_v51 = vmul.f32 %v6114_v60, %v5956_v18  ;;  %v2903_v23 = vld [vmem:[%s7602_s2 + $0x7] sm:$0x1] }
 0x1a6   :  { %3639 = vperm.xlu0 %4456, %v6587_v35   ;;  %3576 = vperm.xlu1 %4457, %v6593_v19   ;;  %v2969_v18 = vmul.f32 %v6053_v48, %v5953_v20  ;;  %v7869_v20 = vld [vmem:[#allocation29_spill] sm:$0xff] }
 0x1a7   :  { %v4579_v34 = vpop.eup %4578  ;;  %v3027_v3 = vsub.f32 %v2899_v1, %v2963_v13  ;;  %v7867_v13 = vld [vmem:[#allocation23_spill] sm:$0xff]  ;;  %v2971_v48 = vmul.f32 %v6076_v12, %v7869_v20  ;;  %v2973_v12 = vmul.f32 %v6097_v8, %v5984_v24  ;;  %v2902_v20 = vld [vmem:[%s7602_s2 + $0x6] sm:$0x1] }
 0x1a8   :  { %v6599_v43 = vmul.f32 %v4579_v34, %v2831_v26  ;;  %v4581_v30 = vpop.eup %4580  ;;  %v2828_v34 = vld [vmem:[%s7601_s1 + $0x3c] sm:$0x1]  ;;  %v2960_v1 = vmul.f32 %v5994_v62, %v7867_v13  ;;  %v2907_v13 = vld [vmem:[%s7602_s2 + $0xb] sm:$0x1]  ;;  %v7872_v24 = vld [vmem:[#allocation33_spill] sm:$0xff] }
 0x1a9   :  { %v6620_v26 = vmul.f32 %v4581_v30, %v2826_v46  ;;  %v4583_v59 = vpop.eup %4582  ;;  %v2830_v46 = vld [vmem:[%s7601_s1 + $0x3e] sm:$0x1]  ;;  %v2975_v8 = vmul.f32 %v6120_v2, %v7872_v24  ;;  %v7874_v2 = vld [vmem:[#allocation35_spill] sm:$0xff]  ;;  %v2906_v24 = vld [vmem:[%s7602_s2 + $0xa] sm:$0x1] }
 0x1aa   :  { %3657 = vperm.xlu0 %4456, %v6599_v43   ;;  %3594 = vperm.xlu1 %4457, %v6607_v49   ;;  %v6631_v55 = vmul.f32 %v4583_v59, %v2828_v34  ;;  %v4585_v10 = vpop.eup %4584  ;;  %v2896_v34 = vld [vmem:[%s7602_s2] sm:$0x1] }
 0x1ab   :  { %v6644_v11 = vmul.f32 %v4585_v10, %v2830_v46  ;;  %v3024_v62 = vsub.f32 %v2896_v34, %v2960_v1 }
 0x1ad   :  { %v6615_v37 = vpop.permute.xlu1 %3099 }
 0x1ae   :  { %3739 = vperm.xlu0 %4456, %v3025_v63   ;;  %3612 = vperm.xlu1 %4457, %v6620_v26   ;;  %v3029_v63 = vsub.f32 %v2901_v47, %v2965_v32  ;;  %v6656_v60 = vpop.permute.xlu0 %3090  ;;  %v2905_v32 = vld [vmem:[%s7602_s2 + $0x9] sm:$0x1]  ;;  %v7868_v47 = vld [vmem:[#allocation25_spill] sm:$0xff] }
 0x1af   :  { %v2962_v10 = vmul.f32 %v6010_v15, %v7868_v47  ;;  %v7870_v15 = vld [vmem:[#allocation27_spill] sm:$0xff]  ;;  %v2909_v47 = vld [vmem:[%s7602_s2 + $0xd] sm:$0x1] }
 0x1b0   :  { %v2964_v34 = vmul.f32 %v6047_v40, %v7870_v15  ;;  %v7871_v40 = vld [vmem:[#allocation28_spill] sm:$0xff] }
 0x1b1   :  { %v6633_v30 = vpop.permute.xlu1 %3108 }
 0x1b2   :  { %3757 = vperm.xlu0 %4456, %v3027_v3   ;;  %3630 = vperm.xlu1 %4457, %v6631_v55   ;;  %v3031_v3 = vsub.f32 %v2903_v23, %v2967_v51  ;;  %v3033_v51 = vsub.f32 %v2905_v32, %v2969_v18  ;;  %v2900_v18 = vld [vmem:[%s7602_s2 + $0x4] sm:$0x1]  ;;  %v3035_v32 = vsub.f32 %v2907_v13, %v2971_v48 }
 0x1b3   :  { %v3037_v48 = vsub.f32 %v2909_v47, %v2973_v12  ;;  %v2977_v47 = vmul.f32 %v6141_v58, %v7874_v2  ;;  %v7876_v58 = vld [vmem:[#allocation37_spill] sm:$0xff]  ;;  %v2908_v2 = vld [vmem:[%s7602_s2 + $0xc] sm:$0x1] }
 0x1b5   :  { %v6648_v59 = vpop.permute.xlu1 %3117 }
 0x1b6   :  { %3775 = vperm.xlu0 %4456, %v3029_v63   ;;  %3648 = vperm.xlu1 %4457, %v6644_v11   ;;  %v2898_v63 = vld [vmem:[%s7602_s2 + $0x2] sm:$0x1] }
 0x1b7   :  { %v3026_v1 = vsub.f32 %v2898_v63, %v2962_v10  ;;  %v3028_v10 = vsub.f32 %v2900_v18, %v2964_v34  ;;  %v2966_v63 = vmul.f32 %v6091_v36, %v7871_v40  ;;  %v7873_v36 = vld [vmem:[#allocation30_spill] sm:$0xff]  ;;  %v2913_v40 = vld [vmem:[%s7602_s2 + $0x11] sm:$0x1] }
 0x1b8   :  { %v2968_v34 = vmul.f32 %v6135_v33, %v7873_v36  ;;  %v7875_v33 = vld [vmem:[#allocation31_spill] sm:$0xff] }
 0x1b9   :  { %v6663_v46 = vpop.permute.xlu1 %3126  ;;  %v3030_v15 = vsub.f32 %v2902_v20, %v2966_v63  ;;  %v2970_v20 = vmul.f32 %v6158_v42, %v7875_v33  ;;  %v2915_v36 = vld [vmem:[%s7602_s2 + $0x13] sm:$0x1]  ;;  %v7877_v42 = vld [vmem:[#allocation32_spill] sm:$0xff]  ;;  %v2917_v33 = vld [vmem:[%s7602_s2 + $0x15] sm:$0x1] }
 0x1ba   :  { %3793 = vperm.xlu0 %4456, %v3031_v3   ;;  %3730 = vperm.xlu1 %4457, %v3024_v62  }
 0x1bd   :  { %v6670_v23 = vpop.permute.xlu0 %3171  ;;  %v6677_v3 = vpop.permute.xlu1 %3135 }
 0x1be   :  { %3811 = vperm.xlu0 %4456, %v3033_v51   ;;  %3748 = vperm.xlu1 %4457, %v3026_v1   ;;  %v2911_v1 = vld [vmem:[%s7602_s2 + $0xf] sm:$0x1] }
 0x1bf   :  { %v3039_v12 = vsub.f32 %v2911_v1, %v2975_v8  ;;  %v3041_v8 = vsub.f32 %v2913_v40, %v2977_v47  ;;  %v2979_v1 = vmul.f32 %v6164_v54, %v7876_v58  ;;  %v7878_v54 = vld [vmem:[#allocation39_spill] sm:$0xff]  ;;  %v2910_v58 = vld [vmem:[%s7602_s2 + $0xe] sm:$0x1] }
 0x1c0   :  { %v2981_v40 = vmul.f32 %v6185_v56, %v7878_v54  ;;  %v7880_v56 = vld [vmem:[#allocation41_spill] sm:$0xff] }
 0x1c1   :  { %v6684_v62 = vpop.permute.xlu0 %3189  ;;  %v6691_v51 = vpop.permute.xlu1 %3144  ;;  %v3043_v47 = vsub.f32 %v2915_v36, %v2979_v1  ;;  %v7881_v36 = vld [vmem:[#allocation54_spill] sm:$0xff] }
 0x1c2   :  { %3829 = vperm.xlu0 %4456, %v3035_v32   ;;  %3766 = vperm.xlu1 %4457, %v3028_v10   ;;  %v2904_v32 = vld [vmem:[%s7602_s2 + $0x8] sm:$0x1]  ;;  %v3045_v1 = vsub.f32 %v2917_v33, %v2981_v40  ;;  %v2912_v40 = vld [vmem:[%s7602_s2 + $0x10] sm:$0x1] }
 0x1c3   :  { %v3032_v63 = vsub.f32 %v2904_v32, %v2968_v34  ;;  %v3034_v34 = vsub.f32 %v2906_v24, %v2970_v20  ;;  %v2972_v32 = vmul.f32 %v6179_v9, %v7877_v42  ;;  %v7879_v9 = vld [vmem:[#allocation34_spill] sm:$0xff] }
 0x1c4   :  { %v2974_v24 = vmul.f32 %v6202_v41, %v7879_v9  ;;  %v7883_v41 = vld [vmem:[#allocation36_spill] sm:$0xff] }
 0x1c5   :  { %v6698_v13 = vpop.permute.xlu0 %3207  ;;  %v6705_v18 = vpop.permute.xlu1 %3153  ;;  %v3036_v20 = vsub.f32 %v2908_v2, %v2972_v32  ;;  %v2919_v32 = vld [vmem:[%s7602_s2 + $0x17] sm:$0x1] }
 0x1c6   :  { %3847 = vperm.xlu0 %4456, %v3037_v48   ;;  %3784 = vperm.xlu1 %4457, %v3030_v15   ;;  %v3038_v2 = vsub.f32 %v2910_v58, %v2974_v24  ;;  %v2921_v24 = vld [vmem:[%s7602_s2 + $0x19] sm:$0x1] }
 0x1c9   :  { %v6712_v10 = vpop.permute.xlu0 %3225  ;;  %v6719_v48 = vpop.permute.xlu1 %3162 }
 0x1ca   :  { %3865 = vperm.xlu0 %4456, %v3039_v12   ;;  %3802 = vperm.xlu1 %4457, %v3032_v63  }
 0x1cd   :  { %v6726_v15 = vpop.permute.xlu0 %3243  ;;  %v6733_v12 = vpop.permute.xlu1 %3180 }
 0x1ce   :  { %3883 = vperm.xlu0 %4456, %v3041_v8   ;;  %3820 = vperm.xlu1 %4457, %v3034_v34   ;;  %v2983_v34 = vmul.f32 %v7881_v36, %v7880_v56  ;;  %v7887_v56 = vld [vmem:[#allocation57_spill] sm:$0xff] }
 0x1d0   :  { %v3047_v33 = vsub.f32 %v2919_v32, %v2983_v34  ;;  %v2914_v34 = vld [vmem:[%s7602_s2 + $0x12] sm:$0x1] }
 0x1d1   :  { %v6740_v63 = vpop.permute.xlu0 %3261  ;;  %v6747_v8 = vpop.permute.xlu1 %3198 }
 0x1d2   :  { %3901 = vperm.xlu0 %4456, %v3043_v47   ;;  %3838 = vperm.xlu1 %4457, %v3036_v20   ;;  %v7884_v47 = vld [vmem:[#allocation56_spill] sm:$0xff]  ;;  %v7886_v20 = vld [vmem:[#allocation43_spill] sm:$0xff] }
 0x1d3   :  { %v2976_v54 = vmul.f32 %v7884_v47, %v7883_v41  ;;  %v2985_v36 = vmul.f32 %v7887_v56, %v7886_v20  ;;  %v7890_v41 = vld [vmem:[#allocation58_spill] sm:$0xff]  ;;  %v7892_v20 = vld [vmem:[#allocation59_spill] sm:$0xff] }
 0x1d5   :  { %v6754_v42 = vpop.permute.xlu0 %3279  ;;  %v6761_v9 = vpop.permute.xlu1 %3216  ;;  %v3040_v58 = vsub.f32 %v2912_v40, %v2976_v54  ;;  %v3049_v32 = vsub.f32 %v2921_v24, %v2985_v36  ;;  %v2923_v54 = vld [vmem:[%s7602_s2 + $0x1b] sm:$0x1]  ;;  %v2916_v36 = vld [vmem:[%s7602_s2 + $0x14] sm:$0x1] }
 0x1d6   :  { %7882 = vst [vmem:[#allocation22_spill] sm:$0xff] %v6754_v42  ;;  %3919 = vperm.xlu0 %4456, %v3045_v1   ;;  %7885 = vst [vmem:[#allocation24_spill] sm:$0xff] %v6761_v9  ;;  %3856 = vperm.xlu1 %4457, %v3038_v2   ;;  %v7889_v1 = vld [vmem:[#allocation38_spill] sm:$0xff]  ;;  %v7891_v2 = vld [vmem:[#allocation45_spill] sm:$0xff] }
 0x1d7   :  { %v2978_v47 = vmul.f32 %v7890_v41, %v7889_v1  ;;  %v2987_v56 = vmul.f32 %v7892_v20, %v7891_v2 }
 0x1d9   :  { %v6768_v42 = vpop.permute.xlu0 %3297  ;;  %v6775_v9 = vpop.permute.xlu1 %3234  ;;  %v3042_v40 = vsub.f32 %v2914_v34, %v2978_v47  ;;  %v3051_v24 = vsub.f32 %v2923_v54, %v2987_v56  ;;  %v2925_v47 = vld [vmem:[%s7602_s2 + $0x1d] sm:$0x1]  ;;  %v2918_v56 = vld [vmem:[%s7602_s2 + $0x16] sm:$0x1] }
 0x1da   :  { %7888 = vst [vmem:[#allocation26_spill] sm:$0xff] %v6768_v42  ;;  %3937 = vperm.xlu0 %4456, %v3047_v33   ;;  %3874 = vperm.xlu1 %4457, %v3040_v58   ;;  %v7893_v33 = vld [vmem:[#allocation40_spill] sm:$0xff]  ;;  %v7895_v58 = vld [vmem:[#allocation47_spill] sm:$0xff] }
 0x1db   :  { %v2980_v1 = vmul.f32 %v6267_v61, %v7893_v33  ;;  %v2989_v2 = vmul.f32 %v6273_v52, %v7895_v58  ;;  %v7896_v61 = vld [vmem:[#allocation42_spill] sm:$0xff]  ;;  %v7899_v52 = vld [vmem:[#allocation49_spill] sm:$0xff] }
 0x1dd   :  { %v6782_v42 = vpop.permute.xlu0 %3315  ;;  %v6789_v41 = vpop.permute.xlu1 %3252  ;;  %v3044_v34 = vsub.f32 %v2916_v36, %v2980_v1  ;;  %v3053_v54 = vsub.f32 %v2925_v47, %v2989_v2  ;;  %v2927_v1 = vld [vmem:[%s7602_s2 + $0x1f] sm:$0x1]  ;;  %v2920_v2 = vld [vmem:[%s7602_s2 + $0x18] sm:$0x1] }
 0x1de   :  { %3955 = vperm.xlu0 %4456, %v3049_v32   ;;  %7894 = vst [vmem:[#allocation23_spill] sm:$0xff] %v6789_v41  ;;  %3892 = vperm.xlu1 %4457, %v3042_v40   ;;  %v7897_v32 = vld [vmem:[#allocation61_spill] sm:$0xff]  ;;  %v2991_v40 = vmul.f32 %v6296_v25, %v7899_v52  ;;  %v7903_v25 = vld [vmem:[#allocation51_spill] sm:$0xff] }
 0x1df   :  { %v2982_v33 = vmul.f32 %v7897_v32, %v7896_v61  ;;  %v7901_v61 = vld [vmem:[#allocation62_spill] sm:$0xff] }
 0x1e0   :  { %v3055_v47 = vsub.f32 %v2927_v1, %v2991_v40  ;;  %v2922_v40 = vld [vmem:[%s7602_s2 + $0x1a] sm:$0x1] }
 0x1e1   :  { %v6796_v20 = vpop.permute.xlu0 %3333  ;;  %v6803_v41 = vpop.permute.xlu1 %3270  ;;  %v3046_v36 = vsub.f32 %v2918_v56, %v2982_v33  ;;  %v2929_v33 = vld [vmem:[%s7602_s2 + $0x21] sm:$0x1] }
 0x1e2   :  { %3973 = vperm.xlu0 %4456, %v3051_v24   ;;  %7898 = vst [vmem:[#allocation25_spill] sm:$0xff] %v6803_v41  ;;  %3910 = vperm.xlu1 %4457, %v3044_v34   ;;  %v7900_v24 = vld [vmem:[#allocation44_spill] sm:$0xff]  ;;  %v2993_v34 = vmul.f32 %v6317_v0, %v7903_v25  ;;  %v7907_v0 = vld [vmem:[#allocation53_spill] sm:$0xff] }
 0x1e3   :  { %v2984_v32 = vmul.f32 %v7901_v61, %v7900_v24  ;;  %v7905_v24 = vld [vmem:[#allocation65_spill] sm:$0xff] }
 0x1e4   :  { %v3057_v1 = vsub.f32 %v2929_v33, %v2993_v34  ;;  %v2924_v34 = vld [vmem:[%s7602_s2 + $0x1c] sm:$0x1] }
 0x1e5   :  { %v6810_v58 = vpop.permute.xlu0 %3351  ;;  %v6817_v41 = vpop.permute.xlu1 %3288  ;;  %v3048_v56 = vsub.f32 %v2920_v2, %v2984_v32  ;;  %v2931_v32 = vld [vmem:[%s7602_s2 + $0x23] sm:$0x1] }
 0x1e6   :  { %3991 = vperm.xlu0 %4456, %v3053_v54   ;;  %7902 = vst [vmem:[#allocation29_spill] sm:$0xff] %v6817_v41  ;;  %3928 = vperm.xlu1 %4457, %v3046_v36   ;;  %v7904_v54 = vld [vmem:[#allocation46_spill] sm:$0xff]  ;;  %v2995_v36 = vmul.f32 %v6340_v44, %v7907_v0 }
 0x1e7   :  { %v2986_v61 = vmul.f32 %v7905_v24, %v7904_v54  ;;  %v7910_v54 = vld [vmem:[#allocation66_spill] sm:$0xff] }
 0x1e8   :  { %v3059_v33 = vsub.f32 %v2931_v32, %v2995_v36  ;;  %v7911_v44 = vld [vmem:[#allocation6_spill] sm:$0xff]  ;;  %v2926_v36 = vld [vmem:[%s7602_s2 + $0x1e] sm:$0x1] }
 0x1e9   :  { %v6824_v52 = vpop.permute.xlu0 %3369  ;;  %v6831_v41 = vpop.permute.xlu1 %3306  ;;  %v3050_v2 = vsub.f32 %v2922_v40, %v2986_v61  ;;  %v2933_v61 = vld [vmem:[%s7602_s2 + $0x25] sm:$0x1] }
 0x1ea   :  { %4009 = vperm.xlu0 %4456, %v3055_v47   ;;  %7906 = vst [vmem:[#allocation27_spill] sm:$0xff] %v6831_v41  ;;  %3946 = vperm.xlu1 %4457, %v3048_v56   ;;  %v7909_v47 = vld [vmem:[#allocation48_spill] sm:$0xff]  ;;  %v7912_v56 = vld [vmem:[#allocation67_spill] sm:$0xff] }
 0x1eb   :  { %v2988_v24 = vmul.f32 %v7910_v54, %v7909_v47  ;;  %v2997_v0 = vmul.f32 %v7912_v56, %v7911_v44 }
 0x1ed   :  { %v6838_v25 = vpop.permute.xlu0 %3387  ;;  %v6845_v41 = vpop.permute.xlu1 %3324  ;;  %v3052_v40 = vsub.f32 %v2924_v34, %v2988_v24  ;;  %v3061_v32 = vsub.f32 %v2933_v61, %v2997_v0  ;;  %v2935_v24 = vld [vmem:[%s7602_s2 + $0x27] sm:$0x1]  ;;  %v2928_v0 = vld [vmem:[%s7602_s2 + $0x20] sm:$0x1] }
 0x1ee   :  { %7908 = vst [vmem:[#allocation28_spill] sm:$0xff] %v6838_v25  ;;  %4027 = vperm.xlu0 %4456, %v3057_v1   ;;  %3964 = vperm.xlu1 %4457, %v3050_v2   ;;  %v7913_v1 = vld [vmem:[#allocation50_spill] sm:$0xff]  ;;  %v7914_v2 = vld [vmem:[#allocation8_spill] sm:$0xff] }
 0x1ef   :  { %v2990_v47 = vmul.f32 %v6378_v21, %v7913_v1  ;;  %v2999_v44 = vmul.f32 %v6384_v45, %v7914_v2  ;;  %v7915_v21 = vld [vmem:[#allocation52_spill] sm:$0xff]  ;;  %v7916_v45 = vld [vmem:[#allocation10_spill] sm:$0xff] }
 0x1f1   :  { %v6852_v25 = vpop.permute.xlu0 %3405  ;;  %v6859_v54 = vpop.permute.xlu1 %3342  ;;  %v3054_v34 = vsub.f32 %v2926_v36, %v2990_v47  ;;  %v3063_v61 = vsub.f32 %v2935_v24, %v2999_v44  ;;  %v2937_v47 = vld [vmem:[%s7602_s2 + $0x29] sm:$0x1]  ;;  %v2930_v44 = vld [vmem:[%s7602_s2 + $0x22] sm:$0x1] }
 0x1f2   :  { %4045 = vperm.xlu0 %4456, %v3059_v33   ;;  %3982 = vperm.xlu1 %4457, %v3052_v40   ;;  %v2992_v33 = vmul.f32 %v6399_v7, %v7915_v21  ;;  %v3001_v40 = vmul.f32 %v6405_v38, %v7916_v45  ;;  %v7917_v7 = vld [vmem:[#allocation55_spill] sm:$0xff]  ;;  %v7918_v38 = vld [vmem:[#allocation60_spill] sm:$0xff] }
 0x1f4   :  { %v3056_v36 = vsub.f32 %v2928_v0, %v2992_v33  ;;  %v3065_v24 = vsub.f32 %v2937_v47, %v3001_v40  ;;  %v2939_v33 = vld [vmem:[%s7602_s2 + $0x2b] sm:$0x1]  ;;  %v2932_v40 = vld [vmem:[%s7602_s2 + $0x24] sm:$0x1] }
 0x1f5   :  { %v6866_v56 = vpop.permute.xlu0 %3423  ;;  %v6873_v1 = vpop.permute.xlu1 %3360 }
 0x1f6   :  { %4063 = vperm.xlu0 %4456, %v3061_v32   ;;  %4000 = vperm.xlu1 %4457, %v3054_v34   ;;  %v2994_v32 = vmul.f32 %v6422_v53, %v7917_v7  ;;  %v3003_v34 = vmul.f32 %v6428_v4, %v7918_v38  ;;  %v7920_v53 = vld [vmem:[#allocation7_spill] sm:$0xff] }
 0x1f7   :  { %v7922_v4 = vld [vmem:[#allocation63_spill] sm:$0xff] }
 0x1f8   :  { %v3058_v0 = vsub.f32 %v2930_v44, %v2994_v32  ;;  %v3067_v47 = vsub.f32 %v2939_v33, %v3003_v34  ;;  %v2941_v32 = vld [vmem:[%s7602_s2 + $0x2d] sm:$0x1]  ;;  %v2934_v34 = vld [vmem:[%s7602_s2 + $0x26] sm:$0x1] }
 0x1f9   :  { %v6880_v2 = vpop.permute.xlu0 %3441  ;;  %v6887_v21 = vpop.permute.xlu1 %3378 }
 0x1fa   :  { %4081 = vperm.xlu0 %4456, %v3063_v61   ;;  %4018 = vperm.xlu1 %4457, %v3056_v36   ;;  %v2996_v61 = vmul.f32 %v6440_v17, %v7920_v53  ;;  %v7923_v36 = vld [vmem:[#allocation74_spill] sm:$0xff]  ;;  %v7925_v17 = vld [vmem:[#allocation9_spill] sm:$0xff] }
 0x1fb   :  { %v3005_v38 = vmul.f32 %v7923_v36, %v7922_v4  ;;  %v7929_v4 = vld [vmem:[#allocation78_spill] sm:$0xff] }
 0x1fc   :  { %v3060_v44 = vsub.f32 %v2932_v40, %v2996_v61  ;;  %v2943_v61 = vld [vmem:[%s7602_s2 + $0x2f] sm:$0x1] }
 0x1fd   :  { %v6894_v45 = vpop.permute.xlu0 %3459  ;;  %v6901_v7 = vpop.permute.xlu1 %3396  ;;  %v3069_v33 = vsub.f32 %v2941_v32, %v3005_v38  ;;  %v2936_v38 = vld [vmem:[%s7602_s2 + $0x28] sm:$0x1] }
 0x1fe   :  { %7919 = vst [vmem:[#allocation33_spill] sm:$0xff] %v6894_v45  ;;  %4099 = vperm.xlu0 %4456, %v3065_v24   ;;  %7921 = vst [vmem:[#allocation30_spill] sm:$0xff] %v6901_v7  ;;  %4036 = vperm.xlu1 %4457, %v3058_v0   ;;  %v7926_v24 = vld [vmem:[#allocation77_spill] sm:$0xff] }
 0x1ff   :  { %v2998_v53 = vmul.f32 %v7926_v24, %v7925_v17  ;;  %v7928_v0 = vld [vmem:[#allocation13_spill] sm:$0xff]  ;;  %v7931_v17 = vld [vmem:[#allocation79_spill] sm:$0xff] }
 0x200   :  { %v3007_v36 = vmul.f32 %v7929_v4, %v7928_v0 }
 0x201   :  { %v6908_v45 = vpop.permute.xlu0 %3477  ;;  %v6915_v7 = vpop.permute.xlu1 %3414  ;;  %v3062_v40 = vsub.f32 %v2934_v34, %v2998_v53  ;;  %v2945_v53 = vld [vmem:[%s7602_s2 + $0x31] sm:$0x1] }
 0x202   :  { %7924 = vst [vmem:[#allocation35_spill] sm:$0xff] %v6908_v45  ;;  %4117 = vperm.xlu0 %4456, %v3067_v47   ;;  %7927 = vst [vmem:[#allocation31_spill] sm:$0xff] %v6915_v7  ;;  %4054 = vperm.xlu1 %4457, %v3060_v44   ;;  %v7930_v47 = vld [vmem:[#allocation11_spill] sm:$0xff]  ;;  %v3071_v32 = vsub.f32 %v2943_v61, %v3007_v36  ;;  %v7932_v44 = vld [vmem:[#allocation68_spill] sm:$0xff] }
 0x203   :  { %v3000_v24 = vmul.f32 %v7931_v17, %v7930_v47  ;;  %v3009_v0 = vmul.f32 %v6488_v31, %v7932_v44  ;;  %v2938_v36 = vld [vmem:[%s7602_s2 + $0x2a] sm:$0x1]  ;;  %v7935_v31 = vld [vmem:[#allocation69_spill] sm:$0xff] }
 0x205   :  { %v6922_v45 = vpop.permute.xlu0 %3495  ;;  %v6929_v7 = vpop.permute.xlu1 %3432  ;;  %v3064_v34 = vsub.f32 %v2936_v38, %v3000_v24  ;;  %v3073_v61 = vsub.f32 %v2945_v53, %v3009_v0  ;;  %v2947_v24 = vld [vmem:[%s7602_s2 + $0x33] sm:$0x1]  ;;  %v2940_v0 = vld [vmem:[%s7602_s2 + $0x2c] sm:$0x1] }
 0x206   :  { %4135 = vperm.xlu0 %4456, %v3069_v33   ;;  %4072 = vperm.xlu1 %4457, %v3062_v40   ;;  %v7934_v33 = vld [vmem:[#allocation12_spill] sm:$0xff] }
 0x207   :  { %v3002_v47 = vmul.f32 %v6505_v22, %v7934_v33  ;;  %v7936_v40 = vld [vmem:[#allocation80_spill] sm:$0xff] }
 0x208   :  { %v3011_v44 = vmul.f32 %v7936_v40, %v7935_v31  ;;  %v7937_v22 = vld [vmem:[#allocation64_spill] sm:$0xff] }
 0x209   :  { %v6936_v4 = vpop.permute.xlu0 %3513  ;;  %v6943_v17 = vpop.permute.xlu1 %3450  ;;  %v3066_v38 = vsub.f32 %v2938_v36, %v3002_v47  ;;  %v2949_v47 = vld [vmem:[%s7602_s2 + $0x35] sm:$0x1] }
 0x20a   :  { %7933 = vst [vmem:[#allocation37_spill] sm:$0xff] %v6936_v4  ;;  %4153 = vperm.xlu0 %4456, %v3071_v32   ;;  %4090 = vperm.xlu1 %4457, %v3064_v34   ;;  %v3004_v32 = vmul.f32 %v6524_v39, %v7937_v22  ;;  %v3075_v53 = vsub.f32 %v2947_v24, %v3011_v44  ;;  %v7938_v34 = vld [vmem:[#allocation71_spill] sm:$0xff]  ;;  %v7939_v39 = vld [vmem:[#allocation14_spill] sm:$0xff] }
 0x20b   :  { %v3013_v31 = vmul.f32 %v6532_v16, %v7938_v34  ;;  %v2942_v44 = vld [vmem:[%s7602_s2 + $0x2e] sm:$0x1]  ;;  %v7940_v16 = vld [vmem:[#allocation73_spill] sm:$0xff] }
 0x20c   :  { %v3068_v36 = vsub.f32 %v2940_v0, %v3004_v32  ;;  %v2951_v32 = vld [vmem:[%s7602_s2 + $0x37] sm:$0x1] }
 0x20d   :  { %v6950_v4 = vpop.permute.xlu0 %3531  ;;  %v6957_v33 = vpop.permute.xlu1 %3468  ;;  %v3077_v24 = vsub.f32 %v2949_v47, %v3013_v31  ;;  %v2944_v31 = vld [vmem:[%s7602_s2 + $0x30] sm:$0x1] }
 0x20e   :  { %4171 = vperm.xlu0 %4456, %v3073_v61   ;;  %4108 = vperm.xlu1 %4457, %v3066_v38   ;;  %v3006_v61 = vmul.f32 %v6538_v50, %v7939_v39  ;;  %v3015_v38 = vmul.f32 %v6549_v57, %v7940_v16  ;;  %v7941_v50 = vld [vmem:[#allocation15_spill] sm:$0xff] }
 0x20f   :  { %v7942_v57 = vld [vmem:[#allocation75_spill] sm:$0xff] }
 0x210   :  { %v3070_v0 = vsub.f32 %v2942_v44, %v3006_v61  ;;  %v3079_v47 = vsub.f32 %v2951_v32, %v3015_v38  ;;  %v2953_v61 = vld [vmem:[%s7602_s2 + $0x39] sm:$0x1]  ;;  %v2946_v38 = vld [vmem:[%s7602_s2 + $0x32] sm:$0x1] }
 0x211   :  { %v6964_v40 = vpop.permute.xlu0 %3549  ;;  %v6971_v22 = vpop.permute.xlu1 %3486 }
 0x212   :  { %4189 = vperm.xlu0 %4456, %v3075_v53   ;;  %4126 = vperm.xlu1 %4457, %v3068_v36   ;;  %v3008_v53 = vmul.f32 %v6555_v29, %v7941_v50  ;;  %v3017_v36 = vmul.f32 %v6563_v28, %v7942_v57  ;;  %v7943_v29 = vld [vmem:[#allocation70_spill] sm:$0xff]  ;;  %v7944_v28 = vld [vmem:[#allocation17_spill] sm:$0xff] }
 0x214   :  { %v3072_v44 = vsub.f32 %v2944_v31, %v3008_v53  ;;  %v3081_v32 = vsub.f32 %v2953_v61, %v3017_v36  ;;  %v2955_v53 = vld [vmem:[%s7602_s2 + $0x3b] sm:$0x1]  ;;  %v2948_v36 = vld [vmem:[%s7602_s2 + $0x34] sm:$0x1] }
 0x215   :  { %v6978_v34 = vpop.permute.xlu0 %3567  ;;  %v6985_v39 = vpop.permute.xlu1 %3504 }
 0x216   :  { %4207 = vperm.xlu0 %4456, %v3077_v24   ;;  %4144 = vperm.xlu1 %4457, %v3070_v0   ;;  %v3010_v24 = vmul.f32 %v6569_v27, %v7943_v29  ;;  %v3019_v0 = vmul.f32 %v6575_v5, %v7944_v28  ;;  %v7945_v27 = vld [vmem:[#allocation72_spill] sm:$0xff]  ;;  %v7946_v5 = vld [vmem:[#allocation19_spill] sm:$0xff] }
 0x218   :  { %v3074_v31 = vsub.f32 %v2946_v38, %v3010_v24  ;;  %v3083_v61 = vsub.f32 %v2955_v53, %v3019_v0  ;;  %v2957_v24 = vld [vmem:[%s7602_s2 + $0x3d] sm:$0x1]  ;;  %v2950_v0 = vld [vmem:[%s7602_s2 + $0x36] sm:$0x1] }
 0x219   :  { %v6992_v16 = vpop.permute.xlu0 %3585  ;;  %v6999_v50 = vpop.permute.xlu1 %3522 }
 0x21a   :  { %4225 = vperm.xlu0 %4456, %v3079_v47   ;;  %4162 = vperm.xlu1 %4457, %v3072_v44   ;;  %v3012_v47 = vmul.f32 %v6581_v6, %v7945_v27  ;;  %v3021_v44 = vmul.f32 %v6587_v35, %v7946_v5  ;;  %v7947_v6 = vld [vmem:[#allocation76_spill] sm:$0xff]  ;;  %v7948_v35 = vld [vmem:[#allocation21_spill] sm:$0xff] }
 0x21c   :  { %v3076_v38 = vsub.f32 %v2948_v36, %v3012_v47  ;;  %v3085_v53 = vsub.f32 %v2957_v24, %v3021_v44  ;;  %v2959_v47 = vld [vmem:[%s7602_s2 + $0x3f] sm:$0x1]  ;;  %v2952_v44 = vld [vmem:[%s7602_s2 + $0x38] sm:$0x1] }
 0x21d   :  { %v7006_v57 = vpop.permute.xlu0 %3603  ;;  %v7013_v29 = vpop.permute.xlu1 %3540 }
 0x21e   :  { %4243 = vperm.xlu0 %4456, %v3081_v32   ;;  %4180 = vperm.xlu1 %4457, %v3074_v31   ;;  %v3014_v32 = vmul.f32 %v6593_v19, %v7947_v6  ;;  %v3023_v31 = vmul.f32 %v6599_v43, %v7948_v35  ;;  %v7950_v19 = vld [vmem:[#allocation16_spill] sm:$0xff] }
 0x220   :  { %v3078_v36 = vsub.f32 %v2950_v0, %v3014_v32  ;;  %v3087_v24 = vsub.f32 %v2959_v47, %v3023_v31  ;;  %v7952_v32 = vld [vmem:[#allocation18_spill] sm:$0xff] }
 0x221   :  { %v7020_v28 = vpop.permute.xlu0 %3621  ;;  %v7027_v27 = vpop.permute.xlu1 %3558  ;;  %v3018_v0 = vmul.f32 %v6620_v26, %v7952_v32  ;;  %v7954_v32 = vlaneseq }
 0x222   :  { %4261 = vperm.xlu0 %4456, %v3083_v61   ;;  %4198 = vperm.xlu1 %4457, %v3076_v38   ;;  %v3016_v61 = vmul.f32 %v6607_v49, %v7950_v19  ;;  %v7951_v38 = vld [vmem:[#allocation5_spill] sm:$0xff]  ;;  %v2954_v49 = vld [vmem:[%s7602_s2 + $0x3a] sm:$0x1] }
 0x223   :  { %v3105_v35 = vrot.slane %v6615_v37, %v7951_v38  ;;  %v4586_v37 = vld [vmem:[%s7600_s0 + $0x2] sm:$0x3]  ;;  %vm7071_vm1 = vcmp.lt.s32.totalorder %v7954_v32, 256  ;;  %v3022_v32 = vmul.f32 %v6644_v11, %v6543_v14 }
 0x225   :  { %v7034_v5 = vpop.permute.xlu0 %3639  ;;  %v7041_v6 = vpop.permute.xlu1 %3576  ;;  %v3665_v47 = vmul.f32 %v4586_v37, %v3105_v35 }
 0x226   :  { %7949 = vst [vmem:[#allocation32_spill] sm:$0xff] %v7034_v5  ;;  %4279 = vperm.xlu0 %4456, %v3085_v53   ;;  %4216 = vperm.xlu1 %4457, %v3078_v36   ;;  %v3080_v5 = vsub.f32 %v2952_v44, %v3016_v61  ;;  %v7953_v36 = vld [vmem:[#allocation20_spill] sm:$0xff]  ;;  %v3123_v61 = vrot.slane %v6648_v59, %v7951_v38  ;;  %v4587_v59 = vld [vmem:[%s7600_s0 + $0x6] sm:$0x3] }
 0x227   :  { %v3020_v31 = vmul.f32 %v6631_v55, %v7953_v36  ;;  %v3082_v44 = vsub.f32 %v2954_v49, %v3018_v0  ;;  %v3141_v49 = vrot.slane %v6677_v3, %v7951_v38  ;;  %v4588_v3 = vld [vmem:[%s7600_s0 + $0xa] sm:$0x3] }
 0x228   :  { %v3667_v0 = vmul.f32 %v4587_v59, %v3123_v61 }
 0x229   :  { %v7046_v43 = vpop.permute.xlu0 %3657  ;;  %v7052_v53 = vpop.permute.xlu1 %3594 }
 0x22a   :  { %4297 = vperm.xlu0 %4456, %v3087_v24   ;;  %4234 = vperm.xlu1 %4457, %v3080_v5   ;;  %v2956_v24 = vld [vmem:[%s7602_s2 + $0x3c] sm:$0x1] }
 0x22b   :  { %v3084_v37 = vsub.f32 %v2956_v24, %v3020_v31  ;;  %v2958_v31 = vld [vmem:[%s7602_s2 + $0x3e] sm:$0x1]  ;;  %v3159_v24 = vrot.slane %v6705_v18, %v7951_v38  ;;  %v4589_v18 = vld [vmem:[%s7600_s0 + $0xe] sm:$0x3] }
 0x22c   :  { %v3086_v11 = vsub.f32 %v2958_v31, %v3022_v32 }
 0x22d   :  { %v3740_v19 = vpop.permute.xlu0 %3739  ;;  %v7068_v5 = vpop.permute.xlu1 %3612 }
 0x22e   :  { %v3745_v26 = vrot.slane %v3740_v19, %v7951_v38  ;;  %4252 = vperm.xlu1 %4457, %v3082_v44   ;;  %v3669_v44 = vmul.f32 %v4588_v3, %v3141_v49  ;;  %v3671_v49 = vmul.f32 %v4589_v18, %v3159_v24  ;;  %v3132_v18 = vrot.slane %v6663_v46, %v7951_v38 }
 0x230   :  { %v4305_v36 = vadd.f32 %v3745_v26, %v3665_v47 }
 0x231   :  { %v3758_v35 = vpop.permute.xlu0 %3757  ;;  %v7085_v47 = vpop.permute.xlu1 %3630 }
 0x232   :  { %4373 = vst.msk [vmem:[#allocation2 + $0x2] sm:$0x3] %vm7071_vm1, %v4305_v36  ;;  %v3763_v19 = vrot.slane %v3758_v35, %v7951_v38  ;;  %4270 = vperm.xlu1 %4457, %v3084_v37   ;;  %v3096_v35 = vrot.slane %v6656_v60, %v7951_v38  ;;  %v4590_v60 = vld [vmem:[%s7600_s0] sm:$0x3] }
 0x234   :  { %v4307_v26 = vadd.f32 %v3763_v19, %v3667_v0  ;;  %v3177_v0 = vrot.slane %v6670_v23, %v7951_v38  ;;  %v3664_v31 = vmul.f32 %v4590_v60, %v3096_v35  ;;  %v3213_v60 = vrot.slane %v6698_v13, %v7951_v38 }
 0x235   :  { %v3776_v61 = vpop.permute.xlu0 %3775  ;;  %v7098_v36 = vpop.permute.xlu1 %3648 }
 0x236   :  { %4375 = vst.msk [vmem:[#allocation2 + $0x6] sm:$0x3] %vm7071_vm1, %v4307_v26  ;;  %v3781_v14 = vrot.slane %v3776_v61, %v7951_v38  ;;  %4288 = vperm.xlu1 %4457, %v3086_v11   ;;  %v3114_v26 = vrot.slane %v6633_v30, %v7951_v38  ;;  %v4592_v30 = vld [vmem:[%s7600_s0 + $0x4] sm:$0x3] }
 0x238   :  { %v4309_v37 = vadd.f32 %v3781_v14, %v3669_v44  ;;  %v4591_v44 = vld [vmem:[%s7600_s0 + $0x12] sm:$0x3]  ;;  %v3195_v14 = vrot.slane %v6684_v62, %v7951_v38 }
 0x239   :  { %v3794_v59 = vpop.permute.xlu0 %3793  ;;  %v3731_v32 = vpop.permute.xlu1 %3730  ;;  %v3673_v24 = vmul.f32 %v4591_v44, %v3177_v0 }
 0x23a   :  { %4377 = vst.msk [vmem:[#allocation2 + $0xa] sm:$0x3] %vm7071_vm1, %v4309_v37  ;;  %v3799_v19 = vrot.slane %v3794_v59, %v7951_v38  ;;  %v3736_v23 = vrot.slane %v3731_v32, %v7951_v38  ;;  %v3666_v59 = vmul.f32 %v4592_v30, %v3114_v26 }
 0x23c   :  { %v4311_v61 = vadd.f32 %v3799_v19, %v3671_v49  ;;  %v4304_v11 = vadd.f32 %v3736_v23, %v3664_v31  ;;  %v4593_v19 = vld [vmem:[%s7600_s0 + $0x16] sm:$0x3]  ;;  %v4594_v23 = vld [vmem:[%s7600_s0 + $0x8] sm:$0x3] }
 0x23d   :  { %v3812_v3 = vpop.permute.xlu0 %3811  ;;  %v3749_v37 = vpop.permute.xlu1 %3748  ;;  %v3675_v32 = vmul.f32 %v4593_v19, %v3195_v14  ;;  %v4595_v14 = vld [vmem:[%s7600_s0 + $0x1a] sm:$0x3]  ;;  %v4597_v19 = vld [vmem:[%s7600_s0 + $0x1e] sm:$0x3] }
 0x23e   :  { %4379 = vst.msk [vmem:[#allocation2 + $0xe] sm:$0x3] %vm7071_vm1, %v4311_v61  ;;  %v3817_v35 = vrot.slane %v3812_v3, %v7951_v38  ;;  %4372 = vst.msk [vmem:[#allocation2] sm:$0x3] %vm7071_vm1, %v4304_v11  ;;  %v3754_v62 = vrot.slane %v3749_v37, %v7951_v38  ;;  %v3668_v61 = vmul.f32 %v4594_v23, %v3132_v18 }
 0x23f   :  { %v3150_v3 = vrot.slane %v6691_v51, %v7951_v38  ;;  %v3677_v11 = vmul.f32 %v4595_v14, %v3213_v60  ;;  %v3249_v60 = vrot.slane %v6726_v15, %v7951_v38  ;;  %v3267_v14 = vrot.slane %v6740_v63, %v7951_v38 }
 0x240   :  { %v4313_v0 = vadd.f32 %v3817_v35, %v3673_v24  ;;  %v4306_v31 = vadd.f32 %v3754_v62, %v3666_v59  ;;  %v3231_v35 = vrot.slane %v6712_v10, %v7951_v38  ;;  %v4596_v59 = vld [vmem:[%s7600_s0 + $0xc] sm:$0x3]  ;;  %v3168_v62 = vrot.slane %v6719_v48, %v7951_v38 }
 0x241   :  { %v3830_v49 = vpop.permute.xlu0 %3829  ;;  %v3767_v26 = vpop.permute.xlu1 %3766  ;;  %v3670_v18 = vmul.f32 %v4596_v59, %v3150_v3 }
 0x242   :  { %4381 = vst.msk [vmem:[#allocation2 + $0x12] sm:$0x3] %vm7071_vm1, %v4313_v0  ;;  %v3835_v46 = vrot.slane %v3830_v49, %v7951_v38  ;;  %4374 = vst.msk [vmem:[#allocation2 + $0x4] sm:$0x3] %vm7071_vm1, %v4306_v31  ;;  %v3772_v13 = vrot.slane %v3767_v26, %v7951_v38  ;;  %v4598_v26 = vld [vmem:[%s7600_s0 + $0x10] sm:$0x3] }
 0x243   :  { %v3672_v23 = vmul.f32 %v4598_v26, %v3168_v62  ;;  %v4601_v62 = vld [vmem:[%s7600_s0 + $0x26] sm:$0x3] }
 0x244   :  { %v4315_v44 = vadd.f32 %v3835_v46, %v3675_v32  ;;  %v4308_v37 = vadd.f32 %v3772_v13, %v3668_v61  ;;  %v3679_v32 = vmul.f32 %v4597_v19, %v3231_v35  ;;  %v3186_v61 = vrot.slane %v6733_v12, %v7951_v38 }
 0x245   :  { %v3848_v24 = vpop.permute.xlu0 %3847  ;;  %v3785_v30 = vpop.permute.xlu1 %3784 }
 0x246   :  { %4383 = vst.msk [vmem:[#allocation2 + $0x16] sm:$0x3] %vm7071_vm1, %v4315_v44  ;;  %v3853_v51 = vrot.slane %v3848_v24, %v7951_v38  ;;  %4376 = vst.msk [vmem:[#allocation2 + $0x8] sm:$0x3] %vm7071_vm1, %v4308_v37  ;;  %v3790_v10 = vrot.slane %v3785_v30, %v7951_v38  ;;  %v4599_v44 = vld [vmem:[%s7600_s0 + $0x22] sm:$0x3]  ;;  %v3204_v30 = vrot.slane %v6747_v8, %v7951_v38 }
 0x247   :  { %v3681_v24 = vmul.f32 %v4599_v44, %v3249_v60  ;;  %v4600_v37 = vld [vmem:[%s7600_s0 + $0x14] sm:$0x3]  ;;  %v4602_v60 = vld [vmem:[%s7600_s0 + $0x18] sm:$0x3] }
 0x248   :  { %v4317_v0 = vadd.f32 %v3853_v51, %v3677_v11  ;;  %v4310_v31 = vadd.f32 %v3790_v10, %v3670_v18  ;;  %v3674_v51 = vmul.f32 %v4600_v37, %v3186_v61  ;;  %v3683_v10 = vmul.f32 %v4601_v62, %v3267_v14 }
 0x249   :  { %v3866_v49 = vpop.permute.xlu0 %3865  ;;  %v3803_v46 = vpop.permute.xlu1 %3802  ;;  %v3240_v37 = vrot.slane %v6775_v9, %v7951_v38  ;;  %v3321_v62 = vrot.slane %v6782_v42, %v7951_v38 }
 0x24a   :  { %4385 = vst.msk [vmem:[#allocation2 + $0x1a] sm:$0x3] %vm7071_vm1, %v4317_v0  ;;  %v3871_v48 = vrot.slane %v3866_v49, %v7951_v38  ;;  %4378 = vst.msk [vmem:[#allocation2 + $0xc] sm:$0x3] %vm7071_vm1, %v4310_v31  ;;  %v3808_v15 = vrot.slane %v3803_v46, %v7951_v38  ;;  %v7957_v0 = vld [vmem:[#allocation22_spill] sm:$0xff]  ;;  %v3676_v31 = vmul.f32 %v4602_v60, %v3204_v30 }
 0x24b   :  { %v3285_v49 = vrot.slane %v7957_v0, %v7951_v38 }
 0x24c   :  { %v4319_v3 = vadd.f32 %v3871_v48, %v3679_v32  ;;  %v4312_v11 = vadd.f32 %v3808_v15, %v3672_v23  ;;  %v7958_v48 = vld [vmem:[#allocation24_spill] sm:$0xff]  ;;  %v4603_v15 = vld [vmem:[%s7600_s0 + $0x2a] sm:$0x3] }
 0x24d   :  { %v3884_v13 = vpop.permute.xlu0 %3883  ;;  %v3821_v35 = vpop.permute.xlu1 %3820  ;;  %v3222_v46 = vrot.slane %v7958_v48, %v7951_v38  ;;  %v4607_v48 = vld [vmem:[%s7600_s0 + $0x32] sm:$0x3] }
 0x24e   :  { %4387 = vst.msk [vmem:[#allocation2 + $0x1e] sm:$0x3] %vm7071_vm1, %v4319_v3  ;;  %v3889_v12 = vrot.slane %v3884_v13, %v7951_v38  ;;  %4380 = vst.msk [vmem:[#allocation2 + $0x10] sm:$0x3] %vm7071_vm1, %v4312_v11  ;;  %v3826_v63 = vrot.slane %v3821_v35, %v7951_v38  ;;  %v3685_v3 = vmul.f32 %v4603_v15, %v3285_v49  ;;  %v7959_v13 = vld [vmem:[#allocation26_spill] sm:$0xff] }
 0x24f   :  { %v3303_v44 = vrot.slane %v7959_v13, %v7951_v38  ;;  %v4606_v49 = vld [vmem:[%s7600_s0 + $0x20] sm:$0x3] }
 0x250   :  { %v4321_v59 = vadd.f32 %v3889_v12, %v3681_v24  ;;  %v4314_v19 = vadd.f32 %v3826_v63, %v3674_v51  ;;  %v4604_v12 = vld [vmem:[%s7600_s0 + $0x1c] sm:$0x3] }
 0x251   :  { %v3902_v18 = vpop.permute.xlu0 %3901  ;;  %v3839_v32 = vpop.permute.xlu1 %3838  ;;  %v3678_v35 = vmul.f32 %v4604_v12, %v3222_v46  ;;  %v3689_v46 = vmul.f32 %v4607_v48, %v3321_v62  ;;  %v4609_v12 = vld [vmem:[%s7600_s0 + $0x36] sm:$0x3]  ;;  %v7962_v62 = vld [vmem:[#allocation29_spill] sm:$0xff] }
 0x252   :  { %4389 = vst.msk [vmem:[#allocation2 + $0x22] sm:$0x3] %vm7071_vm1, %v4321_v59  ;;  %v3907_v8 = vrot.slane %v3902_v18, %v7951_v38  ;;  %4382 = vst.msk [vmem:[#allocation2 + $0x14] sm:$0x3] %vm7071_vm1, %v4314_v19  ;;  %v3844_v26 = vrot.slane %v3839_v32, %v7951_v38  ;;  %v4605_v59 = vld [vmem:[%s7600_s0 + $0x2e] sm:$0x3]  ;;  %v3680_v19 = vmul.f32 %v4606_v49, %v3240_v37 }
 0x253   :  { %v3687_v18 = vmul.f32 %v4605_v59, %v3303_v44  ;;  %v7961_v44 = vld [vmem:[#allocation25_spill] sm:$0xff]  ;;  %v3357_v37 = vrot.slane %v6810_v58, %v7951_v38  ;;  %v4610_v59 = vld [vmem:[%s7600_s0 + $0x28] sm:$0x3]  ;;  %v4611_v49 = vld [vmem:[%s7600_s0 + $0x3a] sm:$0x3] }
 0x254   :  { %v4323_v23 = vadd.f32 %v3907_v8, %v3683_v10  ;;  %v4316_v24 = vadd.f32 %v3844_v26, %v3676_v31  ;;  %v7960_v8 = vld [vmem:[#allocation23_spill] sm:$0xff]  ;;  %v3339_v26 = vrot.slane %v6796_v20, %v7951_v38 }
 0x255   :  { %v3920_v61 = vpop.permute.xlu0 %3919  ;;  %v3857_v11 = vpop.permute.xlu1 %3856  ;;  %v3258_v32 = vrot.slane %v7960_v8, %v7951_v38  ;;  %v3375_v8 = vrot.slane %v6824_v52, %v7951_v38 }
 0x256   :  { %4391 = vst.msk [vmem:[#allocation2 + $0x26] sm:$0x3] %vm7071_vm1, %v4323_v23  ;;  %v3925_v14 = vrot.slane %v3920_v61, %v7951_v38  ;;  %4384 = vst.msk [vmem:[#allocation2 + $0x18] sm:$0x3] %vm7071_vm1, %v4316_v24  ;;  %v3862_v51 = vrot.slane %v3857_v11, %v7951_v38  ;;  %v3276_v24 = vrot.slane %v7961_v44, %v7951_v38 }
 0x258   :  { %v4325_v30 = vadd.f32 %v3925_v14, %v3685_v3  ;;  %v4318_v10 = vadd.f32 %v3862_v51, %v3678_v35  ;;  %v4608_v3 = vld [vmem:[%s7600_s0 + $0x24] sm:$0x3]  ;;  %v3691_v35 = vmul.f32 %v4609_v12, %v3339_v26 }
 0x259   :  { %v3938_v63 = vpop.permute.xlu0 %3937  ;;  %v3875_v0 = vpop.permute.xlu1 %3874  ;;  %v3682_v13 = vmul.f32 %v4608_v3, %v3258_v32 }
 0x25a   :  { %4393 = vst.msk [vmem:[#allocation2 + $0x2a] sm:$0x3] %vm7071_vm1, %v4325_v30  ;;  %v3943_v9 = vrot.slane %v3938_v63, %v7951_v38  ;;  %4386 = vst.msk [vmem:[#allocation2 + $0x1c] sm:$0x3] %vm7071_vm1, %v4318_v10  ;;  %v3880_v42 = vrot.slane %v3875_v0, %v7951_v38  ;;  %v3294_v10 = vrot.slane %v7962_v62, %v7951_v38 }
 0x25c   :  { %v4327_v60 = vadd.f32 %v3943_v9, %v3687_v18  ;;  %v4320_v23 = vadd.f32 %v3880_v42, %v3680_v19  ;;  %v3684_v18 = vmul.f32 %v4610_v59, %v3276_v24  ;;  %v3693_v19 = vmul.f32 %v4611_v49, %v3357_v37 }
 0x25d   :  { %v3956_v31 = vpop.permute.xlu0 %3955  ;;  %v3893_v15 = vpop.permute.xlu1 %3892 }
 0x25e   :  { %4395 = vst.msk [vmem:[#allocation2 + $0x2e] sm:$0x3] %vm7071_vm1, %v4327_v60  ;;  %v3961_v61 = vrot.slane %v3956_v31, %v7951_v38  ;;  %4388 = vst.msk [vmem:[#allocation2 + $0x20] sm:$0x3] %vm7071_vm1, %v4320_v23  ;;  %v3898_v20 = vrot.slane %v3893_v15, %v7951_v38  ;;  %v4612_v31 = vld [vmem:[%s7600_s0 + $0x2c] sm:$0x3] }
 0x25f   :  { %v3686_v48 = vmul.f32 %v4612_v31, %v3294_v10  ;;  %v4613_v15 = vld [vmem:[%s7600_s0 + $0x3e] sm:$0x3] }
 0x260   :  { %v4329_v14 = vadd.f32 %v3961_v61, %v3689_v46  ;;  %v4322_v51 = vadd.f32 %v3898_v20, %v3682_v13  ;;  %v7963_v46 = vld [vmem:[#allocation27_spill] sm:$0xff]  ;;  %v3695_v3 = vmul.f32 %v4613_v15, %v3375_v8  ;;  %v7964_v13 = vld [vmem:[#allocation28_spill] sm:$0xff]  ;;  %v4617_v8 = vld [vmem:[%s7600_s0 + $0x46] sm:$0x3] }
 0x261   :  { %v3974_v11 = vpop.permute.xlu0 %3973  ;;  %v3911_v63 = vpop.permute.xlu1 %3910  ;;  %v3312_v26 = vrot.slane %v7963_v46, %v7951_v38  ;;  %v3393_v44 = vrot.slane %v7964_v13, %v7951_v38 }
 0x262   :  { %4397 = vst.msk [vmem:[#allocation2 + $0x32] sm:$0x3] %vm7071_vm1, %v4329_v14  ;;  %v3979_v30 = vrot.slane %v3974_v11, %v7951_v38  ;;  %4390 = vst.msk [vmem:[#allocation2 + $0x24] sm:$0x3] %vm7071_vm1, %v4322_v51  ;;  %v3916_v58 = vrot.slane %v3911_v63, %v7951_v38  ;;  %v4614_v11 = vld [vmem:[%s7600_s0 + $0x30] sm:$0x3] }
 0x263   :  { %v3688_v12 = vmul.f32 %v4614_v11, %v3312_v26  ;;  %v4615_v63 = vld [vmem:[%s7600_s0 + $0x42] sm:$0x3]  ;;  %v3366_v26 = vrot.slane %v6873_v1, %v7951_v38 }
 0x264   :  { %v4331_v9 = vadd.f32 %v3979_v30, %v3691_v35  ;;  %v4324_v32 = vadd.f32 %v3916_v58, %v3684_v18  ;;  %v3330_v35 = vrot.slane %v6845_v41, %v7951_v38  ;;  %v3697_v59 = vmul.f32 %v4615_v63, %v3393_v44  ;;  %v4616_v58 = vld [vmem:[%s7600_s0 + $0x34] sm:$0x3] }
 0x265   :  { %v3992_v0 = vpop.permute.xlu0 %3991  ;;  %v3929_v60 = vpop.permute.xlu1 %3928  ;;  %v3411_v18 = vrot.slane %v6852_v25, %v7951_v38 }
 0x266   :  { %4399 = vst.msk [vmem:[#allocation2 + $0x36] sm:$0x3] %vm7071_vm1, %v4331_v9  ;;  %v3997_v42 = vrot.slane %v3992_v0, %v7951_v38  ;;  %4392 = vst.msk [vmem:[#allocation2 + $0x28] sm:$0x3] %vm7071_vm1, %v4324_v32  ;;  %v3934_v52 = vrot.slane %v3929_v60, %v7951_v38  ;;  %v3690_v9 = vmul.f32 %v4616_v58, %v3330_v35  ;;  %v4621_v35 = vld [vmem:[%s7600_s0 + $0x4e] sm:$0x3] }
 0x267   :  { %v3348_v0 = vrot.slane %v6859_v54, %v7951_v38  ;;  %v3699_v32 = vmul.f32 %v4617_v8, %v3411_v18  ;;  %v4622_v18 = vld [vmem:[%s7600_s0 + $0x40] sm:$0x3] }
 0x268   :  { %v4333_v23 = vadd.f32 %v3997_v42, %v3693_v19  ;;  %v4326_v24 = vadd.f32 %v3934_v52, %v3686_v48  ;;  %v3429_v42 = vrot.slane %v6866_v56, %v7951_v38  ;;  %v4618_v48 = vld [vmem:[%s7600_s0 + $0x38] sm:$0x3] }
 0x269   :  { %v4010_v61 = vpop.permute.xlu0 %4009  ;;  %v3947_v14 = vpop.permute.xlu1 %3946  ;;  %v3692_v46 = vmul.f32 %v4618_v48, %v3348_v0  ;;  %v7968_v48 = vld [vmem:[#allocation31_spill] sm:$0xff] }
 0x26a   :  { %4401 = vst.msk [vmem:[#allocation2 + $0x3a] sm:$0x3] %vm7071_vm1, %v4333_v23  ;;  %v4015_v20 = vrot.slane %v4010_v61, %v7951_v38  ;;  %4394 = vst.msk [vmem:[#allocation2 + $0x2c] sm:$0x3] %vm7071_vm1, %v4326_v24  ;;  %v3952_v37 = vrot.slane %v3947_v14, %v7951_v38  ;;  %v4619_v61 = vld [vmem:[%s7600_s0 + $0x4a] sm:$0x3]  ;;  %v3384_v14 = vrot.slane %v6887_v21, %v7951_v38 }
 0x26b   :  { %v3701_v15 = vmul.f32 %v4619_v61, %v3429_v42  ;;  %v4620_v24 = vld [vmem:[%s7600_s0 + $0x3c] sm:$0x3] }
 0x26c   :  { %v4335_v51 = vadd.f32 %v4015_v20, %v3695_v3  ;;  %v4328_v62 = vadd.f32 %v3952_v37, %v3688_v12  ;;  %v3447_v3 = vrot.slane %v6880_v2, %v7951_v38  ;;  %v3694_v20 = vmul.f32 %v4620_v24, %v3366_v26 }
 0x26d   :  { %v4028_v30 = vpop.permute.xlu0 %4027  ;;  %v3965_v10 = vpop.permute.xlu1 %3964 }
 0x26e   :  { %4403 = vst.msk [vmem:[#allocation2 + $0x3e] sm:$0x3] %vm7071_vm1, %v4335_v51  ;;  %v4033_v41 = vrot.slane %v4028_v30, %v7951_v38  ;;  %4396 = vst.msk [vmem:[#allocation2 + $0x30] sm:$0x3] %vm7071_vm1, %v4328_v62  ;;  %v3970_v25 = vrot.slane %v3965_v10, %v7951_v38  ;;  %v3703_v37 = vmul.f32 %v4621_v35, %v3447_v3  ;;  %v7965_v51 = vld [vmem:[#allocation33_spill] sm:$0xff] }
 0x26f   :  { %v3465_v30 = vrot.slane %v7965_v51, %v7951_v38  ;;  %v3696_v62 = vmul.f32 %v4622_v18, %v3384_v14  ;;  %v7969_v35 = vld [vmem:[#allocation37_spill] sm:$0xff] }
 0x270   :  { %v4337_v49 = vadd.f32 %v4033_v41, %v3697_v59  ;;  %v4330_v60 = vadd.f32 %v3970_v25, %v3690_v9  ;;  %v7966_v41 = vld [vmem:[#allocation30_spill] sm:$0xff]  ;;  %v4623_v25 = vld [vmem:[%s7600_s0 + $0x52] sm:$0x3] }
 0x271   :  { %v4046_v19 = vpop.permute.xlu0 %4045  ;;  %v3983_v31 = vpop.permute.xlu1 %3982  ;;  %v3402_v10 = vrot.slane %v7966_v41, %v7951_v38 }
 0x272   :  { %4405 = vst.msk [vmem:[#allocation2 + $0x42] sm:$0x3] %vm7071_vm1, %v4337_v49  ;;  %v4051_v54 = vrot.slane %v4046_v19, %v7951_v38  ;;  %4398 = vst.msk [vmem:[#allocation2 + $0x34] sm:$0x3] %vm7071_vm1, %v4330_v60  ;;  %v3988_v56 = vrot.slane %v3983_v31, %v7951_v38  ;;  %v3705_v49 = vmul.f32 %v4623_v25, %v3465_v30  ;;  %v7967_v19 = vld [vmem:[#allocation35_spill] sm:$0xff] }
 0x273   :  { %v3483_v8 = vrot.slane %v7967_v19, %v7951_v38 }
 0x274   :  { %v4339_v52 = vadd.f32 %v4051_v54, %v3699_v32  ;;  %v4332_v13 = vadd.f32 %v3988_v56, %v3692_v46  ;;  %v4624_v54 = vld [vmem:[%s7600_s0 + $0x44] sm:$0x3]  ;;  %v3420_v46 = vrot.slane %v7968_v48, %v7951_v38 }
 0x275   :  { %v4064_v23 = vpop.permute.xlu0 %4063  ;;  %v4001_v44 = vpop.permute.xlu1 %4000  ;;  %v3698_v31 = vmul.f32 %v4624_v54, %v3402_v10  ;;  %v4629_v10 = vld [vmem:[%s7600_s0 + $0x5e] sm:$0x3] }
 0x276   :  { %4407 = vst.msk [vmem:[#allocation2 + $0x46] sm:$0x3] %vm7071_vm1, %v4339_v52  ;;  %v4069_v1 = vrot.slane %v4064_v23, %v7951_v38  ;;  %4400 = vst.msk [vmem:[#allocation2 + $0x38] sm:$0x3] %vm7071_vm1, %v4332_v13  ;;  %v4006_v2 = vrot.slane %v4001_v44, %v7951_v38  ;;  %v4625_v23 = vld [vmem:[%s7600_s0 + $0x56] sm:$0x3] }
 0x277   :  { %v3707_v61 = vmul.f32 %v4625_v23, %v3483_v8  ;;  %v4626_v44 = vld [vmem:[%s7600_s0 + $0x48] sm:$0x3]  ;;  %v3474_v8 = vrot.slane %v6957_v33, %v7951_v38 }
 0x278   :  { %v4341_v11 = vadd.f32 %v4069_v1, %v3701_v15  ;;  %v4334_v63 = vadd.f32 %v4006_v2, %v3694_v20  ;;  %v3501_v15 = vrot.slane %v6922_v45, %v7951_v38  ;;  %v3700_v24 = vmul.f32 %v4626_v44, %v3420_v46 }
 0x279   :  { %v4082_v12 = vpop.permute.xlu0 %4081  ;;  %v4019_v59 = vpop.permute.xlu1 %4018  ;;  %v3438_v20 = vrot.slane %v6929_v7, %v7951_v38 }
 0x27a   :  { %4409 = vst.msk [vmem:[#allocation2 + $0x4a] sm:$0x3] %vm7071_vm1, %v4341_v11  ;;  %v4087_v21 = vrot.slane %v4082_v12, %v7951_v38  ;;  %4402 = vst.msk [vmem:[#allocation2 + $0x3c] sm:$0x3] %vm7071_vm1, %v4334_v63  ;;  %v4024_v58 = vrot.slane %v4019_v59, %v7951_v38  ;;  %v4627_v11 = vld [vmem:[%s7600_s0 + $0x5a] sm:$0x3]  ;;  %v3456_v59 = vrot.slane %v6943_v17, %v7951_v38 }
 0x27b   :  { %v3709_v12 = vmul.f32 %v4627_v11, %v3501_v15  ;;  %v4628_v63 = vld [vmem:[%s7600_s0 + $0x4c] sm:$0x3]  ;;  %v4633_v15 = vld [vmem:[%s7600_s0 + $0x66] sm:$0x3]  ;;  %v4635_v11 = vld [vmem:[%s7600_s0 + $0x6a] sm:$0x3] }
 0x27c   :  { %v4343_v9 = vadd.f32 %v4087_v21, %v3703_v37  ;;  %v4336_v32 = vadd.f32 %v4024_v58, %v3696_v62  ;;  %v3519_v37 = vrot.slane %v7969_v35, %v7951_v38  ;;  %v3702_v21 = vmul.f32 %v4628_v63, %v3438_v20 }
 0x27d   :  { %v4100_v0 = vpop.permute.xlu0 %4099  ;;  %v4037_v60 = vpop.permute.xlu1 %4036  ;;  %v3591_v35 = vrot.slane %v6992_v16, %v7951_v38  ;;  %v3528_v63 = vrot.slane %v6999_v50, %v7951_v38 }
 0x27e   :  { %4411 = vst.msk [vmem:[#allocation2 + $0x4e] sm:$0x3] %vm7071_vm1, %v4343_v9  ;;  %v4105_v42 = vrot.slane %v4100_v0, %v7951_v38  ;;  %4404 = vst.msk [vmem:[#allocation2 + $0x40] sm:$0x3] %vm7071_vm1, %v4336_v32  ;;  %v4042_v26 = vrot.slane %v4037_v60, %v7951_v38  ;;  %v3711_v58 = vmul.f32 %v4629_v10, %v3519_v37  ;;  %v4631_v60 = vld [vmem:[%s7600_s0 + $0x62] sm:$0x3] }
 0x27f   :  { %v3537_v9 = vrot.slane %v6950_v4, %v7951_v38 }
 0x280   :  { %v4345_v56 = vadd.f32 %v4105_v42, %v3705_v49  ;;  %v4338_v3 = vadd.f32 %v4042_v26, %v3698_v31  ;;  %v4630_v49 = vld [vmem:[%s7600_s0 + $0x50] sm:$0x3]  ;;  %v3555_v31 = vrot.slane %v6964_v40, %v7951_v38  ;;  %v4632_v26 = vld [vmem:[%s7600_s0 + $0x54] sm:$0x3] }
 0x281   :  { %v4118_v52 = vpop.permute.xlu0 %4117  ;;  %v4055_v1 = vpop.permute.xlu1 %4054  ;;  %v3704_v19 = vmul.f32 %v4630_v49, %v3456_v59  ;;  %v3713_v54 = vmul.f32 %v4631_v60, %v3537_v9  ;;  %v4638_v9 = vld [vmem:[%s7600_s0 + $0x60] sm:$0x3]  ;;  %v4640_v60 = vld [vmem:[%s7600_s0 + $0x64] sm:$0x3] }
 0x282   :  { %4413 = vst.msk [vmem:[#allocation2 + $0x52] sm:$0x3] %vm7071_vm1, %v4345_v56  ;;  %v4123_v13 = vrot.slane %v4118_v52, %v7951_v38  ;;  %4406 = vst.msk [vmem:[#allocation2 + $0x44] sm:$0x3] %vm7071_vm1, %v4338_v3  ;;  %v4060_v45 = vrot.slane %v4055_v1, %v7951_v38  ;;  %v3706_v56 = vmul.f32 %v4632_v26, %v3474_v8 }
 0x283   :  { %v3492_v52 = vrot.slane %v6971_v22, %v7951_v38  ;;  %v3715_v3 = vmul.f32 %v4633_v15, %v3555_v31  ;;  %v3564_v31 = vrot.slane %v7027_v27, %v7951_v38 }
 0x284   :  { %v4347_v14 = vadd.f32 %v4123_v13, %v3707_v61  ;;  %v4340_v51 = vadd.f32 %v4060_v45, %v3700_v24  ;;  %v3573_v13 = vrot.slane %v6978_v34, %v7951_v38  ;;  %v4634_v24 = vld [vmem:[%s7600_s0 + $0x58] sm:$0x3]  ;;  %v3510_v45 = vrot.slane %v6985_v39, %v7951_v38 }
 0x285   :  { %v4136_v2 = vpop.permute.xlu0 %4135  ;;  %v4073_v30 = vpop.permute.xlu1 %4072  ;;  %v3708_v20 = vmul.f32 %v4634_v24, %v3492_v52 }
 0x286   :  { %4415 = vst.msk [vmem:[#allocation2 + $0x56] sm:$0x3] %vm7071_vm1, %v4347_v14  ;;  %v4141_v7 = vrot.slane %v4136_v2, %v7951_v38  ;;  %4408 = vst.msk [vmem:[#allocation2 + $0x48] sm:$0x3] %vm7071_vm1, %v4340_v51  ;;  %v4078_v18 = vrot.slane %v4073_v30, %v7951_v38 }
 0x288   :  { %v4349_v62 = vadd.f32 %v4141_v7, %v3709_v12  ;;  %v4342_v0 = vadd.f32 %v4078_v18, %v3702_v21  ;;  %v3717_v12 = vmul.f32 %v4635_v11, %v3573_v13  ;;  %v4636_v7 = vld [vmem:[%s7600_s0 + $0x5c] sm:$0x3]  ;;  %v4637_v18 = vld [vmem:[%s7600_s0 + $0x6e] sm:$0x3]  ;;  %v3600_v11 = vrot.slane %v7052_v53, %v7951_v38  ;;  %v4646_v53 = vld [vmem:[%s7600_s0 + $0x70] sm:$0x3] }
 0x289   :  { %v4154_v41 = vpop.permute.xlu0 %4153  ;;  %v4091_v25 = vpop.permute.xlu1 %4090  ;;  %v3710_v30 = vmul.f32 %v4636_v7, %v3510_v45 }
 0x28a   :  { %4417 = vst.msk [vmem:[#allocation2 + $0x5a] sm:$0x3] %vm7071_vm1, %v4349_v62  ;;  %v4159_v17 = vrot.slane %v4154_v41, %v7951_v38  ;;  %4410 = vst.msk [vmem:[#allocation2 + $0x4c] sm:$0x3] %vm7071_vm1, %v4342_v0  ;;  %v4096_v4 = vrot.slane %v4091_v25, %v7951_v38  ;;  %v3719_v62 = vmul.f32 %v4637_v18, %v3591_v35 }
 0x28b   :  { %v3609_v41 = vrot.slane %v7006_v57, %v7951_v38  ;;  %v3712_v0 = vmul.f32 %v4638_v9, %v3528_v63  ;;  %v3720_v63 = vmul.f32 %v4646_v53, %v3600_v11 }
 0x28c   :  { %v4351_v32 = vadd.f32 %v4159_v17, %v3711_v58  ;;  %v4344_v48 = vadd.f32 %v4096_v4, %v3704_v19  ;;  %v3546_v17 = vrot.slane %v7013_v29, %v7951_v38  ;;  %v4639_v19 = vld [vmem:[%s7600_s0 + $0x72] sm:$0x3]  ;;  %v3627_v4 = vrot.slane %v7020_v28, %v7951_v38 }
 0x28d   :  { %v4172_v42 = vpop.permute.xlu0 %4171  ;;  %v4109_v46 = vpop.permute.xlu1 %4108  ;;  %v3721_v8 = vmul.f32 %v4639_v19, %v3609_v41  ;;  %v4647_v41 = vld [vmem:[%s7600_s0 + $0x74] sm:$0x3]  ;;  %v4649_v19 = vld [vmem:[%s7600_s0 + $0x7c] sm:$0x3] }
 0x28e   :  { %4419 = vst.msk [vmem:[#allocation2 + $0x5e] sm:$0x3] %vm7071_vm1, %v4351_v32  ;;  %v4177_v33 = vrot.slane %v4172_v42, %v7951_v38  ;;  %4412 = vst.msk [vmem:[#allocation2 + $0x50] sm:$0x3] %vm7071_vm1, %v4344_v48  ;;  %v4114_v40 = vrot.slane %v4109_v46, %v7951_v38  ;;  %v4641_v46 = vld [vmem:[%s7600_s0 + $0x76] sm:$0x3] }
 0x28f   :  { %v3723_v26 = vmul.f32 %v4641_v46, %v3627_v4 }
 0x290   :  { %v4353_v23 = vadd.f32 %v4177_v33, %v3713_v54  ;;  %v4346_v1 = vadd.f32 %v4114_v40, %v3706_v56  ;;  %v3714_v54 = vmul.f32 %v4640_v60, %v3546_v17  ;;  %v7970_v56 = vld [vmem:[#allocation32_spill] sm:$0xff] }
 0x291   :  { %v4190_v61 = vpop.permute.xlu0 %4189  ;;  %v4127_v44 = vpop.permute.xlu1 %4126  ;;  %v3645_v52 = vrot.slane %v7970_v56, %v7951_v38 }
 0x292   :  { %4421 = vst.msk [vmem:[#allocation2 + $0x62] sm:$0x3] %vm7071_vm1, %v4353_v23  ;;  %v4195_v22 = vrot.slane %v4190_v61, %v7951_v38  ;;  %4414 = vst.msk [vmem:[#allocation2 + $0x54] sm:$0x3] %vm7071_vm1, %v4346_v1  ;;  %v4132_v34 = vrot.slane %v4127_v44, %v7951_v38  ;;  %v4642_v61 = vld [vmem:[%s7600_s0 + $0x68] sm:$0x3] }
 0x293   :  { %v3716_v15 = vmul.f32 %v4642_v61, %v3564_v31  ;;  %v4643_v44 = vld [vmem:[%s7600_s0 + $0x7a] sm:$0x3] }
 0x294   :  { %v4355_v14 = vadd.f32 %v4195_v22, %v3715_v3  ;;  %v4348_v37 = vadd.f32 %v4132_v34, %v3708_v20  ;;  %v3582_v3 = vrot.slane %v7041_v6, %v7951_v38  ;;  %v3725_v24 = vmul.f32 %v4643_v44, %v3645_v52 }
 0x295   :  { %v4208_v2 = vpop.permute.xlu0 %4207  ;;  %v4145_v51 = vpop.permute.xlu1 %4144  ;;  %v3663_v20 = vrot.slane %v7046_v43, %v7951_v38 }
 0x296   :  { %4423 = vst.msk [vmem:[#allocation2 + $0x66] sm:$0x3] %vm7071_vm1, %v4355_v14  ;;  %v4213_v39 = vrot.slane %v4208_v2, %v7951_v38  ;;  %4416 = vst.msk [vmem:[#allocation2 + $0x58] sm:$0x3] %vm7071_vm1, %v4348_v37  ;;  %v4150_v16 = vrot.slane %v4145_v51, %v7951_v38  ;;  %v4644_v14 = vld [vmem:[%s7600_s0 + $0x6c] sm:$0x3] }
 0x297   :  { %v3718_v2 = vmul.f32 %v4644_v14, %v3582_v3  ;;  %v4645_v37 = vld [vmem:[%s7600_s0 + $0x7e] sm:$0x3] }
 0x298   :  { %v4357_v21 = vadd.f32 %v4213_v39, %v3717_v12  ;;  %v4350_v10 = vadd.f32 %v4150_v16, %v3710_v30  ;;  %v3727_v39 = vmul.f32 %v4645_v37, %v3663_v20  ;;  %v3618_v16 = vrot.slane %v7068_v5, %v7951_v38 }
 0x299   :  { %v4226_v59 = vpop.permute.xlu0 %4225  ;;  %v4163_v58 = vpop.permute.xlu1 %4162 }
 0x29a   :  { %4425 = vst.msk [vmem:[#allocation2 + $0x6a] sm:$0x3] %vm7071_vm1, %v4357_v21  ;;  %v4231_v50 = vrot.slane %v4226_v59, %v7951_v38  ;;  %4418 = vst.msk [vmem:[#allocation2 + $0x5c] sm:$0x3] %vm7071_vm1, %v4350_v10  ;;  %v4168_v57 = vrot.slane %v4163_v58, %v7951_v38  ;;  %v3722_v10 = vmul.f32 %v4647_v41, %v3618_v16 }
 0x29c   :  { %v4359_v25 = vadd.f32 %v4231_v50, %v3719_v62  ;;  %v4352_v32 = vadd.f32 %v4168_v57, %v3712_v0  ;;  %v3636_v50 = vrot.slane %v7085_v47, %v7951_v38  ;;  %v4648_v0 = vld [vmem:[%s7600_s0 + $0x78] sm:$0x3]  ;;  %v3654_v57 = vrot.slane %v7098_v36, %v7951_v38 }
 0x29d   :  { %v4244_v49 = vpop.permute.xlu0 %4243  ;;  %v4181_v42 = vpop.permute.xlu1 %4180 }
 0x29e   :  { %4427 = vst.msk [vmem:[#allocation2 + $0x6e] sm:$0x3] %vm7071_vm1, %v4359_v25  ;;  %v4249_v29 = vrot.slane %v4244_v49, %v7951_v38  ;;  %4420 = vst.msk [vmem:[#allocation2 + $0x60] sm:$0x3] %vm7071_vm1, %v4352_v32  ;;  %v4186_v28 = vrot.slane %v4181_v42, %v7951_v38  ;;  %v3724_v17 = vmul.f32 %v4648_v0, %v3636_v50 }
 0x2a0   :  { %v4361_v48 = vadd.f32 %v4249_v29, %v3721_v8  ;;  %v4354_v40 = vadd.f32 %v4186_v28, %v3714_v54  ;;  %v3726_v8 = vmul.f32 %v4649_v19, %v3654_v57 }
 0x2a1   :  { %v4262_v33 = vpop.permute.xlu0 %4261  ;;  %v4199_v23 = vpop.permute.xlu1 %4198 }
 0x2a2   :  { %4429 = vst.msk [vmem:[#allocation2 + $0x72] sm:$0x3] %vm7071_vm1, %v4361_v48  ;;  %v4267_v27 = vrot.slane %v4262_v33, %v7951_v38  ;;  %4422 = vst.msk [vmem:[#allocation2 + $0x64] sm:$0x3] %vm7071_vm1, %v4354_v40  ;;  %v4204_v13 = vrot.slane %v4199_v23, %v7951_v38 }
 0x2a4   :  { %v4363_v1 = vadd.f32 %v4267_v27, %v3723_v26  ;;  %v4356_v45 = vadd.f32 %v4204_v13, %v3716_v15 }
 0x2a5   :  { %v4280_v22 = vpop.permute.xlu0 %4279  ;;  %v4217_v34 = vpop.permute.xlu1 %4216 }
 0x2a6   :  { %4431 = vst.msk [vmem:[#allocation2 + $0x76] sm:$0x3] %vm7071_vm1, %v4363_v1  ;;  %v4285_v6 = vrot.slane %v4280_v22, %v7951_v38  ;;  %4424 = vst.msk [vmem:[#allocation2 + $0x68] sm:$0x3] %vm7071_vm1, %v4356_v45  ;;  %v4222_v43 = vrot.slane %v4217_v34, %v7951_v38 }
 0x2a8   :  { %v4365_v12 = vadd.f32 %v4285_v6, %v3725_v24  ;;  %v4358_v51 = vadd.f32 %v4222_v43, %v3718_v2 }
 0x2a9   :  { %v4298_v35 = vpop.permute.xlu0 %4297  ;;  %v4235_v30 = vpop.permute.xlu1 %4234 }
 0x2aa   :  { %4433 = vst.msk [vmem:[#allocation2 + $0x7a] sm:$0x3] %vm7071_vm1, %v4365_v12  ;;  %v4303_v7 = vrot.slane %v4298_v35, %v7951_v38  ;;  %4426 = vst.msk [vmem:[#allocation2 + $0x6c] sm:$0x3] %vm7071_vm1, %v4358_v51  ;;  %v4240_v21 = vrot.slane %v4235_v30, %v7951_v38 }
 0x2ac   :  { %v4367_v59 = vadd.f32 %v4303_v7, %v3727_v39  ;;  %v4360_v18 = vadd.f32 %v4240_v21, %v3720_v63 }
 0x2ad   :  { %v4253_v62 = vpop.permute.xlu1 %4252 }
 0x2ae   :  { %4435 = vst.msk [vmem:[#allocation2 + $0x7e] sm:$0x3] %vm7071_vm1, %v4367_v59  ;;  %4428 = vst.msk [vmem:[#allocation2 + $0x70] sm:$0x3] %vm7071_vm1, %v4360_v18  ;;  %v4258_v5 = vrot.slane %v4253_v62, %v7951_v38 }
 0x2b0   :  { %v4362_v58 = vadd.f32 %v4258_v5, %v3722_v10 }
 0x2b1   :  { %v4271_v9 = vpop.permute.xlu1 %4270 }
 0x2b2   :  { %4430 = vst.msk [vmem:[#allocation2 + $0x74] sm:$0x3] %vm7071_vm1, %v4362_v58  ;;  %v4276_v47 = vrot.slane %v4271_v9, %v7951_v38 }
 0x2b4   :  { %v4364_v25 = vadd.f32 %v4276_v47, %v3724_v17 }
 0x2b5   :  { %v4289_v49 = vpop.permute.xlu1 %4288 }
 0x2b6   :  { %4432 = vst.msk [vmem:[#allocation2 + $0x78] sm:$0x3] %vm7071_vm1, %v4364_v25  ;;  %v4294_v4 = vrot.slane %v4289_v49, %v7951_v38 }
 0x2b8   :  { %v4366_v36 = vadd.f32 %v4294_v4, %v3726_v8 }
 0x2ba   :  { %4434 = vst.msk [vmem:[#allocation2 + $0x7c] sm:$0x3] %vm7071_vm1, %v4366_v36 }
 0x2bb   :  { %4661 = shalt.err (!%p4658_p4)
}
 0x2bc   :  { %s4662_s28 = scalar_lea.hbm %s7603_s3, 2048 }
 0x2bd   :  { %p4663_p5 = scmp.ne.s32.totalorder %s7603_s3, %s4662_s28  ;;  %p4666_p6 = scmp.lt.u32.totalorder %s4662_s28, %s7603_s3 }
 0x2bf   :  { %p4668_p7 = pnand %p4666_p6, %p4663_p5 }
 0x2c1   :  { %4671 = shalt.err (!%p4668_p7)
}
 0x2c2   :  { %s4676_s6 = smov 32   ;;  %s4677_s1 = smov 2  }
 0x2c3   :  { %4447 = dma.vmem_to_hbm [thread:$0]  %s4442_s23, 2048, %s7603_s3, [#allocation3], %s4676_s6, %s4676_s6, %s4677_s1  }
 0x2c4   :  { %4672 = dma.done.wait [#allocation3], 2048  }
 0x2c5   :  { %4673 = vsyncadd [#allocation3], 4294965248 }
 0x2c6   :  { %4451 = vsyncpa [#allocation3], 1 }

</bundles_post_ra>
